<compile_context>
chip_gen: v6e
topology: v6e:2x2x1
jax: 0.10.0
libtpu: 0.0.40
codegen_flags: <defaults>
</compile_context>

<pallas_src>
from functools import partial

import jax
import jax.numpy as jnp
from jax import lax
from jax.experimental import pallas as pl
from jax.experimental.pallas import tpu as pltpu

BN_EPS = 1e-5
VMEM_LIMIT = 32 * 1024 * 1024     # raise v5e's 16 MiB default; safe on v6e/v7x


def _pick_tile_n(n):
    """Largest point tile (multiple of 8, <=1024) dividing N; else whole N."""
    for cand in (1024, 512, 256, 128, 64, 32, 16, 8):
        if n % cand == 0:
            return cand
    return n


def _const_spec(shape):
    """BlockSpec for a parameter that is DMA'd once and stays VMEM-resident."""
    return pl.BlockSpec(shape, lambda bi, ti: (0,) * len(shape))


# ---------------------------------------------------------------------------
# conv-stack kernels (Conv1d with kernel_size=1 == per-point matmul)
# ---------------------------------------------------------------------------

def _conv_pass_kernel(*refs, apply_prev):
    """One point tile: [bn+relu of previous layer] -> bf16 matmul -> stats."""
    if apply_prev:
        scale_ref, shift_ref, x_ref, w_ref, b_ref, z_ref, sum_ref, sq_ref = refs
    else:
        x_ref, w_ref, b_ref, z_ref, sum_ref, sq_ref = refs

    x = x_ref[0]                                            # (tile_n, Cin)
    if apply_prev:
        h32 = x.astype(jnp.float32) * scale_ref[...] + shift_ref[...]
        h = jnp.maximum(h32, 0.0).astype(jnp.bfloat16)
    else:
        h = x.astype(jnp.bfloat16)

    z = jnp.dot(h, w_ref[...], preferred_element_type=jnp.float32) + b_ref[...]
    z_ref[0] = z.astype(z_ref.dtype)

    # Cross-tile BatchNorm statistics (single pass: sum + sum of squares, f32).
    @pl.when(jnp.logical_and(pl.program_id(0) == 0, pl.program_id(1) == 0))
    def _():
        sum_ref[...] = jnp.zeros_like(sum_ref)
        sq_ref[...] = jnp.zeros_like(sq_ref)

    sum_ref[...] += jnp.sum(z, axis=0, keepdims=True)
    sq_ref[...] += jnp.sum(z * z, axis=0, keepdims=True)


def _conv_pool_kernel(scale_ref, shift_ref, x_ref, w_ref, b_ref,
                      sum_ref, sq_ref, zmax_ref, zmin_ref):
    """Last conv layer: bn2+relu -> matmul -> stats + running per-batch max/min."""
    b_i = pl.program_id(0)
    t_i = pl.program_id(1)

    h32 = x_ref[0].astype(jnp.float32) * scale_ref[...] + shift_ref[...]
    h = jnp.maximum(h32, 0.0).astype(jnp.bfloat16)
    z = jnp.dot(h, w_ref[...], preferred_element_type=jnp.float32) + b_ref[...]

    @pl.when(jnp.logical_and(b_i == 0, t_i == 0))
    def _():
        sum_ref[...] = jnp.zeros_like(sum_ref)
        sq_ref[...] = jnp.zeros_like(sq_ref)

    sum_ref[...] += jnp.sum(z, axis=0, keepdims=True)
    sq_ref[...] += jnp.sum(z * z, axis=0, keepdims=True)

    tile_max = jnp.max(z, axis=0, keepdims=True)            # (1, Cout)
    tile_min = jnp.min(z, axis=0, keepdims=True)

    @pl.when(t_i == 0)
    def _():
        zmax_ref[0] = tile_max
        zmin_ref[0] = tile_min

    @pl.when(t_i > 0)
    def _():
        zmax_ref[0] = jnp.maximum(zmax_ref[0], tile_max)
        zmin_ref[0] = jnp.minimum(zmin_ref[0], tile_min)


# ---------------------------------------------------------------------------
# fc head kernel (pool finalize + fc4 + fc5 + transform) -- tiny, gridless
# ---------------------------------------------------------------------------

def _head_kernel(zmax_ref, zmin_ref, sc3_ref, sh3_ref,
                 w4_ref, b4_ref, g4_ref, be4_ref,
                 w5_ref, b5_ref, g5_ref, be5_ref,
                 w6_ref, b6_ref, out_ref):
    # MaxPool1d(N) of relu(bn3(z3)): relu/affine are monotone per channel, so
    # only the per-batch max and min of z3 are needed.
    sc3 = sc3_ref[...]
    zbest = jnp.maximum(zmax_ref[...] * sc3, zmin_ref[...] * sc3)
    pooled = jnp.maximum(zbest + sh3_ref[...], 0.0)          # (B, 1024)

    def fc_bn_relu(h, w_ref, b_ref, g_ref, be_ref):
        z = jnp.dot(h.astype(jnp.bfloat16), w_ref[...],
                    preferred_element_type=jnp.float32) + b_ref[...]
        mean = jnp.mean(z, axis=0, keepdims=True)
        var = jnp.maximum(jnp.mean(z * z, axis=0, keepdims=True) - mean * mean, 0.0)
        scale = g_ref[...] * lax.rsqrt(var + BN_EPS)
        shift = be_ref[...] - mean * scale
        return jnp.maximum(z * scale + shift, 0.0)

    h = fc_bn_relu(pooled, w4_ref, b4_ref, g4_ref, be4_ref)  # (B, 512)
    h = fc_bn_relu(h, w5_ref, b5_ref, g5_ref, be5_ref)       # (B, 256)
    out_ref[...] = jnp.dot(h.astype(jnp.bfloat16), w6_ref[...],
                           preferred_element_type=jnp.float32) + b6_ref[...]


# ---------------------------------------------------------------------------
# pallas_call wrappers
# ---------------------------------------------------------------------------

def _conv_pass(x, w, b, scale, shift, tile_n):
    B, N, Cin = x.shape
    Cout = w.shape[1]
    grid = (B, N // tile_n)
    x_spec = pl.BlockSpec((1, tile_n, Cin), lambda bi, ti: (bi, ti, 0))

    if scale is None:
        kernel = partial(_conv_pass_kernel, apply_prev=False)
        inputs = (x, w, b)
        in_specs = [x_spec, _const_spec((Cin, Cout)), _const_spec((1, Cout))]
    else:
        kernel = partial(_conv_pass_kernel, apply_prev=True)
        inputs = (scale, shift, x, w, b)
        in_specs = [_const_spec((1, Cin)), _const_spec((1, Cin)),
                    x_spec, _const_spec((Cin, Cout)), _const_spec((1, Cout))]

    out_shape = (
        jax.ShapeDtypeStruct((B, N, Cout), jnp.bfloat16),    # pre-BN activations
        jax.ShapeDtypeStruct((1, Cout), jnp.float32),        # per-channel sum
        jax.ShapeDtypeStruct((1, Cout), jnp.float32),        # per-channel sum sq
    )
    out_specs = (
        pl.BlockSpec((1, tile_n, Cout), lambda bi, ti: (bi, ti, 0)),
        _const_spec((1, Cout)),
        _const_spec((1, Cout)),
    )
    return pl.pallas_call(
        kernel,
        grid=grid,
        in_specs=in_specs,
        out_specs=out_specs,
        out_shape=out_shape,
        compiler_params=pltpu.CompilerParams(
            dimension_semantics=("arbitrary", "arbitrary"),
            vmem_limit_bytes=VMEM_LIMIT),
    )(*inputs)


def _conv_pool_pass(x, w, b, scale, shift, tile_n):
    B, N, Cin = x.shape
    Cout = w.shape[1]
    grid = (B, N // tile_n)

    in_specs = [_const_spec((1, Cin)), _const_spec((1, Cin)),
                pl.BlockSpec((1, tile_n, Cin), lambda bi, ti: (bi, ti, 0)),
                _const_spec((Cin, Cout)), _const_spec((1, Cout))]
    out_shape = (
        jax.ShapeDtypeStruct((1, Cout), jnp.float32),        # sum
        jax.ShapeDtypeStruct((1, Cout), jnp.float32),        # sum of squares
        jax.ShapeDtypeStruct((B, 1, Cout), jnp.float32),     # per-batch max of z3
        jax.ShapeDtypeStruct((B, 1, Cout), jnp.float32),     # per-batch min of z3
    )
    out_specs = (
        _const_spec((1, Cout)),
        _const_spec((1, Cout)),
        pl.BlockSpec((1, 1, Cout), lambda bi, ti: (bi, 0, 0)),
        pl.BlockSpec((1, 1, Cout), lambda bi, ti: (bi, 0, 0)),
    )
    return pl.pallas_call(
        _conv_pool_kernel,
        grid=grid,
        in_specs=in_specs,
        out_specs=out_specs,
        out_shape=out_shape,
        compiler_params=pltpu.CompilerParams(
            dimension_semantics=("arbitrary", "arbitrary"),
            vmem_limit_bytes=VMEM_LIMIT),
    )(scale, shift, x, w, b)


def _bn_scale_shift(s, sq, gamma, beta, count):
    """Finalize training-mode BN: fold mean/var/gamma/beta into scale & shift."""
    mean = s / count
    var = jnp.maximum(sq / count - mean * mean, 0.0)         # biased variance, f32
    scale = gamma * lax.rsqrt(var + BN_EPS)
    shift = beta - mean * scale
    return scale, shift


def _head(zmax, zmin, sc3, sh3, p):
    B = zmax.shape[0]
    vmem = pl.BlockSpec(memory_space=pltpu.MemorySpace.VMEM)
    args = (zmax, zmin, sc3, sh3,
            p['w4'].astype(jnp.bfloat16), p['b4'], p['g4'], p['be4'],
            p['w5'].astype(jnp.bfloat16), p['b5'], p['g5'], p['be5'],
            p['w6'].astype(jnp.bfloat16), p['b6'])
    return pl.pallas_call(
        _head_kernel,
        out_shape=jax.ShapeDtypeStruct((B, 9), jnp.float32),
        in_specs=[vmem] * len(args),
        out_specs=vmem,
        compiler_params=pltpu.CompilerParams(vmem_limit_bytes=VMEM_LIMIT),
    )(*args)


def input_transform_net(x, params):
    """x: (B, 3, N) float32, PyTorch NCW layout.  Returns (B, 3, 3) float32."""
    B, C, N = x.shape
    assert C == 3
    tile_n = _pick_tile_n(N)
    count = float(B * N)

    # Channels-last layout; pad Cin 3 -> 8 (lane/sublane-friendlier first layer).
    x_cl = jnp.transpose(x, (0, 2, 1))                       # (B, N, 3)
    x_cl = jnp.pad(x_cl, ((0, 0), (0, 0), (0, 5))).astype(jnp.bfloat16)

    w1 = jnp.pad(params['w1'], ((0, 5), (0, 0))).astype(jnp.bfloat16)   # (8, 64)
    w2 = params['w2'].astype(jnp.bfloat16)
    w3 = params['w3'].astype(jnp.bfloat16)

    # conv_block_1: matmul + stats (its BN+ReLU is applied in the next pass)
    z1, s1, q1 = _conv_pass(x_cl, w1, params['b1'], None, None, tile_n)
    sc1, sh1 = _bn_scale_shift(s1, q1, params['g1'], params['be1'], count)

    # conv_block_2
    z2, s2, q2 = _conv_pass(z1, w2, params['b2'], sc1, sh1, tile_n)
    sc2, sh2 = _bn_scale_shift(s2, q2, params['g2'], params['be2'], count)

    # conv_block_3 + running max/min for MaxPool1d(N)
    s3, q3, zmax, zmin = _conv_pool_pass(z2, w3, params['b3'], sc2, sh2, tile_n)
    sc3, sh3 = _bn_scale_shift(s3, q3, params['g3'], params['be3'], count)

    # fc head: pool finalize + fc4 + fc5 + transform
    out = _head(zmax.reshape(B, -1), zmin.reshape(B, -1), sc3, sh3, params)
    return out.reshape(B, 3, 3)


def init_params(key):
    """Deterministic parameter init mirroring the PyTorch module's shapes/init."""
    def linear_params(k, cin, cout):
        k1, k2 = jax.random.split(k)
        bound = 1.0 / (cin ** 0.5)                           # PyTorch default uniform
        w = jax.random.uniform(k1, (cin, cout), jnp.float32, -bound, bound)
        b = jax.random.uniform(k2, (1, cout), jnp.float32, -bound, bound)
        return w, b

    keys = jax.random.split(key, 5)
    dims = [(3, 64), (64, 128), (128, 1024), (1024, 512), (512, 256)]
    p = {}
    for i, (k, (cin, cout)) in enumerate(zip(keys, dims), start=1):
        w, b = linear_params(k, cin, cout)
        p[f'w{i}'] = w
        p[f'b{i}'] = b
        p[f'g{i}'] = jnp.ones((1, cout), jnp.float32)        # BN gamma
        p[f'be{i}'] = jnp.zeros((1, cout), jnp.float32)      # BN beta
    # transform: init.constant_(weight, 0); init.eye_(bias.view(3, 3))
    p['w6'] = jnp.zeros((256, 9), jnp.float32)
    p['b6'] = jnp.eye(3, dtype=jnp.float32).reshape(1, 9)
    return p


if __name__ == "__main__":
    key = jax.random.PRNGKey(0)
    kx, kp = jax.random.split(key)

    B, N = 2, 16                                             # small demo point cloud
    x = jax.random.normal(kx, (B, 3, N), jnp.float32)
    params = init_params(kp)

    fwd = jax.jit(input_transform_net)
    out = jax.block_until_ready(fwd(x, params))

    assert out.shape == (B, 3, 3) and out.dtype == jnp.float32
    # At init the transform layer is weight=0 / bias=identity, so the output must
    # equal the 3x3 identity (any upstream NaN would poison this through the dot).
    assert bool(jnp.allclose(out, jnp.eye(3, dtype=jnp.float32)[None], atol=1e-5))
    print("KERNEL_OK")
</pallas_src>

<mosaic_0001>
module attributes {stable_mosaic.version = 11 : i64} {
  func.func @_conv_pass_kernel(%arg0: i32, %arg1: i32, %arg2: memref<1x16x8xbf16, #tpu.memory_space<vmem>>, %arg3: memref<8x64xbf16, #tpu.memory_space<vmem>>, %arg4: memref<1x64xf32, #tpu.memory_space<vmem>>, %arg5: memref<1x16x64xbf16, #tpu.memory_space<vmem>>, %arg6: memref<1x64xf32, #tpu.memory_space<vmem>>, %arg7: memref<1x64xf32, #tpu.memory_space<vmem>>) attributes {dimension_semantics = [#tpu.dimension_semantics<arbitrary>, #tpu.dimension_semantics<arbitrary>], iteration_bounds = array<i64: 2, 1>, scalar_prefetch = 0 : i64, scratch_operands = 0 : i64, tpu.core_type = #tpu.core_type<tc>, window_params = [{transform_indices = @transform_0, window_bounds = array<i64: 1, 16, 8>}, {pipeline_mode = #tpu.pipeline_mode<synchronous>, transform_indices = @transform_1, window_bounds = array<i64: 8, 64>}, {pipeline_mode = #tpu.pipeline_mode<synchronous>, transform_indices = @transform_2, window_bounds = array<i64: 1, 64>}, {transform_indices = @transform_3, window_bounds = array<i64: 1, 16, 64>}, {pipeline_mode = #tpu.pipeline_mode<synchronous>, transform_indices = @transform_4, window_bounds = array<i64: 1, 64>}, {pipeline_mode = #tpu.pipeline_mode<synchronous>, transform_indices = @transform_5, window_bounds = array<i64: 1, 64>}]} {
    %c0 = arith.constant 0 : index
    %c0_0 = arith.constant 0 : index
    %c0_1 = arith.constant 0 : index
    %0 = vector.load %arg2[%c0, %c0_0, %c0_1] : memref<1x16x8xbf16, #tpu.memory_space<vmem>>, vector<1x16x8xbf16>
    %1 = vector.shape_cast %0 : vector<1x16x8xbf16> to vector<16x8xbf16>
    %c0_2 = arith.constant 0 : index
    %c0_3 = arith.constant 0 : index
    %2 = vector.load %arg3[%c0_2, %c0_3] : memref<8x64xbf16, #tpu.memory_space<vmem>>, vector<8x64xbf16>
    %cst = arith.constant dense<0.000000e+00> : vector<16x64xf32>
    %3 = tpu.matmul %1, %2, %cst {dimension_numbers = #tpu.dot_dimension_numbers<[1], [0], [0], [1], [0, 0, 1, 1], [], []>} : vector<16x8xbf16>, vector<8x64xbf16>, vector<16x64xf32> -> vector<16x64xf32>
    %c0_4 = arith.constant 0 : index
    %c0_5 = arith.constant 0 : index
    %4 = vector.load %arg4[%c0_4, %c0_5] : memref<1x64xf32, #tpu.memory_space<vmem>>, vector<1x64xf32>
    %5 = vector.broadcast %4 : vector<1x64xf32> to vector<16x64xf32>
    %6 = arith.addf %3, %5 : vector<16x64xf32>
    %7 = arith.truncf %6 : vector<16x64xf32> to vector<16x64xbf16>
    %c0_6 = arith.constant 0 : index
    %c0_7 = arith.constant 0 : index
    %c0_8 = arith.constant 0 : index
    %8 = vector.load %arg5[%c0_6, %c0_7, %c0_8] : memref<1x16x64xbf16, #tpu.memory_space<vmem>>, vector<1x16x64xbf16>
    %9 = vector.shape_cast %8 : vector<1x16x64xbf16> to vector<16x64xbf16>
    %10 = vector.shape_cast %7 : vector<16x64xbf16> to vector<1x16x64xbf16>
    tpu.vector_store %arg5[%c0_6, %c0_7, %c0_8], %10 {strides = array<i32>} : memref<1x16x64xbf16, #tpu.memory_space<vmem>>, vector<1x16x64xbf16>,
    %c0_i32 = arith.constant 0 : i32
    %11 = arith.cmpi eq, %arg0, %c0_i32 : i32
    %c0_i32_9 = arith.constant 0 : i32
    %12 = arith.cmpi eq, %arg1, %c0_i32_9 : i32
    %13 = arith.andi %11, %12 : i1
    %14 = arith.extui %13 : i1 to i32
    %c0_i32_10 = arith.constant 0 : i32
    %15 = arith.cmpi ne, %14, %c0_i32_10 : i32
    scf.if %15 {
      %cst_21 = arith.constant 0.000000e+00 : f32
      %27 = vector.broadcast %cst_21 : f32 to vector<1x64xf32>
      %c0_22 = arith.constant 0 : index
      %c0_23 = arith.constant 0 : index
      %28 = vector.load %arg6[%c0_22, %c0_23] : memref<1x64xf32, #tpu.memory_space<vmem>>, vector<1x64xf32>
      tpu.vector_store %arg6[%c0_22, %c0_23], %27 {strides = array<i32>} : memref<1x64xf32, #tpu.memory_space<vmem>>, vector<1x64xf32>,
      %cst_24 = arith.constant 0.000000e+00 : f32
      %29 = vector.broadcast %cst_24 : f32 to vector<1x64xf32>
      %c0_25 = arith.constant 0 : index
      %c0_26 = arith.constant 0 : index
      %30 = vector.load %arg7[%c0_25, %c0_26] : memref<1x64xf32, #tpu.memory_space<vmem>>, vector<1x64xf32>
      tpu.vector_store %arg7[%c0_25, %c0_26], %29 {strides = array<i32>} : memref<1x64xf32, #tpu.memory_space<vmem>>, vector<1x64xf32>,
    } else {
    }
    %c0_11 = arith.constant 0 : index
    %c0_12 = arith.constant 0 : index
    %16 = vector.load %arg6[%c0_11, %c0_12] : memref<1x64xf32, #tpu.memory_space<vmem>>, vector<1x64xf32>
    %cst_13 = arith.constant dense<0.000000e+00> : vector<64xf32>
    %17 = vector.multi_reduction <add>, %6, %cst_13 [0] : vector<16x64xf32> to vector<64xf32>
    %18 = vector.shape_cast %17 : vector<64xf32> to vector<1x64xf32>
    %19 = arith.addf %16, %18 : vector<1x64xf32>
    %c0_14 = arith.constant 0 : index
    %c0_15 = arith.constant 0 : index
    %20 = vector.load %arg6[%c0_14, %c0_15] : memref<1x64xf32, #tpu.memory_space<vmem>>, vector<1x64xf32>
    tpu.vector_store %arg6[%c0_14, %c0_15], %19 {strides = array<i32>} : memref<1x64xf32, #tpu.memory_space<vmem>>, vector<1x64xf32>,
    %c0_16 = arith.constant 0 : index
    %c0_17 = arith.constant 0 : index
    %21 = vector.load %arg7[%c0_16, %c0_17] : memref<1x64xf32, #tpu.memory_space<vmem>>, vector<1x64xf32>
    %22 = arith.mulf %6, %6 : vector<16x64xf32>
    %cst_18 = arith.constant dense<0.000000e+00> : vector<64xf32>
    %23 = vector.multi_reduction <add>, %22, %cst_18 [0] : vector<16x64xf32> to vector<64xf32>
    %24 = vector.shape_cast %23 : vector<64xf32> to vector<1x64xf32>
    %25 = arith.addf %21, %24 : vector<1x64xf32>
    %c0_19 = arith.constant 0 : index
    %c0_20 = arith.constant 0 : index
    %26 = vector.load %arg7[%c0_19, %c0_20] : memref<1x64xf32, #tpu.memory_space<vmem>>, vector<1x64xf32>
    tpu.vector_store %arg7[%c0_19, %c0_20], %25 {strides = array<i32>} : memref<1x64xf32, #tpu.memory_space<vmem>>, vector<1x64xf32>,
    return
  }
  func.func @transform_0(%arg0: i32, %arg1: i32) -> (i32, i32, i32) {
    %c0_i32 = arith.constant 0 : i32
    %c0_i32_0 = arith.constant 0 : i32
    return %arg0, %arg1, %c0_i32 : i32, i32, i32
  }
  func.func @transform_1(%arg0: i32, %arg1: i32) -> (i32, i32) {
    %c0_i32 = arith.constant 0 : i32
    %c0_i32_0 = arith.constant 0 : i32
    %c0_i32_1 = arith.constant 0 : i32
    return %c0_i32, %c0_i32_0 : i32, i32
  }
  func.func @transform_2(%arg0: i32, %arg1: i32) -> (i32, i32) {
    %c0_i32 = arith.constant 0 : i32
    %c0_i32_0 = arith.constant 0 : i32
    %c0_i32_1 = arith.constant 0 : i32
    return %c0_i32, %c0_i32_0 : i32, i32
  }
  func.func @transform_3(%arg0: i32, %arg1: i32) -> (i32, i32, i32) {
    %c0_i32 = arith.constant 0 : i32
    %c0_i32_0 = arith.constant 0 : i32
    return %arg0, %arg1, %c0_i32 : i32, i32, i32
  }
  func.func @transform_4(%arg0: i32, %arg1: i32) -> (i32, i32) {
    %c0_i32 = arith.constant 0 : i32
    %c0_i32_0 = arith.constant 0 : i32
    %c0_i32_1 = arith.constant 0 : i32
    return %c0_i32, %c0_i32_0 : i32, i32
  }
  func.func @transform_5(%arg0: i32, %arg1: i32) -> (i32, i32) {
    %c0_i32 = arith.constant 0 : i32
    %c0_i32_0 = arith.constant 0 : i32
    %c0_i32_1 = arith.constant 0 : i32
    return %c0_i32, %c0_i32_0 : i32, i32
  }
}

module attributes {stable_mosaic.version = 11 : i64} {
  func.func @_conv_pass_kernel(%arg0: i32, %arg1: i32, %arg2: memref<1x64xf32, #tpu.memory_space<vmem>>, %arg3: memref<1x64xf32, #tpu.memory_space<vmem>>, %arg4: memref<1x16x64xbf16, #tpu.memory_space<vmem>>, %arg5: memref<64x128xbf16, #tpu.memory_space<vmem>>, %arg6: memref<1x128xf32, #tpu.memory_space<vmem>>, %arg7: memref<1x16x128xbf16, #tpu.memory_space<vmem>>, %arg8: memref<1x128xf32, #tpu.memory_space<vmem>>, %arg9: memref<1x128xf32, #tpu.memory_space<vmem>>) attributes {dimension_semantics = [#tpu.dimension_semantics<arbitrary>, #tpu.dimension_semantics<arbitrary>], iteration_bounds = array<i64: 2, 1>, scalar_prefetch = 0 : i64, scratch_operands = 0 : i64, tpu.core_type = #tpu.core_type<tc>, window_params = [{pipeline_mode = #tpu.pipeline_mode<synchronous>, transform_indices = @transform_0, window_bounds = array<i64: 1, 64>}, {pipeline_mode = #tpu.pipeline_mode<synchronous>, transform_indices = @transform_1, window_bounds = array<i64: 1, 64>}, {transform_indices = @transform_2, window_bounds = array<i64: 1, 16, 64>}, {pipeline_mode = #tpu.pipeline_mode<synchronous>, transform_indices = @transform_3, window_bounds = array<i64: 64, 128>}, {pipeline_mode = #tpu.pipeline_mode<synchronous>, transform_indices = @transform_4, window_bounds = array<i64: 1, 128>}, {transform_indices = @transform_5, window_bounds = array<i64: 1, 16, 128>}, {pipeline_mode = #tpu.pipeline_mode<synchronous>, transform_indices = @transform_6, window_bounds = array<i64: 1, 128>}, {pipeline_mode = #tpu.pipeline_mode<synchronous>, transform_indices = @transform_7, window_bounds = array<i64: 1, 128>}]} {
    %c0 = arith.constant 0 : index
    %c0_0 = arith.constant 0 : index
    %c0_1 = arith.constant 0 : index
    %0 = vector.load %arg4[%c0, %c0_0, %c0_1] : memref<1x16x64xbf16, #tpu.memory_space<vmem>>, vector<1x16x64xbf16>
    %1 = vector.shape_cast %0 : vector<1x16x64xbf16> to vector<16x64xbf16>
    %2 = arith.extf %1 : vector<16x64xbf16> to vector<16x64xf32>
    %c0_2 = arith.constant 0 : index
    %c0_3 = arith.constant 0 : index
    %3 = vector.load %arg2[%c0_2, %c0_3] : memref<1x64xf32, #tpu.memory_space<vmem>>, vector<1x64xf32>
    %4 = vector.broadcast %3 : vector<1x64xf32> to vector<16x64xf32>
    %5 = arith.mulf %2, %4 : vector<16x64xf32>
    %c0_4 = arith.constant 0 : index
    %c0_5 = arith.constant 0 : index
    %6 = vector.load %arg3[%c0_4, %c0_5] : memref<1x64xf32, #tpu.memory_space<vmem>>, vector<1x64xf32>
    %7 = vector.broadcast %6 : vector<1x64xf32> to vector<16x64xf32>
    %8 = arith.addf %5, %7 : vector<16x64xf32>
    %cst = arith.constant 0.000000e+00 : f32
    %9 = vector.broadcast %cst : f32 to vector<16x64xf32>
    %10 = arith.maximumf %8, %9 : vector<16x64xf32>
    %11 = arith.truncf %10 : vector<16x64xf32> to vector<16x64xbf16>
    %c0_6 = arith.constant 0 : index
    %c0_7 = arith.constant 0 : index
    %12 = vector.load %arg5[%c0_6, %c0_7] : memref<64x128xbf16, #tpu.memory_space<vmem>>, vector<64x128xbf16>
    %cst_8 = arith.constant dense<0.000000e+00> : vector<16x128xf32>
    %13 = tpu.matmul %11, %12, %cst_8 {dimension_numbers = #tpu.dot_dimension_numbers<[1], [0], [0], [1], [0, 0, 1, 1], [], []>} : vector<16x64xbf16>, vector<64x128xbf16>, vector<16x128xf32> -> vector<16x128xf32>
    %c0_9 = arith.constant 0 : index
    %c0_10 = arith.constant 0 : index
    %14 = vector.load %arg6[%c0_9, %c0_10] : memref<1x128xf32, #tpu.memory_space<vmem>>, vector<1x128xf32>
    %15 = vector.broadcast %14 : vector<1x128xf32> to vector<16x128xf32>
    %16 = arith.addf %13, %15 : vector<16x128xf32>
    %17 = arith.truncf %16 : vector<16x128xf32> to vector<16x128xbf16>
    %c0_11 = arith.constant 0 : index
    %c0_12 = arith.constant 0 : index
    %c0_13 = arith.constant 0 : index
    %18 = vector.load %arg7[%c0_11, %c0_12, %c0_13] : memref<1x16x128xbf16, #tpu.memory_space<vmem>>, vector<1x16x128xbf16>
    %19 = vector.shape_cast %18 : vector<1x16x128xbf16> to vector<16x128xbf16>
    %20 = vector.shape_cast %17 : vector<16x128xbf16> to vector<1x16x128xbf16>
    tpu.vector_store %arg7[%c0_11, %c0_12, %c0_13], %20 {strides = array<i32>} : memref<1x16x128xbf16, #tpu.memory_space<vmem>>, vector<1x16x128xbf16>,
    %c0_i32 = arith.constant 0 : i32
    %21 = arith.cmpi eq, %arg0, %c0_i32 : i32
    %c0_i32_14 = arith.constant 0 : i32
    %22 = arith.cmpi eq, %arg1, %c0_i32_14 : i32
    %23 = arith.andi %21, %22 : i1
    %24 = arith.extui %23 : i1 to i32
    %c0_i32_15 = arith.constant 0 : i32
    %25 = arith.cmpi ne, %24, %c0_i32_15 : i32
    scf.if %25 {
      %cst_26 = arith.constant 0.000000e+00 : f32
      %37 = vector.broadcast %cst_26 : f32 to vector<1x128xf32>
      %c0_27 = arith.constant 0 : index
      %c0_28 = arith.constant 0 : index
      %38 = vector.load %arg8[%c0_27, %c0_28] : memref<1x128xf32, #tpu.memory_space<vmem>>, vector<1x128xf32>
      tpu.vector_store %arg8[%c0_27, %c0_28], %37 {strides = array<i32>} : memref<1x128xf32, #tpu.memory_space<vmem>>, vector<1x128xf32>,
      %cst_29 = arith.constant 0.000000e+00 : f32
      %39 = vector.broadcast %cst_29 : f32 to vector<1x128xf32>
      %c0_30 = arith.constant 0 : index
      %c0_31 = arith.constant 0 : index
      %40 = vector.load %arg9[%c0_30, %c0_31] : memref<1x128xf32, #tpu.memory_space<vmem>>, vector<1x128xf32>
      tpu.vector_store %arg9[%c0_30, %c0_31], %39 {strides = array<i32>} : memref<1x128xf32, #tpu.memory_space<vmem>>, vector<1x128xf32>,
    } else {
    }
    %c0_16 = arith.constant 0 : index
    %c0_17 = arith.constant 0 : index
    %26 = vector.load %arg8[%c0_16, %c0_17] : memref<1x128xf32, #tpu.memory_space<vmem>>, vector<1x128xf32>
    %cst_18 = arith.constant dense<0.000000e+00> : vector<128xf32>
    %27 = vector.multi_reduction <add>, %16, %cst_18 [0] : vector<16x128xf32> to vector<128xf32>
    %28 = vector.shape_cast %27 : vector<128xf32> to vector<1x128xf32>
    %29 = arith.addf %26, %28 : vector<1x128xf32>
    %c0_19 = arith.constant 0 : index
    %c0_20 = arith.constant 0 : index
    %30 = vector.load %arg8[%c0_19, %c0_20] : memref<1x128xf32, #tpu.memory_space<vmem>>, vector<1x128xf32>
    tpu.vector_store %arg8[%c0_19, %c0_20], %29 {strides = array<i32>} : memref<1x128xf32, #tpu.memory_space<vmem>>, vector<1x128xf32>,
    %c0_21 = arith.constant 0 : index
    %c0_22 = arith.constant 0 : index
    %31 = vector.load %arg9[%c0_21, %c0_22] : memref<1x128xf32, #tpu.memory_space<vmem>>, vector<1x128xf32>
    %32 = arith.mulf %16, %16 : vector<16x128xf32>
    %cst_23 = arith.constant dense<0.000000e+00> : vector<128xf32>
    %33 = vector.multi_reduction <add>, %32, %cst_23 [0] : vector<16x128xf32> to vector<128xf32>
    %34 = vector.shape_cast %33 : vector<128xf32> to vector<1x128xf32>
    %35 = arith.addf %31, %34 : vector<1x128xf32>
    %c0_24 = arith.constant 0 : index
    %c0_25 = arith.constant 0 : index
    %36 = vector.load %arg9[%c0_24, %c0_25] : memref<1x128xf32, #tpu.memory_space<vmem>>, vector<1x128xf32>
    tpu.vector_store %arg9[%c0_24, %c0_25], %35 {strides = array<i32>} : memref<1x128xf32, #tpu.memory_space<vmem>>, vector<1x128xf32>,
    return
  }
  func.func @transform_0(%arg0: i32, %arg1: i32) -> (i32, i32) {
    %c0_i32 = arith.constant 0 : i32
    %c0_i32_0 = arith.constant 0 : i32
    %c0_i32_1 = arith.constant 0 : i32
    return %c0_i32, %c0_i32_0 : i32, i32
  }
  func.func @transform_1(%arg0: i32, %arg1: i32) -> (i32, i32) {
    %c0_i32 = arith.constant 0 : i32
    %c0_i32_0 = arith.constant 0 : i32
    %c0_i32_1 = arith.constant 0 : i32
    return %c0_i32, %c0_i32_0 : i32, i32
  }
  func.func @transform_2(%arg0: i32, %arg1: i32) -> (i32, i32, i32) {
    %c0_i32 = arith.constant 0 : i32
    %c0_i32_0 = arith.constant 0 : i32
    return %arg0, %arg1, %c0_i32 : i32, i32, i32
  }
  func.func @transform_3(%arg0: i32, %arg1: i32) -> (i32, i32) {
    %c0_i32 = arith.constant 0 : i32
    %c0_i32_0 = arith.constant 0 : i32
    %c0_i32_1 = arith.constant 0 : i32
    return %c0_i32, %c0_i32_0 : i32, i32
  }
  func.func @transform_4(%arg0: i32, %arg1: i32) -> (i32, i32) {
    %c0_i32 = arith.constant 0 : i32
    %c0_i32_0 = arith.constant 0 : i32
    %c0_i32_1 = arith.constant 0 : i32
    return %c0_i32, %c0_i32_0 : i32, i32
  }
  func.func @transform_5(%arg0: i32, %arg1: i32) -> (i32, i32, i32) {
    %c0_i32 = arith.constant 0 : i32
    %c0_i32_0 = arith.constant 0 : i32
    return %arg0, %arg1, %c0_i32 : i32, i32, i32
  }
  func.func @transform_6(%arg0: i32, %arg1: i32) -> (i32, i32) {
    %c0_i32 = arith.constant 0 : i32
    %c0_i32_0 = arith.constant 0 : i32
    %c0_i32_1 = arith.constant 0 : i32
    return %c0_i32, %c0_i32_0 : i32, i32
  }
  func.func @transform_7(%arg0: i32, %arg1: i32) -> (i32, i32) {
    %c0_i32 = arith.constant 0 : i32
    %c0_i32_0 = arith.constant 0 : i32
    %c0_i32_1 = arith.constant 0 : i32
    return %c0_i32, %c0_i32_0 : i32, i32
  }
}

module attributes {stable_mosaic.version = 11 : i64} {
  func.func @_conv_pool_kernel(%arg0: i32, %arg1: i32, %arg2: memref<1x128xf32, #tpu.memory_space<vmem>>, %arg3: memref<1x128xf32, #tpu.memory_space<vmem>>, %arg4: memref<1x16x128xbf16, #tpu.memory_space<vmem>>, %arg5: memref<128x1024xbf16, #tpu.memory_space<vmem>>, %arg6: memref<1x1024xf32, #tpu.memory_space<vmem>>, %arg7: memref<1x1024xf32, #tpu.memory_space<vmem>>, %arg8: memref<1x1024xf32, #tpu.memory_space<vmem>>, %arg9: memref<1x1x1024xf32, #tpu.memory_space<vmem>>, %arg10: memref<1x1x1024xf32, #tpu.memory_space<vmem>>) attributes {dimension_semantics = [#tpu.dimension_semantics<arbitrary>, #tpu.dimension_semantics<arbitrary>], iteration_bounds = array<i64: 2, 1>, scalar_prefetch = 0 : i64, scratch_operands = 0 : i64, tpu.core_type = #tpu.core_type<tc>, window_params = [{pipeline_mode = #tpu.pipeline_mode<synchronous>, transform_indices = @transform_0, window_bounds = array<i64: 1, 128>}, {pipeline_mode = #tpu.pipeline_mode<synchronous>, transform_indices = @transform_1, window_bounds = array<i64: 1, 128>}, {transform_indices = @transform_2, window_bounds = array<i64: 1, 16, 128>}, {pipeline_mode = #tpu.pipeline_mode<synchronous>, transform_indices = @transform_3, window_bounds = array<i64: 128, 1024>}, {pipeline_mode = #tpu.pipeline_mode<synchronous>, transform_indices = @transform_4, window_bounds = array<i64: 1, 1024>}, {pipeline_mode = #tpu.pipeline_mode<synchronous>, transform_indices = @transform_5, window_bounds = array<i64: 1, 1024>}, {pipeline_mode = #tpu.pipeline_mode<synchronous>, transform_indices = @transform_6, window_bounds = array<i64: 1, 1024>}, {transform_indices = @transform_7, window_bounds = array<i64: 1, 1, 1024>}, {transform_indices = @transform_8, window_bounds = array<i64: 1, 1, 1024>}]} {
    %c0 = arith.constant 0 : index
    %c0_0 = arith.constant 0 : index
    %c0_1 = arith.constant 0 : index
    %0 = vector.load %arg4[%c0, %c0_0, %c0_1] : memref<1x16x128xbf16, #tpu.memory_space<vmem>>, vector<1x16x128xbf16>
    %1 = vector.shape_cast %0 : vector<1x16x128xbf16> to vector<16x128xbf16>
    %2 = arith.extf %1 : vector<16x128xbf16> to vector<16x128xf32>
    %c0_2 = arith.constant 0 : index
    %c0_3 = arith.constant 0 : index
    %3 = vector.load %arg2[%c0_2, %c0_3] : memref<1x128xf32, #tpu.memory_space<vmem>>, vector<1x128xf32>
    %4 = vector.broadcast %3 : vector<1x128xf32> to vector<16x128xf32>
    %5 = arith.mulf %2, %4 : vector<16x128xf32>
    %c0_4 = arith.constant 0 : index
    %c0_5 = arith.constant 0 : index
    %6 = vector.load %arg3[%c0_4, %c0_5] : memref<1x128xf32, #tpu.memory_space<vmem>>, vector<1x128xf32>
    %7 = vector.broadcast %6 : vector<1x128xf32> to vector<16x128xf32>
    %8 = arith.addf %5, %7 : vector<16x128xf32>
    %cst = arith.constant 0.000000e+00 : f32
    %9 = vector.broadcast %cst : f32 to vector<16x128xf32>
    %10 = arith.maximumf %8, %9 : vector<16x128xf32>
    %11 = arith.truncf %10 : vector<16x128xf32> to vector<16x128xbf16>
    %c0_6 = arith.constant 0 : index
    %c0_7 = arith.constant 0 : index
    %12 = vector.load %arg5[%c0_6, %c0_7] : memref<128x1024xbf16, #tpu.memory_space<vmem>>, vector<128x1024xbf16>
    %cst_8 = arith.constant dense<0.000000e+00> : vector<16x1024xf32>
    %13 = tpu.matmul %11, %12, %cst_8 {dimension_numbers = #tpu.dot_dimension_numbers<[1], [0], [0], [1], [0, 0, 1, 1], [], []>} : vector<16x128xbf16>, vector<128x1024xbf16>, vector<16x1024xf32> -> vector<16x1024xf32>
    %c0_9 = arith.constant 0 : index
    %c0_10 = arith.constant 0 : index
    %14 = vector.load %arg6[%c0_9, %c0_10] : memref<1x1024xf32, #tpu.memory_space<vmem>>, vector<1x1024xf32>
    %15 = vector.broadcast %14 : vector<1x1024xf32> to vector<16x1024xf32>
    %16 = arith.addf %13, %15 : vector<16x1024xf32>
    %c0_i32 = arith.constant 0 : i32
    %17 = arith.cmpi eq, %arg0, %c0_i32 : i32
    %c0_i32_11 = arith.constant 0 : i32
    %18 = arith.cmpi eq, %arg1, %c0_i32_11 : i32
    %19 = arith.andi %17, %18 : i1
    %20 = arith.extui %19 : i1 to i32
    %c0_i32_12 = arith.constant 0 : i32
    %21 = arith.cmpi ne, %20, %c0_i32_12 : i32
    scf.if %21 {
      %cst_29 = arith.constant 0.000000e+00 : f32
      %43 = vector.broadcast %cst_29 : f32 to vector<1x1024xf32>
      %c0_30 = arith.constant 0 : index
      %c0_31 = arith.constant 0 : index
      %44 = vector.load %arg7[%c0_30, %c0_31] : memref<1x1024xf32, #tpu.memory_space<vmem>>, vector<1x1024xf32>
      tpu.vector_store %arg7[%c0_30, %c0_31], %43 {strides = array<i32>} : memref<1x1024xf32, #tpu.memory_space<vmem>>, vector<1x1024xf32>,
      %cst_32 = arith.constant 0.000000e+00 : f32
      %45 = vector.broadcast %cst_32 : f32 to vector<1x1024xf32>
      %c0_33 = arith.constant 0 : index
      %c0_34 = arith.constant 0 : index
      %46 = vector.load %arg8[%c0_33, %c0_34] : memref<1x1024xf32, #tpu.memory_space<vmem>>, vector<1x1024xf32>
      tpu.vector_store %arg8[%c0_33, %c0_34], %45 {strides = array<i32>} : memref<1x1024xf32, #tpu.memory_space<vmem>>, vector<1x1024xf32>,
    } else {
    }
    %c0_13 = arith.constant 0 : index
    %c0_14 = arith.constant 0 : index
    %22 = vector.load %arg7[%c0_13, %c0_14] : memref<1x1024xf32, #tpu.memory_space<vmem>>, vector<1x1024xf32>
    %cst_15 = arith.constant dense<0.000000e+00> : vector<1024xf32>
    %23 = vector.multi_reduction <add>, %16, %cst_15 [0] : vector<16x1024xf32> to vector<1024xf32>
    %24 = vector.shape_cast %23 : vector<1024xf32> to vector<1x1024xf32>
    %25 = arith.addf %22, %24 : vector<1x1024xf32>
    %c0_16 = arith.constant 0 : index
    %c0_17 = arith.constant 0 : index
    %26 = vector.load %arg7[%c0_16, %c0_17] : memref<1x1024xf32, #tpu.memory_space<vmem>>, vector<1x1024xf32>
    tpu.vector_store %arg7[%c0_16, %c0_17], %25 {strides = array<i32>} : memref<1x1024xf32, #tpu.memory_space<vmem>>, vector<1x1024xf32>,
    %c0_18 = arith.constant 0 : index
    %c0_19 = arith.constant 0 : index
    %27 = vector.load %arg8[%c0_18, %c0_19] : memref<1x1024xf32, #tpu.memory_space<vmem>>, vector<1x1024xf32>
    %28 = arith.mulf %16, %16 : vector<16x1024xf32>
    %cst_20 = arith.constant dense<0.000000e+00> : vector<1024xf32>
    %29 = vector.multi_reduction <add>, %28, %cst_20 [0] : vector<16x1024xf32> to vector<1024xf32>
    %30 = vector.shape_cast %29 : vector<1024xf32> to vector<1x1024xf32>
    %31 = arith.addf %27, %30 : vector<1x1024xf32>
    %c0_21 = arith.constant 0 : index
    %c0_22 = arith.constant 0 : index
    %32 = vector.load %arg8[%c0_21, %c0_22] : memref<1x1024xf32, #tpu.memory_space<vmem>>, vector<1x1024xf32>
    tpu.vector_store %arg8[%c0_21, %c0_22], %31 {strides = array<i32>} : memref<1x1024xf32, #tpu.memory_space<vmem>>, vector<1x1024xf32>,
    %cst_23 = arith.constant dense<0xFF800000> : vector<1024xf32>
    %33 = vector.multi_reduction <maximumf>, %16, %cst_23 [0] : vector<16x1024xf32> to vector<1024xf32>
    %34 = vector.shape_cast %33 : vector<1024xf32> to vector<1x1024xf32>
    %cst_24 = arith.constant dense<0x7F800000> : vector<1024xf32>
    %35 = vector.multi_reduction <minimumf>, %16, %cst_24 [0] : vector<16x1024xf32> to vector<1024xf32>
    %36 = vector.shape_cast %35 : vector<1024xf32> to vector<1x1024xf32>
    %c0_i32_25 = arith.constant 0 : i32
    %37 = arith.cmpi eq, %arg1, %c0_i32_25 : i32
    %38 = arith.extui %37 : i1 to i32
    %c0_i32_26 = arith.constant 0 : i32
    %39 = arith.cmpi ne, %38, %c0_i32_26 : i32
    scf.if %39 {
      %c0_29 = arith.constant 0 : index
      %c0_30 = arith.constant 0 : index
      %c0_31 = arith.constant 0 : index
      %43 = vector.load %arg9[%c0_29, %c0_30, %c0_31] : memref<1x1x1024xf32, #tpu.memory_space<vmem>>, vector<1x1x1024xf32>
      %44 = vector.shape_cast %43 : vector<1x1x1024xf32> to vector<1x1024xf32>
      %45 = vector.shape_cast %34 : vector<1x1024xf32> to vector<1x1x1024xf32>
      tpu.vector_store %arg9[%c0_29, %c0_30, %c0_31], %45 {strides = array<i32>} : memref<1x1x1024xf32, #tpu.memory_space<vmem>>, vector<1x1x1024xf32>,
      %c0_32 = arith.constant 0 : index
      %c0_33 = arith.constant 0 : index
      %c0_34 = arith.constant 0 : index
      %46 = vector.load %arg10[%c0_32, %c0_33, %c0_34] : memref<1x1x1024xf32, #tpu.memory_space<vmem>>, vector<1x1x1024xf32>
      %47 = vector.shape_cast %46 : vector<1x1x1024xf32> to vector<1x1024xf32>
      %48 = vector.shape_cast %36 : vector<1x1024xf32> to vector<1x1x1024xf32>
      tpu.vector_store %arg10[%c0_32, %c0_33, %c0_34], %48 {strides = array<i32>} : memref<1x1x1024xf32, #tpu.memory_space<vmem>>, vector<1x1x1024xf32>,
    } else {
    }
    %c0_i32_27 = arith.constant 0 : i32
    %40 = arith.cmpi sgt, %arg1, %c0_i32_27 : i32
    %41 = arith.extui %40 : i1 to i32
    %c0_i32_28 = arith.constant 0 : i32
    %42 = arith.cmpi ne, %41, %c0_i32_28 : i32
    scf.if %42 {
      %c0_29 = arith.constant 0 : index
      %c0_30 = arith.constant 0 : index
      %c0_31 = arith.constant 0 : index
      %43 = vector.load %arg9[%c0_29, %c0_30, %c0_31] : memref<1x1x1024xf32, #tpu.memory_space<vmem>>, vector<1x1x1024xf32>
      %44 = vector.shape_cast %43 : vector<1x1x1024xf32> to vector<1x1024xf32>
      %45 = arith.maximumf %44, %34 : vector<1x1024xf32>
      %c0_32 = arith.constant 0 : index
      %c0_33 = arith.constant 0 : index
      %c0_34 = arith.constant 0 : index
      %46 = vector.load %arg9[%c0_32, %c0_33, %c0_34] : memref<1x1x1024xf32, #tpu.memory_space<vmem>>, vector<1x1x1024xf32>
      %47 = vector.shape_cast %46 : vector<1x1x1024xf32> to vector<1x1024xf32>
      %48 = vector.shape_cast %45 : vector<1x1024xf32> to vector<1x1x1024xf32>
      tpu.vector_store %arg9[%c0_32, %c0_33, %c0_34], %48 {strides = array<i32>} : memref<1x1x1024xf32, #tpu.memory_space<vmem>>, vector<1x1x1024xf32>,
      %c0_35 = arith.constant 0 : index
      %c0_36 = arith.constant 0 : index
      %c0_37 = arith.constant 0 : index
      %49 = vector.load %arg10[%c0_35, %c0_36, %c0_37] : memref<1x1x1024xf32, #tpu.memory_space<vmem>>, vector<1x1x1024xf32>
      %50 = vector.shape_cast %49 : vector<1x1x1024xf32> to vector<1x1024xf32>
      %51 = arith.minimumf %50, %36 : vector<1x1024xf32>
      %c0_38 = arith.constant 0 : index
      %c0_39 = arith.constant 0 : index
      %c0_40 = arith.constant 0 : index
      %52 = vector.load %arg10[%c0_38, %c0_39, %c0_40] : memref<1x1x1024xf32, #tpu.memory_space<vmem>>, vector<1x1x1024xf32>
      %53 = vector.shape_cast %52 : vector<1x1x1024xf32> to vector<1x1024xf32>
      %54 = vector.shape_cast %51 : vector<1x1024xf32> to vector<1x1x1024xf32>
      tpu.vector_store %arg10[%c0_38, %c0_39, %c0_40], %54 {strides = array<i32>} : memref<1x1x1024xf32, #tpu.memory_space<vmem>>, vector<1x1x1024xf32>,
    } else {
    }
    return
  }
  func.func @transform_0(%arg0: i32, %arg1: i32) -> (i32, i32) {
    %c0_i32 = arith.constant 0 : i32
    %c0_i32_0 = arith.constant 0 : i32
    %c0_i32_1 = arith.constant 0 : i32
    return %c0_i32, %c0_i32_0 : i32, i32
  }
  func.func @transform_1(%arg0: i32, %arg1: i32) -> (i32, i32) {
    %c0_i32 = arith.constant 0 : i32
    %c0_i32_0 = arith.constant 0 : i32
    %c0_i32_1 = arith.constant 0 : i32
    return %c0_i32, %c0_i32_0 : i32, i32
  }
  func.func @transform_2(%arg0: i32, %arg1: i32) -> (i32, i32, i32) {
    %c0_i32 = arith.constant 0 : i32
    %c0_i32_0 = arith.constant 0 : i32
    return %arg0, %arg1, %c0_i32 : i32, i32, i32
  }
  func.func @transform_3(%arg0: i32, %arg1: i32) -> (i32, i32) {
    %c0_i32 = arith.constant 0 : i32
    %c0_i32_0 = arith.constant 0 : i32
    %c0_i32_1 = arith.constant 0 : i32
    return %c0_i32, %c0_i32_0 : i32, i32
  }
  func.func @transform_4(%arg0: i32, %arg1: i32) -> (i32, i32) {
    %c0_i32 = arith.constant 0 : i32
    %c0_i32_0 = arith.constant 0 : i32
    %c0_i32_1 = arith.constant 0 : i32
    return %c0_i32, %c0_i32_0 : i32, i32
  }
  func.func @transform_5(%arg0: i32, %arg1: i32) -> (i32, i32) {
    %c0_i32 = arith.constant 0 : i32
    %c0_i32_0 = arith.constant 0 : i32
    %c0_i32_1 = arith.constant 0 : i32
    return %c0_i32, %c0_i32_0 : i32, i32
  }
  func.func @transform_6(%arg0: i32, %arg1: i32) -> (i32, i32) {
    %c0_i32 = arith.constant 0 : i32
    %c0_i32_0 = arith.constant 0 : i32
    %c0_i32_1 = arith.constant 0 : i32
    return %c0_i32, %c0_i32_0 : i32, i32
  }
  func.func @transform_7(%arg0: i32, %arg1: i32) -> (i32, i32, i32) {
    %c0_i32 = arith.constant 0 : i32
    %c0_i32_0 = arith.constant 0 : i32
    %c0_i32_1 = arith.constant 0 : i32
    return %arg0, %c0_i32, %c0_i32_0 : i32, i32, i32
  }
  func.func @transform_8(%arg0: i32, %arg1: i32) -> (i32, i32, i32) {
    %c0_i32 = arith.constant 0 : i32
    %c0_i32_0 = arith.constant 0 : i32
    %c0_i32_1 = arith.constant 0 : i32
    return %arg0, %c0_i32, %c0_i32_0 : i32, i32, i32
  }
}

module attributes {stable_mosaic.version = 11 : i64} {
  func.func @_head_kernel(%arg0: memref<2x1024xf32, #tpu.memory_space<vmem>>, %arg1: memref<2x1024xf32, #tpu.memory_space<vmem>>, %arg2: memref<1x1024xf32, #tpu.memory_space<vmem>>, %arg3: memref<1x1024xf32, #tpu.memory_space<vmem>>, %arg4: memref<1024x512xbf16, #tpu.memory_space<vmem>>, %arg5: memref<1x512xf32, #tpu.memory_space<vmem>>, %arg6: memref<1x512xf32, #tpu.memory_space<vmem>>, %arg7: memref<1x512xf32, #tpu.memory_space<vmem>>, %arg8: memref<512x256xbf16, #tpu.memory_space<vmem>>, %arg9: memref<1x256xf32, #tpu.memory_space<vmem>>, %arg10: memref<1x256xf32, #tpu.memory_space<vmem>>, %arg11: memref<1x256xf32, #tpu.memory_space<vmem>>, %arg12: memref<256x9xbf16, #tpu.memory_space<vmem>>, %arg13: memref<1x9xf32, #tpu.memory_space<vmem>>, %arg14: memref<2x9xf32, #tpu.memory_space<vmem>>) attributes {dimension_semantics = [], scalar_prefetch = 0 : i64, scratch_operands = 0 : i64, tpu.core_type = #tpu.core_type<tc>} {
    %c0 = arith.constant 0 : index
    %c0_0 = arith.constant 0 : index
    %0 = vector.load %arg2[%c0, %c0_0] : memref<1x1024xf32, #tpu.memory_space<vmem>>, vector<1x1024xf32>
    %c0_1 = arith.constant 0 : index
    %c0_2 = arith.constant 0 : index
    %1 = vector.load %arg0[%c0_1, %c0_2] : memref<2x1024xf32, #tpu.memory_space<vmem>>, vector<2x1024xf32>
    %2 = vector.broadcast %0 : vector<1x1024xf32> to vector<2x1024xf32>
    %3 = arith.mulf %1, %2 : vector<2x1024xf32>
    %c0_3 = arith.constant 0 : index
    %c0_4 = arith.constant 0 : index
    %4 = vector.load %arg1[%c0_3, %c0_4] : memref<2x1024xf32, #tpu.memory_space<vmem>>, vector<2x1024xf32>
    %5 = vector.broadcast %0 : vector<1x1024xf32> to vector<2x1024xf32>
    %6 = arith.mulf %4, %5 : vector<2x1024xf32>
    %7 = arith.maximumf %3, %6 : vector<2x1024xf32>
    %c0_5 = arith.constant 0 : index
    %c0_6 = arith.constant 0 : index
    %8 = vector.load %arg3[%c0_5, %c0_6] : memref<1x1024xf32, #tpu.memory_space<vmem>>, vector<1x1024xf32>
    %9 = vector.broadcast %8 : vector<1x1024xf32> to vector<2x1024xf32>
    %10 = arith.addf %7, %9 : vector<2x1024xf32>
    %cst = arith.constant 0.000000e+00 : f32
    %11 = vector.broadcast %cst : f32 to vector<2x1024xf32>
    %12 = arith.maximumf %10, %11 : vector<2x1024xf32>
    %13 = arith.truncf %12 : vector<2x1024xf32> to vector<2x1024xbf16>
    %c0_7 = arith.constant 0 : index
    %c0_8 = arith.constant 0 : index
    %14 = vector.load %arg4[%c0_7, %c0_8] : memref<1024x512xbf16, #tpu.memory_space<vmem>>, vector<1024x512xbf16>
    %cst_9 = arith.constant dense<0.000000e+00> : vector<2x512xf32>
    %15 = tpu.matmul %13, %14, %cst_9 {dimension_numbers = #tpu.dot_dimension_numbers<[1], [0], [0], [1], [0, 0, 1, 1], [], []>} : vector<2x1024xbf16>, vector<1024x512xbf16>, vector<2x512xf32> -> vector<2x512xf32>
    %c0_10 = arith.constant 0 : index
    %c0_11 = arith.constant 0 : index
    %16 = vector.load %arg5[%c0_10, %c0_11] : memref<1x512xf32, #tpu.memory_space<vmem>>, vector<1x512xf32>
    %17 = vector.broadcast %16 : vector<1x512xf32> to vector<2x512xf32>
    %18 = arith.addf %15, %17 : vector<2x512xf32>
    %cst_12 = arith.constant dense<0.000000e+00> : vector<512xf32>
    %19 = vector.multi_reduction <add>, %18, %cst_12 [0] : vector<2x512xf32> to vector<512xf32>
    %20 = vector.shape_cast %19 : vector<512xf32> to vector<1x512xf32>
    %cst_13 = arith.constant 2.000000e+00 : f32
    %21 = vector.broadcast %cst_13 : f32 to vector<1x512xf32>
    %22 = arith.divf %20, %21 : vector<1x512xf32>
    %23 = arith.mulf %18, %18 : vector<2x512xf32>
    %cst_14 = arith.constant dense<0.000000e+00> : vector<512xf32>
    %24 = vector.multi_reduction <add>, %23, %cst_14 [0] : vector<2x512xf32> to vector<512xf32>
    %25 = vector.shape_cast %24 : vector<512xf32> to vector<1x512xf32>
    %cst_15 = arith.constant 2.000000e+00 : f32
    %26 = vector.broadcast %cst_15 : f32 to vector<1x512xf32>
    %27 = arith.divf %25, %26 : vector<1x512xf32>
    %28 = arith.mulf %22, %22 : vector<1x512xf32>
    %29 = arith.subf %27, %28 : vector<1x512xf32>
    %cst_16 = arith.constant 0.000000e+00 : f32
    %30 = vector.broadcast %cst_16 : f32 to vector<1x512xf32>
    %31 = arith.maximumf %29, %30 : vector<1x512xf32>
    %c0_17 = arith.constant 0 : index
    %c0_18 = arith.constant 0 : index
    %32 = vector.load %arg6[%c0_17, %c0_18] : memref<1x512xf32, #tpu.memory_space<vmem>>, vector<1x512xf32>
    %cst_19 = arith.constant 9.99999974E-6 : f32
    %33 = vector.broadcast %cst_19 : f32 to vector<1x512xf32>
    %34 = arith.addf %31, %33 : vector<1x512xf32>
    %35 = math.rsqrt %34 : vector<1x512xf32>
    %36 = arith.mulf %32, %35 : vector<1x512xf32>
    %c0_20 = arith.constant 0 : index
    %c0_21 = arith.constant 0 : index
    %37 = vector.load %arg7[%c0_20, %c0_21] : memref<1x512xf32, #tpu.memory_space<vmem>>, vector<1x512xf32>
    %38 = arith.mulf %22, %36 : vector<1x512xf32>
    %39 = arith.subf %37, %38 : vector<1x512xf32>
    %40 = vector.broadcast %36 : vector<1x512xf32> to vector<2x512xf32>
    %41 = arith.mulf %18, %40 : vector<2x512xf32>
    %42 = vector.broadcast %39 : vector<1x512xf32> to vector<2x512xf32>
    %43 = arith.addf %41, %42 : vector<2x512xf32>
    %cst_22 = arith.constant 0.000000e+00 : f32
    %44 = vector.broadcast %cst_22 : f32 to vector<2x512xf32>
    %45 = arith.maximumf %43, %44 : vector<2x512xf32>
    %46 = arith.truncf %45 : vector<2x512xf32> to vector<2x512xbf16>
    %c0_23 = arith.constant 0 : index
    %c0_24 = arith.constant 0 : index
    %47 = vector.load %arg8[%c0_23, %c0_24] : memref<512x256xbf16, #tpu.memory_space<vmem>>, vector<512x256xbf16>
    %cst_25 = arith.constant dense<0.000000e+00> : vector<2x256xf32>
    %48 = tpu.matmul %46, %47, %cst_25 {dimension_numbers = #tpu.dot_dimension_numbers<[1], [0], [0], [1], [0, 0, 1, 1], [], []>} : vector<2x512xbf16>, vector<512x256xbf16>, vector<2x256xf32> -> vector<2x256xf32>
    %c0_26 = arith.constant 0 : index
    %c0_27 = arith.constant 0 : index
    %49 = vector.load %arg9[%c0_26, %c0_27] : memref<1x256xf32, #tpu.memory_space<vmem>>, vector<1x256xf32>
    %50 = vector.broadcast %49 : vector<1x256xf32> to vector<2x256xf32>
    %51 = arith.addf %48, %50 : vector<2x256xf32>
    %cst_28 = arith.constant dense<0.000000e+00> : vector<256xf32>
    %52 = vector.multi_reduction <add>, %51, %cst_28 [0] : vector<2x256xf32> to vector<256xf32>
    %53 = vector.shape_cast %52 : vector<256xf32> to vector<1x256xf32>
    %cst_29 = arith.constant 2.000000e+00 : f32
    %54 = vector.broadcast %cst_29 : f32 to vector<1x256xf32>
    %55 = arith.divf %53, %54 : vector<1x256xf32>
    %56 = arith.mulf %51, %51 : vector<2x256xf32>
    %cst_30 = arith.constant dense<0.000000e+00> : vector<256xf32>
    %57 = vector.multi_reduction <add>, %56, %cst_30 [0] : vector<2x256xf32> to vector<256xf32>
    %58 = vector.shape_cast %57 : vector<256xf32> to vector<1x256xf32>
    %cst_31 = arith.constant 2.000000e+00 : f32
    %59 = vector.broadcast %cst_31 : f32 to vector<1x256xf32>
    %60 = arith.divf %58, %59 : vector<1x256xf32>
    %61 = arith.mulf %55, %55 : vector<1x256xf32>
    %62 = arith.subf %60, %61 : vector<1x256xf32>
    %cst_32 = arith.constant 0.000000e+00 : f32
    %63 = vector.broadcast %cst_32 : f32 to vector<1x256xf32>
    %64 = arith.maximumf %62, %63 : vector<1x256xf32>
    %c0_33 = arith.constant 0 : index
    %c0_34 = arith.constant 0 : index
    %65 = vector.load %arg10[%c0_33, %c0_34] : memref<1x256xf32, #tpu.memory_space<vmem>>, vector<1x256xf32>
    %cst_35 = arith.constant 9.99999974E-6 : f32
    %66 = vector.broadcast %cst_35 : f32 to vector<1x256xf32>
    %67 = arith.addf %64, %66 : vector<1x256xf32>
    %68 = math.rsqrt %67 : vector<1x256xf32>
    %69 = arith.mulf %65, %68 : vector<1x256xf32>
    %c0_36 = arith.constant 0 : index
    %c0_37 = arith.constant 0 : index
    %70 = vector.load %arg11[%c0_36, %c0_37] : memref<1x256xf32, #tpu.memory_space<vmem>>, vector<1x256xf32>
    %71 = arith.mulf %55, %69 : vector<1x256xf32>
    %72 = arith.subf %70, %71 : vector<1x256xf32>
    %73 = vector.broadcast %69 : vector<1x256xf32> to vector<2x256xf32>
    %74 = arith.mulf %51, %73 : vector<2x256xf32>
    %75 = vector.broadcast %72 : vector<1x256xf32> to vector<2x256xf32>
    %76 = arith.addf %74, %75 : vector<2x256xf32>
    %cst_38 = arith.constant 0.000000e+00 : f32
    %77 = vector.broadcast %cst_38 : f32 to vector<2x256xf32>
    %78 = arith.maximumf %76, %77 : vector<2x256xf32>
    %79 = arith.truncf %78 : vector<2x256xf32> to vector<2x256xbf16>
    %c0_39 = arith.constant 0 : index
    %c0_40 = arith.constant 0 : index
    %80 = vector.load %arg12[%c0_39, %c0_40] : memref<256x9xbf16, #tpu.memory_space<vmem>>, vector<256x9xbf16>
    %cst_41 = arith.constant dense<0.000000e+00> : vector<2x9xf32>
    %81 = tpu.matmul %79, %80, %cst_41 {dimension_numbers = #tpu.dot_dimension_numbers<[1], [0], [0], [1], [0, 0, 1, 1], [], []>} : vector<2x256xbf16>, vector<256x9xbf16>, vector<2x9xf32> -> vector<2x9xf32>
    %c0_42 = arith.constant 0 : index
    %c0_43 = arith.constant 0 : index
    %82 = vector.load %arg13[%c0_42, %c0_43] : memref<1x9xf32, #tpu.memory_space<vmem>>, vector<1x9xf32>
    %83 = vector.broadcast %82 : vector<1x9xf32> to vector<2x9xf32>
    %84 = arith.addf %81, %83 : vector<2x9xf32>
    %c0_44 = arith.constant 0 : index
    %c0_45 = arith.constant 0 : index
    %85 = vector.load %arg14[%c0_44, %c0_45] : memref<2x9xf32, #tpu.memory_space<vmem>>, vector<2x9xf32>
    tpu.vector_store %arg14[%c0_44, %c0_45], %84 {strides = array<i32>} : memref<2x9xf32, #tpu.memory_space<vmem>>, vector<2x9xf32>,
    return
  }
}

</mosaic_0001>

<bundles_post_ra>
// kernel: input_transform_net.5
= control target key start
LH: loop header
LB: loop body
LE: loop exit
PB: predicated region body
PF: predicated region fallthrough
CT: control target
= control target key end

     0   :  { %13 = vsyncpa [#allocation3], 0  ;;  %s782_s24 = smov 0   ;;  %s784_s25 = smov 0   ;;  %s885_s0 = inlined_call_operand.vmem [shape: f32[1,64], index: 0, kind: input, shape index: {}]   ;;  %s886_s1 = inlined_call_operand.vmem [shape: f32[1,64], index: 1, kind: input, shape index: {}]   ;;  %s887_s2 = inlined_call_operand.vmem [shape: bf16[2,16,64], index: 2, kind: input, shape index: {}]   ;;  %s888_s3 = inlined_call_operand.vmem [shape: bf16[64,128], index: 3, kind: input, shape index: {}]   ;;  %s889_s4 = inlined_call_operand.hbm [shape: f32[1,128], index: 4, kind: input, shape index: {}]   ;;  %s890_s5 = inlined_call_operand.vmem [shape: bf16[2,16,128], index: 5, kind: output, shape index: {0}]   ;;  %s891_s6 = inlined_call_operand.vmem [shape: f32[1,128], index: 6, kind: output, shape index: {1}]   ;;  %s892_s7 = inlined_call_operand.vmem [shape: f32[1,128], index: 7, kind: output, shape index: {2}]  }
   0x1   :  { %s786_s26 = smov 0  }
   0x2 LB: > { %s587_s27 = sadd.s32 4294967295, %s736_s26   ;;  %s31_s28 = sadd.s32 1, %s732_s25  ;;  %s736_s26 = sphi %s786_s26, %s19_s26   ;;  %s732_s25 = sphi %s784_s25, %s896_s25   ;;  %s728_s24 = sphi %s782_s24, %s895_s24  }
   0x3   : > { %p33_p0 = scmp.ge.s32.totalorder %s31_s28, 2  ;;  %p589_p1 = scmp.ge.s32.totalorder %s736_s26, 1 }
   0x4   : > { %p218_p2 = scmp.lt.s32.totalorder %s736_s26, 3  ;;  %p807_p4 = scmp.eq.s32.totalorder %s587_s27, 0 }
   0x5   : > { %s898_s28 = smov (%p33_p0, %s31_s28), 0  ;;  %s738_s8 = smov [#allocation2]  }
   0x6   : > { %p803_p3 = pnand %p589_p1, %p218_p2  ;;  %s240_s9 = sshll.u32 %s738_s8, 4  ;;  %s241_s9 = int_to_ptr.vmem [resolvable:$true] %s240_s9 }
   0x7   : > { %s695_s10 = scalar_lea.vmem %s241_s9, 16  ;;  %s702_s11 = scalar_lea.vmem %s241_s9, 32 }
   0x8   : > { %p646_p5 = pneg %p803_p3  ;;  %p696_p8 = scmp.ne.s32.totalorder %s241_s9, %s695_s10 }
   0x9   : > { %p703_p11 = scmp.lt.s32.totalorder %s241_s9, %s241_s9  ;;  %p704_p12 = scmp.lt.s32.totalorder %s702_s11, %s695_s10 }
   0xa   : > { %p647_p6 = pnand %p807_p4, %p646_p5 }
   0xb   : > { %p705_p13 = por %p704_p12, %p703_p11 }
   0xc   : > { %p686_p7 = pneg %p647_p6 }
   0xe   : > { %p698_p9 = pnand %p696_p8, %p686_p7 }
  0x10   : > { %p699_p10 = pneg %p698_p9 }
  0x12   : > { %p706_p0 = pnand %p705_p13, %p699_p10 }
  0x14   : > { %709 = shalt.err (!%p706_p0)
}
  0x15   : > { %649 = dma.hbm_to_vmem [thread:$0]  (!%p647_p6), %s889_s4, 16, %s241_s9, [#allocation3]  }
  0x16   : > { %266 = sbr.rel (%p803_p3) target bundleno = 266 (0x10a), region = 40 }
  0x1b   : > { %723 = dma.done.wait (%p807_p4), [#allocation3], 16  }
  0x1c   : > { %725 = vsyncadd (%p807_p4), [#allocation3], 4294967280  ;;  %p307_p1 = scmp.lt.s32.totalorder %s728_s24, 1  ;;  %v739_v0 = vmov 0.0   ;;  %vm740_vm0 = vmmov 0   ;;  %v680_v1 = vld [vmem:[%s888_s3 + $0x18] sm:$0xff]  }
  0x1d   : > { %630 = vmatprep.subr.bf16.mxu0 %v739_v0  ;;  %638 = vmatprep.mubr.msk.bf16.mxu0 %vm740_vm0, %v739_v0  ;;  %v681_v2 = vld [vmem:[%s888_s3 + $0x10] sm:$0xff]   ;;  %v598_v4 = vld [vmem:[%s885_s0] ss:$0 sm:$0xff]  ;;  %v682_v7 = vld [vmem:[%s888_s3 + $0x8] sm:$0xff]   ;;  %vm391_vm1 = vcmask 523264   ;;  %p446_p2 = scmp.eq.s32.totalorder %s728_s24, 0 }
  0x1e   : > { %s826_s14 = scalar_select %p307_p1, %s728_s24, 1  ;;  %631 = vmatpush3.bf16.msra.mxu0 %v680_v1  ;;  %v599_v8 = vld [vmem:[%s886_s1] ss:$0 sm:$0xff]  ;;  %v741_v25 = vmov (%p446_p2), 0.0  }
  0x1f   : > { %632 = vmatprep.subr.bf16.mxu0 %v739_v0  ;;  %v683_v13 = vld [vmem:[%s888_s3] sm:$0xff]   ;;  %452 = vst [vmem:[%s891_s6] sm:$0x1] (%p446_p2), %v741_v25  ;;  %453 = vst [vmem:[%s892_s7] sm:$0x1] (%p446_p2), %v741_v25 }
  0x20   : > { %s611_s15 = sshll.u32 %s826_s14, 3  ;;  %v600_v18 = vld [vmem:[#allocation2] ss:$0 sm:$0xff] }
  0x21   : > { %s314_s20 = scalar_lea.vmem %s887_s2, %s611_s15  ;;  %s324_s16 = scalar_lea.vmem %s890_s5, %s611_s15 }
  0x22   : > { %v617_v3 = vld [vmem:[%s314_s20] sm:$0xff]   ;;  %633 = vmatpush3.bf16.msra.mxu0 %v681_v2 }
  0x23   : > { %v618_v5 = vunpack.c.l.bf16 %v617_v3  ;;  %v619_v6 = vunpack.c.h.bf16 %v617_v3  ;;  %634 = vmatprep.subr.bf16.mxu0 %v739_v0 }
  0x25   : > { %v338_v9 = vmul.f32 %v618_v5, %v598_v4  ;;  %v339_v10 = vmul.f32 %v619_v6, %v598_v4 }
  0x26   : > { %635 = vmatpush3.bf16.msra.mxu0 %v682_v7 }
  0x27   : > { %v347_v11 = vadd.f32 %v599_v8, %v338_v9  ;;  %v348_v12 = vadd.f32 %v599_v8, %v339_v10  ;;  %636 = vmatprep.subr.bf16.mxu0 %v739_v0 }
  0x29   : > { %v349_v14 = vmax.f32 %v347_v11, 0.0  ;;  %v350_v15 = vmax.f32 %v348_v12, 0.0 }
  0x2a   : > { %637 = vmatpush3.bf16.msra.mxu0 %v683_v13 }
  0x2b   : > { %v351_v16 = vpack.c.bf16 %v350_v15, %v349_v14 }
  0x2d   : > { %639 = vmatmul.mubr.msk.bf16.vlgmr.msra.gmra.mxu0 %vm391_vm1, %v351_v16 }
  0xed   : > { %v429_v17 = vpop.f32.mrf.mxu0 }
  0xee   : > { %v430_v21 = vadd.f32 %v600_v18, %v429_v17 }
  0xef   : > { %v640_v19 = vpop.f32.mrf.mxu0 }
  0xf1   : > { %v432_v20 = vpop.f32.mrf.mxu0 }
  0xf2   : > { %v433_v22 = vadd.f32 %v600_v18, %v432_v20  ;;  %451 = sbr.rel (!%p446_p2) target bundleno = 247 (0xf7), region = 48 }
  0xf3   : > { %v641_v23 = vpop.f32.mrf.mxu0 }
  0xf4   : > { %v623_v24 = vpack.c.bf16 %v433_v22, %v430_v21 }
  0xf6   : > { %624 = vst [vmem:[%s324_s16] sm:$0xff] %v623_v24  }
  0xf7 PF: > { %v455_v26 = vadd.f32 %v433_v22, %v430_v21  ;;  %v465_v27 = vmul.f32 %v430_v21, %v430_v21  ;;  %v466_v28 = vmul.f32 %v433_v22, %v433_v22  ;;  %v454_v39 = vld [vmem:[%s891_s6] sm:$0x1] }
  0xf8   : > { %v464_v42 = vld [vmem:[%s892_s7] sm:$0x1] }
  0xf9   : > { %v456_v29 = vrot.slane %v455_v26, 4  ;;  %v467_v30 = vadd.f32 %v466_v28, %v465_v27 }
  0xfb   : > { %v457_v31 = vadd.f32 %v456_v29, %v455_v26  ;;  %v468_v32 = vrot.slane %v467_v30, 4 }
  0xfd   : > { %v458_v33 = vrot.slane %v457_v31, 2  ;;  %v469_v34 = vadd.f32 %v468_v32, %v467_v30 }
  0xff   : > { %v459_v35 = vadd.f32 %v458_v33, %v457_v31  ;;  %v470_v36 = vrot.slane %v469_v34, 2 }
 0x101   : > { %v460_v37 = vrot.slane %v459_v35, 1  ;;  %v471_v38 = vadd.f32 %v470_v36, %v469_v34 }
 0x103   : > { %v461_v40 = vadd.f32 %v460_v37, %v459_v35  ;;  %v472_v41 = vrot.slane %v471_v38, 1 }
 0x105   : > { %v462_v43 = vadd.f32 %v461_v40, %v454_v39  ;;  %v473_v44 = vadd.f32 %v472_v41, %v471_v38 }
 0x107   : > { %463 = vst [vmem:[%s891_s6] sm:$0x1] %v462_v43  ;;  %v474_v45 = vadd.f32 %v473_v44, %v464_v42 }
 0x109   : > { %475 = vst [vmem:[%s892_s7] sm:$0x1] %v474_v45 }
 0x10a PF: > { %s19_s26 = sadd.s32 1, %s736_s26   ;;  %s895_s24 = smov %s732_s25 }
 0x10b   : > { %p16_p3 = scmp.ge.s32.totalorder %s19_s26, 4   ;;  %s896_s25 = smov %s898_s28 }
 0x10d   :  { %18 = sbr.rel (!%p16_p3) target bundleno = 2 (0x2), region = 95 }
 0x112   :  { %518 = vsyncpa [#allocation3], 1 }
 0x113   :  { %520 = vsyncpa [#allocation3 + $0x1], 1 }

// kernel: input_transform_net.4
= control target key start
LH: loop header
LB: loop body
LE: loop exit
PB: predicated region body
PF: predicated region fallthrough
CT: control target
= control target key end

     0   :  { %11 = vsyncpa [#allocation3], 0  ;;  %s655_s18 = smov 0   ;;  %s657_s19 = smov 0   ;;  %s738_s0 = inlined_call_operand.vmem [shape: bf16[2,16,8], index: 0, kind: input, shape index: {}]   ;;  %s739_s1 = inlined_call_operand.vmem [shape: bf16[8,64], index: 1, kind: input, shape index: {}]   ;;  %s740_s2 = inlined_call_operand.hbm [shape: f32[1,64], index: 2, kind: input, shape index: {}]   ;;  %s741_s3 = inlined_call_operand.vmem [shape: bf16[2,16,64], index: 3, kind: output, shape index: {0}]   ;;  %s742_s4 = inlined_call_operand.vmem [shape: f32[1,64], index: 4, kind: output, shape index: {1}]   ;;  %s743_s5 = inlined_call_operand.vmem [shape: f32[1,64], index: 5, kind: output, shape index: {2}]  }
   0x1   :  { %s659_s20 = smov 0  }
   0x2 LB: > { %s496_s21 = sadd.s32 4294967295, %s619_s20   ;;  %s29_s22 = sadd.s32 1, %s615_s19  ;;  %s619_s20 = sphi %s659_s20, %s17_s20   ;;  %s615_s19 = sphi %s657_s19, %s747_s19   ;;  %s611_s18 = sphi %s655_s18, %s746_s18  }
   0x3   : > { %p31_p0 = scmp.ge.s32.totalorder %s29_s22, 2  ;;  %p498_p1 = scmp.ge.s32.totalorder %s619_s20, 1 }
   0x4   : > { %p174_p2 = scmp.lt.s32.totalorder %s619_s20, 3  ;;  %p680_p4 = scmp.eq.s32.totalorder %s496_s21, 0 }
   0x5   : > { %s749_s22 = smov (%p31_p0, %s29_s22), 0  ;;  %s621_s25 = smov [#allocation2]  }
   0x6   : > { %p676_p3 = pnand %p498_p1, %p174_p2  ;;  %s190_s26 = sshll.u32 %s621_s25, 4  ;;  %s191_s26 = int_to_ptr.vmem [resolvable:$true] %s190_s26 }
   0x7   : > { %s578_s27 = scalar_lea.vmem %s191_s26, 16  ;;  %s585_s28 = scalar_lea.vmem %s191_s26, 32 }
   0x8   : > { %p532_p5 = pneg %p676_p3  ;;  %p579_p8 = scmp.ne.s32.totalorder %s191_s26, %s578_s27 }
   0x9   : > { %p586_p11 = scmp.lt.s32.totalorder %s191_s26, %s191_s26  ;;  %p587_p12 = scmp.lt.s32.totalorder %s585_s28, %s578_s27 }
   0xa   : > { %p533_p6 = pnand %p680_p4, %p532_p5 }
   0xb   : > { %p588_p13 = por %p587_p12, %p586_p11 }
   0xc   : > { %p569_p7 = pneg %p533_p6 }
   0xe   : > { %p581_p9 = pnand %p579_p8, %p569_p7 }
  0x10   : > { %p582_p10 = pneg %p581_p9 }
  0x12   : > { %p589_p0 = pnand %p588_p13, %p582_p10 }
  0x14   : > { %592 = shalt.err (!%p589_p0)
}
  0x15   : > { %535 = dma.hbm_to_vmem [thread:$0]  (!%p533_p6), %s740_s2, 16, %s191_s26, [#allocation3]  }
  0x16   : > { %216 = sbr.rel (%p676_p3) target bundleno = 257 (0x101), region = 32 }
  0x1b   : > { %606 = dma.done.wait (%p680_p4), [#allocation3], 16  }
  0x1c   : > { %608 = vsyncadd (%p680_p4), [#allocation3], 4294967280  ;;  %p253_p1 = scmp.lt.s32.totalorder %s611_s18, 1  ;;  %v622_v0 = vmov 0.0   ;;  %vm623_vm0 = vmmov 0   ;;  %vm292_vm1 = vcmask 1043456  }
  0x1d   : > { %522 = vmatprep.subr.bf16.mxu0 %v622_v0  ;;  %524 = vmatprep.mubr.msk.bf16.mxu0 %vm623_vm0, %v622_v0  ;;  %v275_v1 = vld [vmem:[%s739_s1] sm:$0xf]  ;;  %vm288_vm2 = vcmask 64512   ;;  %p348_p2 = scmp.eq.s32.totalorder %s611_s18, 0  ;;  %vm345_vm3 = vcmask 519168  }
  0x1e   : > { %s254_s6 = scalar_select %p253_p1, %s611_s18, 1  ;;  %v294_v2 = vsel %vm292_vm1, %v275_v1, 0  ;;  %v507_v4 = vld [vmem:[#allocation2] ss:$0 sm:$0xff]  ;;  %vm354_vm4 = vcmask (%p348_p2), 516096   ;;  %v624_v13 = vmov (%p348_p2), 0.0  }
  0x1f   : > { %523 = vmatpush3.bf16.msra.mxu0 %v294_v2  ;;  %355 = vst.msk [vmem:[%s742_s4] sm:$0x1] (%p348_p2), %vm354_vm4, %v624_v13  ;;  %356 = vst.msk [vmem:[%s743_s5] sm:$0x1] (%p348_p2), %vm354_vm4, %v624_v13 }
  0x20   : > { %s515_s7 = sshll.u32 %s254_s6, 3 }
  0x21   : > { %s260_s10 = scalar_lea.vmem %s738_s0, %s515_s7  ;;  %s270_s15 = scalar_lea.vmem %s741_s3, %s515_s7 }
  0x22   : > { %v566_v3 = vld [vmem:[%s260_s10] sm:$0xff]  }
  0x23   : > { %525 = vmatmul.mubr.msk.bf16.vlgmr.msra.gmra.mxu0 %vm288_vm2, %v566_v3 }
  0xe3   : > { %v330_v5 = vpop.f32.mrf.mxu0 }
  0xe4   : > { %v331_v6 = vadd.f32 %v507_v4, %v330_v5 }
  0xe5   : > { %v526_v7 = vpop.f32.mrf.mxu0 }
  0xe6   : > { %v517_v8 = vpack.c.bf16 %v331_v6, %v331_v6 }
  0xe7   : > { %v333_v9 = vpop.f32.mrf.mxu0 }
  0xe8   : > { %346 = vst.msk [vmem:[%s270_s15] sm:$0xf] %vm345_vm3, %v517_v8  ;;  %v334_v10 = vadd.f32 %v507_v4, %v333_v9  ;;  %353 = sbr.rel (!%p348_p2) target bundleno = 237 (0xed), region = 40 }
  0xe9   : > { %v527_v11 = vpop.f32.mrf.mxu0 }
  0xea   : > { %v518_v12 = vpack.c.bf16 %v334_v10, %v334_v10 }
  0xec   : > { %347 = vst.msk [vmem:[%s270_s15 + $0x4] sm:$0xf] %vm345_vm3, %v518_v12 }
  0xed PF: > { %vm358_vm5 = vcmask 523264   ;;  %v372_v14 = vmul.f32 %v331_v6, %v331_v6  ;;  %v373_v15 = vmul.f32 %v334_v10, %v334_v10  ;;  %v357_v31 = vld [vmem:[%s742_s4] sm:$0x1]  ;;  %vm369_vm6 = vcmask 516096  }
  0xee   : > { %v359_v16 = vsel %vm358_vm5, %v331_v6, 0.0  ;;  %v360_v17 = vsel %vm358_vm5, %v334_v10, 0.0  ;;  %v371_v34 = vld [vmem:[%s743_s5] sm:$0x1] }
  0xef   : > { %v361_v18 = vadd.f32 %v360_v17, %v359_v16  ;;  %v374_v19 = vsel %vm358_vm5, %v372_v14, 0.0  ;;  %v375_v20 = vsel %vm358_vm5, %v373_v15, 0.0 }
  0xf0   : > { %v376_v21 = vadd.f32 %v375_v20, %v374_v19 }
  0xf1   : > { %v362_v22 = vrot.slane %v361_v18, 4 }
  0xf2   : > { %v377_v23 = vrot.slane %v376_v21, 4 }
  0xf3   : > { %v363_v24 = vadd.f32 %v362_v22, %v361_v18 }
  0xf4   : > { %v378_v25 = vadd.f32 %v377_v23, %v376_v21 }
  0xf5   : > { %v364_v26 = vrot.slane %v363_v24, 2 }
  0xf6   : > { %v379_v27 = vrot.slane %v378_v25, 2 }
  0xf7   : > { %v365_v28 = vadd.f32 %v364_v26, %v363_v24 }
  0xf8   : > { %v380_v29 = vadd.f32 %v379_v27, %v378_v25 }
  0xf9   : > { %v366_v30 = vrot.slane %v365_v28, 1 }
  0xfa   : > { %v381_v32 = vrot.slane %v380_v29, 1 }
  0xfb   : > { %v367_v33 = vadd.f32 %v366_v30, %v365_v28 }
  0xfc   : > { %v382_v35 = vadd.f32 %v381_v32, %v380_v29 }
  0xfd   : > { %v368_v36 = vadd.f32 %v367_v33, %v357_v31 }
  0xfe   : > { %v383_v37 = vadd.f32 %v382_v35, %v371_v34 }
  0xff   : > { %370 = vst.msk [vmem:[%s742_s4] sm:$0x1] %vm369_vm6, %v368_v36 }
 0x100   : > { %384 = vst.msk [vmem:[%s743_s5] sm:$0x1] %vm369_vm6, %v383_v37 }
 0x101 PF: > { %s17_s20 = sadd.s32 1, %s619_s20   ;;  %s746_s18 = smov %s615_s19 }
 0x102   : > { %p14_p3 = scmp.ge.s32.totalorder %s17_s20, 4   ;;  %s747_s19 = smov %s749_s22 }
 0x104   :  { %16 = sbr.rel (!%p14_p3) target bundleno = 2 (0x2), region = 87 }
 0x109   :  { %427 = vsyncpa [#allocation3], 1 }
 0x10a   :  { %429 = vsyncpa [#allocation3 + $0x1], 1 }

// kernel: input_transform_net.6
= control target key start
LH: loop header
LB: loop body
LE: loop exit
PB: predicated region body
PF: predicated region fallthrough
CT: control target
= control target key end

     0   :  { %14 = vsyncpa [#allocation3], 0  ;;  %s1941_s27 = smov 0   ;;  %s1943_s28 = smov 0   ;;  %s2411_s0 = inlined_call_operand.vmem [shape: f32[1,128], index: 0, kind: input, shape index: {}]   ;;  %s2412_s1 = inlined_call_operand.vmem [shape: f32[1,128], index: 1, kind: input, shape index: {}]   ;;  %s2413_s2 = inlined_call_operand.vmem [shape: bf16[2,16,128], index: 2, kind: input, shape index: {}]   ;;  %s2414_s3 = inlined_call_operand.vmem [shape: bf16[128,1024], index: 3, kind: input, shape index: {}]   ;;  %s2415_s4 = inlined_call_operand.hbm [shape: f32[1,1024], index: 4, kind: input, shape index: {}]   ;;  %s2416_s5 = inlined_call_operand.vmem [shape: f32[1,1024], index: 5, kind: output, shape index: {0}]   ;;  %s2417_s6 = inlined_call_operand.vmem [shape: f32[1,1024], index: 6, kind: output, shape index: {1}]   ;;  %s2418_s7 = inlined_call_operand.vmem [shape: f32[2,1,1024], index: 7, kind: output, shape index: {2}]   ;;  %s2419_s8 = inlined_call_operand.vmem [shape: f32[2,1,1024], index: 8, kind: output, shape index: {3}]  }
   0x1   :  { %s1945_s29 = smov 0  }
   0x2 LB: > { %s1714_s30 = sadd.s32 4294967295, %s1890_s29   ;;  %s32_s9 = sadd.s32 1, %s1886_s28  ;;  %s1890_s29 = sphi %s1945_s29, %s20_s29   ;;  %s1886_s28 = sphi %s1943_s28, %s2423_s28   ;;  %s1882_s27 = sphi %s1941_s27, %s2422_s27  }
   0x3   : > { %p34_p0 = scmp.ge.s32.totalorder %s32_s9, 2  ;;  %p1716_p1 = scmp.ge.s32.totalorder %s1890_s29, 1 }
   0x4   : > { %p243_p2 = scmp.lt.s32.totalorder %s1890_s29, 3  ;;  %p1966_p4 = scmp.eq.s32.totalorder %s1714_s30, 0 }
   0x5   : > { %s2425_s9 = smov (%p34_p0, %s32_s9), 0  ;;  %s1892_s12 = smov [#allocation2]  }
   0x6   : > { %p1962_p3 = pnand %p1716_p1, %p243_p2  ;;  %s265_s13 = sshll.u32 %s1892_s12, 4  ;;  %s266_s13 = int_to_ptr.vmem [resolvable:$true] %s265_s13 }
   0x7   : > { %s1849_s14 = scalar_lea.vmem %s266_s13, 128  ;;  %p1857_p11 = scmp.lt.s32.totalorder %s266_s13, %s266_s13 }
   0x8   : > { %p1804_p5 = pneg %p1962_p3  ;;  %p1850_p8 = scmp.ne.s32.totalorder %s266_s13, %s1849_s14 }
   0x9   : > { %p1858_p12 = scmp.lt.s32.totalorder %s1849_s14, %s1849_s14 }
   0xa   : > { %p1805_p6 = pnand %p1966_p4, %p1804_p5 }
   0xb   : > { %p1859_p13 = por %p1858_p12, %p1857_p11 }
   0xc   : > { %p1840_p7 = pneg %p1805_p6 }
   0xe   : > { %p1852_p9 = pnand %p1850_p8, %p1840_p7 }
  0x10   : > { %p1853_p10 = pneg %p1852_p9 }
  0x12   : > { %p1860_p0 = pnand %p1859_p13, %p1853_p10 }
  0x14   : > { %1863 = shalt.err (!%p1860_p0)
}
  0x15   : > { %1807 = dma.hbm_to_vmem [thread:$0]  (!%p1805_p6), %s2415_s4, 128, %s266_s13, [#allocation3]  }
  0x16   : > { %291 = sbr.rel (%p1962_p3) target bundleno = 383 (0x17f), region = 40 }
  0x1b   : > { %1877 = dma.done.wait (%p1966_p4), [#allocation3], 128  }
  0x1c   : > { %1879 = vsyncadd (%p1966_p4), [#allocation3], 4294967168  ;;  %p333_p1 = scmp.lt.s32.totalorder %s1882_s27, 1  ;;  %v1893_v0 = vmov 0   ;;  %v432_v1 = vld [vmem:[%s2414_s3 + $0x1c0] sm:$0xff]  ;;  %v433_v3 = vld [vmem:[%s2414_s3 + $0x1c8] sm:$0xff] }
  0x1d   : > { %834 = vmatprep.mubr.bf16.mxu0 %v1893_v0  ;;  %877 = vmatprep.mubr.bf16.mxu1 %v1893_v0  ;;  %v436_v2 = vld [vmem:[%s2414_s3 + $0x1e0] sm:$0xff]  ;;  %v437_v5 = vld [vmem:[%s2414_s3 + $0x1e8] sm:$0xff]  ;;  %p974_p2 = scmp.eq.s32.totalorder %s1882_s27, 0 }
  0x1e   : > { %s334_s17 = scalar_select %p333_p1, %s1882_s27, 1  ;;  %v1784_v4 = vcombine.high %v432_v1, %v436_v2  ;;  %v1783_v6 = vcombine.low %v432_v1, %v436_v2  ;;  %v424_v7 = vld [vmem:[%s2414_s3 + $0x180] sm:$0xff]  ;;  %v1786_v9 = vcombine.high %v433_v3, %v437_v5  ;;  %v1785_v10 = vcombine.low %v433_v3, %v437_v5  ;;  %v425_v12 = vld [vmem:[%s2414_s3 + $0x188] sm:$0xff] }
  0x1f   : > { %v428_v8 = vld [vmem:[%s2414_s3 + $0x1a0] sm:$0xff]  ;;  %v429_v13 = vld [vmem:[%s2414_s3 + $0x1a8] sm:$0xff] }
  0x20   : > { %s1987_s18 = sshll.u32 %s334_s17, 3  ;;  %v1776_v11 = vcombine.high %v424_v7, %v428_v8  ;;  %v416_v14 = vld [vmem:[%s2414_s3 + $0x140] sm:$0xff]  ;;  %802 = vmatprep.subr.bf16.mxu0 %v1784_v4  ;;  %v1778_v15 = vcombine.high %v425_v12, %v429_v13  ;;  %v417_v17 = vld [vmem:[%s2414_s3 + $0x148] sm:$0xff]  ;;  %845 = vmatprep.subr.bf16.mxu1 %v1786_v9  ;;  %v1775_v19 = vcombine.low %v424_v7, %v428_v8  ;;  %v434_v9 = vld [vmem:[%s2414_s3 + $0x1d0] sm:$0xff] }
  0x21   : > { %s345_s21 = scalar_lea.vmem %s2418_s7, %s1987_s18  ;;  %s349_s24 = scalar_lea.vmem %s2419_s8, %s1987_s18  ;;  %v420_v16 = vld [vmem:[%s2414_s3 + $0x160] sm:$0xff]  ;;  %v421_v18 = vld [vmem:[%s2414_s3 + $0x168] sm:$0xff]  ;;  %803 = vmatpush1.bf16.msra.mxu0 %v1783_v6  ;;  %846 = vmatpush1.bf16.msra.mxu1 %v1785_v10  ;;  %v1777_v20 = vcombine.low %v425_v12, %v429_v13  ;;  %v438_v10 = vld [vmem:[%s2414_s3 + $0x1f0] sm:$0xff] }
  0x22   : > { %804 = vmatprep.subr.bf16.mxu0 %v1776_v11  ;;  %v1768_v21 = vcombine.high %v416_v14, %v420_v16  ;;  %847 = vmatprep.subr.bf16.mxu1 %v1778_v15  ;;  %v1770_v22 = vcombine.high %v417_v17, %v421_v18  ;;  %v408_v23 = vld [vmem:[%s2414_s3 + $0x100] sm:$0xff]  ;;  %v409_v25 = vld [vmem:[%s2414_s3 + $0x108] sm:$0xff]  ;;  %v1767_v27 = vcombine.low %v416_v14, %v420_v16  ;;  %s340_s11 = scalar_lea.vmem %s2413_s2, %s1987_s18  ;;  %v435_v13 = vld [vmem:[%s2414_s3 + $0x1d8] sm:$0xff] }
  0x23   : > { %v412_v24 = vld [vmem:[%s2414_s3 + $0x120] sm:$0xff]  ;;  %v413_v26 = vld [vmem:[%s2414_s3 + $0x128] sm:$0xff]  ;;  %v1769_v28 = vcombine.low %v417_v17, %v421_v18  ;;  %v439_v14 = vld [vmem:[%s2414_s3 + $0x1f8] sm:$0xff]  ;;  %v1788_v17 = vcombine.high %v434_v9, %v438_v10 }
  0x24   : > { %v1760_v29 = vcombine.high %v408_v23, %v412_v24  ;;  %v1762_v30 = vcombine.high %v409_v25, %v413_v26  ;;  %v400_v31 = vld [vmem:[%s2414_s3 + $0xc0] sm:$0xff]  ;;  %v401_v33 = vld [vmem:[%s2414_s3 + $0xc8] sm:$0xff]  ;;  %v1759_v35 = vcombine.low %v408_v23, %v412_v24  ;;  %v1761_v37 = vcombine.low %v409_v25, %v413_v26  ;;  %v431_v23 = vld [vmem:[%s2414_s3 + $0x1b8] sm:$0xff] }
  0x25   : > { %805 = vmatpush1.bf16.msra.mxu0 %v1775_v19  ;;  %848 = vmatpush1.bf16.msra.mxu1 %v1777_v20  ;;  %v404_v32 = vld [vmem:[%s2414_s3 + $0xe0] sm:$0xff]  ;;  %v405_v34 = vld [vmem:[%s2414_s3 + $0xe8] sm:$0xff]  ;;  %v1790_v18 = vcombine.high %v435_v13, %v439_v14  ;;  %v426_v19 = vld [vmem:[%s2414_s3 + $0x190] sm:$0xff]  ;;  %v1787_v24 = vcombine.low %v434_v9, %v438_v10  ;;  %v1789_v25 = vcombine.low %v435_v13, %v439_v14  ;;  %v442_v14 = vlaneseq }
  0x26   : > { %806 = vmatprep.subr.bf16.mxu0 %v1768_v21  ;;  %849 = vmatprep.subr.bf16.mxu1 %v1770_v22  ;;  %v1797_v36 = vld [vmem:[%s340_s11] sm:$0xff]   ;;  %v1752_v38 = vcombine.high %v400_v31, %v404_v32  ;;  %v1754_v39 = vcombine.high %v401_v33, %v405_v34  ;;  %v393_v42 = vld [vmem:[%s2414_s3 + $0x88] sm:$0xff]  ;;  %v1751_v46 = vcombine.low %v400_v31, %v404_v32  ;;  %v430_v20 = vld [vmem:[%s2414_s3 + $0x1b0] sm:$0xff] }
  0x27   : > { %v392_v40 = vld [vmem:[%s2414_s3 + $0x80] sm:$0xff]  ;;  %v397_v43 = vld [vmem:[%s2414_s3 + $0xa8] sm:$0xff]  ;;  %v1798_v44 = vunpack.c.l.bf16 %v1797_v36  ;;  %v1799_v45 = vunpack.c.h.bf16 %v1797_v36  ;;  %v1753_v48 = vcombine.low %v401_v33, %v405_v34  ;;  %v427_v22 = vld [vmem:[%s2414_s3 + $0x198] sm:$0xff]  ;;  %v1780_v26 = vcombine.high %v426_v19, %v430_v20 }
  0x28   : > { %v396_v41 = vld [vmem:[%s2414_s3 + $0xa0] sm:$0xff]  ;;  %v1746_v50 = vcombine.high %v393_v42, %v397_v43  ;;  %v385_v53 = vld [vmem:[%s2414_s3 + $0x48] sm:$0xff]  ;;  %v1745_v59 = vcombine.low %v393_v42, %v397_v43  ;;  %v423_v31 = vld [vmem:[%s2414_s3 + $0x178] sm:$0xff]  ;;  %v1779_v32 = vcombine.low %v426_v19, %v430_v20  ;;  %v1781_v33 = vcombine.low %v427_v22, %v431_v23 }
  0x29   : > { %807 = vmatpush1.bf16.msra.mxu0 %v1767_v27  ;;  %850 = vmatpush1.bf16.msra.mxu1 %v1769_v28  ;;  %v1725_v47 = vld [vmem:[%s2411_s0] ss:$0 sm:$0xff]  ;;  %v1744_v49 = vcombine.high %v392_v40, %v396_v41  ;;  %v389_v54 = vld [vmem:[%s2414_s3 + $0x68] sm:$0xff]  ;;  %v1743_v57 = vcombine.low %v392_v40, %v396_v41  ;;  %v1782_v27 = vcombine.high %v427_v22, %v431_v23  ;;  %v418_v28 = vld [vmem:[%s2414_s3 + $0x150] sm:$0xff] }
  0x2a   : > { %808 = vmatprep.subr.bf16.mxu0 %v1760_v29  ;;  %851 = vmatprep.subr.bf16.mxu1 %v1762_v30  ;;  %v384_v51 = vld [vmem:[%s2414_s3 + $0x40] sm:$0xff]  ;;  %v362_v55 = vmul.f32 %v1798_v44, %v1725_v47  ;;  %v363_v56 = vmul.f32 %v1799_v45, %v1725_v47  ;;  %v1738_v61 = vcombine.high %v385_v53, %v389_v54  ;;  %v377_v1 = vld [vmem:[%s2414_s3 + $0x8] sm:$0xff]  ;;  %v422_v29 = vld [vmem:[%s2414_s3 + $0x170] sm:$0xff] }
  0x2b   : > { %v388_v52 = vld [vmem:[%s2414_s3 + $0x60] sm:$0xff]  ;;  %v381_v2 = vld [vmem:[%s2414_s3 + $0x28] sm:$0xff]  ;;  %v1737_v6 = vcombine.low %v385_v53, %v389_v54  ;;  %v419_v30 = vld [vmem:[%s2414_s3 + $0x158] sm:$0xff]  ;;  %v1772_v34 = vcombine.high %v418_v28, %v422_v29  ;;  %v1771_v40 = vcombine.low %v418_v28, %v422_v29 }
  0x2c   : > { %v1726_v58 = vld [vmem:[%s2412_s1] ss:$0 sm:$0xff]  ;;  %v1736_v60 = vcombine.high %v384_v51, %v388_v52  ;;  %v1735_v5 = vcombine.low %v384_v51, %v388_v52  ;;  %v1730_v8 = vcombine.high %v377_v1, %v381_v2  ;;  %v1729_v16 = vcombine.low %v377_v1, %v381_v2  ;;  %v410_v36 = vld [vmem:[%s2414_s3 + $0x110] sm:$0xff]  ;;  %v395_v53 = vld [vmem:[%s2414_s3 + $0x98] sm:$0xff] }
  0x2d   : > { %809 = vmatpush1.bf16.msra.mxu0 %v1759_v35  ;;  %852 = vmatpush1.bf16.msra.mxu1 %v1761_v37  ;;  %v376_v62 = vld [vmem:[%s2414_s3] sm:$0xff]  ;;  %v371_v3 = vadd.f32 %v1726_v58, %v362_v55  ;;  %v372_v4 = vadd.f32 %v1726_v58, %v363_v56  ;;  %v1774_v35 = vcombine.high %v419_v30, %v423_v31  ;;  %v414_v37 = vld [vmem:[%s2414_s3 + $0x130] sm:$0xff]  ;;  %v399_v54 = vld [vmem:[%s2414_s3 + $0xb8] sm:$0xff] }
  0x2e   : > { %810 = vmatprep.subr.bf16.mxu0 %v1752_v38  ;;  %853 = vmatprep.subr.bf16.mxu1 %v1754_v39  ;;  %v380_v63 = vld [vmem:[%s2414_s3 + $0x20] sm:$0xff]  ;;  %v411_v38 = vld [vmem:[%s2414_s3 + $0x118] sm:$0xff]  ;;  %v1773_v41 = vcombine.low %v419_v30, %v423_v31  ;;  %v1764_v42 = vcombine.high %v410_v36, %v414_v37  ;;  %v402_v44 = vld [vmem:[%s2414_s3 + $0xd0] sm:$0xff]  ;;  %v1763_v47 = vcombine.low %v410_v36, %v414_v37 }
  0x2f   : > { %v1728_v7 = vcombine.high %v376_v62, %v380_v63  ;;  %v373_v11 = vmax.f32 %v371_v3, 0.0  ;;  %v374_v12 = vmax.f32 %v372_v4, 0.0  ;;  %v1727_v15 = vcombine.low %v376_v62, %v380_v63  ;;  %v415_v39 = vld [vmem:[%s2414_s3 + $0x138] sm:$0xff]  ;;  %v406_v45 = vld [vmem:[%s2414_s3 + $0xf0] sm:$0xff] }
  0x30   : > { %v1766_v43 = vcombine.high %v411_v38, %v415_v39  ;;  %v394_v51 = vld [vmem:[%s2414_s3 + $0x90] sm:$0xff]  ;;  %v1755_v55 = vcombine.low %v402_v44, %v406_v45  ;;  %v1750_v58 = vcombine.high %v395_v53, %v399_v54  ;;  %v391_v62 = vld [vmem:[%s2414_s3 + $0x78] sm:$0xff]  ;;  %v1749_v1 = vcombine.low %v395_v53, %v399_v54 }
  0x31   : > { %811 = vmatpush1.bf16.msra.mxu0 %v1751_v46  ;;  %854 = vmatpush1.bf16.msra.mxu1 %v1753_v48  ;;  %v2121_v21 = vpack.c.bf16 %v374_v12, %v373_v11  ;;  %v407_v46 = vld [vmem:[%s2414_s3 + $0xf8] sm:$0xff]  ;;  %v1765_v48 = vcombine.low %v411_v38, %v415_v39  ;;  %v398_v52 = vld [vmem:[%s2414_s3 + $0xb0] sm:$0xff] }
  0x32   : > { %812 = vmatprep.subr.bf16.mxu0 %v1744_v49  ;;  %855 = vmatprep.subr.bf16.mxu1 %v1746_v50  ;;  %v1756_v49 = vcombine.high %v402_v44, %v406_v45  ;;  %v1747_v63 = vcombine.low %v394_v51, %v398_v52  ;;  %v378_v4 = vld [vmem:[%s2414_s3 + $0x10] sm:$0xff] }
  0x35   : > { %813 = vmatpush1.bf16.msra.mxu0 %v1743_v57  ;;  %856 = vmatpush1.bf16.msra.mxu1 %v1745_v59  ;;  %v1748_v57 = vcombine.high %v394_v51, %v398_v52  ;;  %v386_v59 = vld [vmem:[%s2414_s3 + $0x50] sm:$0xff] }
  0x36   : > { %814 = vmatprep.subr.bf16.mxu0 %v1736_v60  ;;  %857 = vmatprep.subr.bf16.mxu1 %v1738_v61  ;;  %v390_v60 = vld [vmem:[%s2414_s3 + $0x70] sm:$0xff]  ;;  %v387_v61 = vld [vmem:[%s2414_s3 + $0x58] sm:$0xff] }
  0x37   : > { %v1740_v2 = vcombine.high %v386_v59, %v390_v60  ;;  %v1742_v3 = vcombine.high %v387_v61, %v391_v62  ;;  %v1741_v9 = vcombine.low %v387_v61, %v391_v62 }
  0x39   : > { %815 = vmatpush1.bf16.msra.mxu0 %v1735_v5  ;;  %858 = vmatpush1.bf16.msra.mxu1 %v1737_v6  ;;  %v382_v5 = vld [vmem:[%s2414_s3 + $0x30] sm:$0xff]  ;;  %v379_v6 = vld [vmem:[%s2414_s3 + $0x18] sm:$0xff] }
  0x3a   : > { %816 = vmatprep.subr.bf16.mxu0 %v1728_v7  ;;  %859 = vmatprep.subr.bf16.mxu1 %v1730_v8  ;;  %v383_v7 = vld [vmem:[%s2414_s3 + $0x38] sm:$0xff]  ;;  %v1739_v8 = vcombine.low %v386_v59, %v390_v60  ;;  %v1732_v10 = vcombine.high %v378_v4, %v382_v5  ;;  %v1731_v12 = vcombine.low %v378_v4, %v382_v5 }
  0x3b   : > { %v1734_v11 = vcombine.high %v379_v6, %v383_v7  ;;  %v1733_v13 = vcombine.low %v379_v6, %v383_v7 }
  0x3d   : > { %817 = vmatpush1.bf16.msra.mxu0 %v1727_v15  ;;  %860 = vmatpush1.bf16.msra.mxu1 %v1729_v16  ;;  %v2208_v15 = vshrl.u32 %v442_v14, 7 }
  0x3e   : > { %888 = vmatprep.subr.bf16.mxu0 %v1788_v17  ;;  %931 = vmatprep.subr.bf16.mxu1 %v1790_v18  ;;  %v440_v17 = vld [vmem:[#allocation2] sm:$0xff] }
  0x3f   : > { %v444_v16 = vsub.s32 0, %v2208_v15  ;;  %v452_v18 = vsub.s32 2, %v2208_v15  ;;  %v448_v19 = vsub.s32 1, %v2208_v15  ;;  %v456_v20 = vsub.s32 3, %v2208_v15 }
  0x40   : > { %835 = vmatmul.mubr.bf16.vlgmr.msra.gmra.mxu0 %v2121_v21  ;;  %878 = vmatmul.mubr.bf16.vlgmr.msra.gmra.mxu1 %v2121_v21  ;;  %v472_v44 = vsub.s32 7, %v2208_v15 }
  0x41   : > { %889 = vmatpush1.bf16.msra.mxu0 %v1787_v24  ;;  %932 = vmatpush1.bf16.msra.mxu1 %v1789_v25  ;;  %v445_v22 = vrot.slane %v440_v17, %v444_v16  ;;  %v453_v23 = vrot.slane %v440_v17, %v452_v18  ;;  %v449_v24 = vrot.slane %v440_v17, %v448_v19 }
  0x42   : > { %890 = vmatprep.subr.bf16.mxu0 %v1780_v26  ;;  %933 = vmatprep.subr.bf16.mxu1 %v1782_v27  ;;  %v457_v26 = vrot.slane %v440_v17, %v456_v20 }
  0x43   : > { %920 = vmatprep.mubr.bf16.mxu0 %v1893_v0  ;;  %963 = vmatprep.mubr.bf16.mxu1 %v1893_v0  ;;  %v403_v0 = vld [vmem:[%s2414_s3 + $0xd8] sm:$0xff] }
  0x44   : > { %v1758_v50 = vcombine.high %v403_v0, %v407_v46  ;;  %v1757_v56 = vcombine.low %v403_v0, %v407_v46 }
  0x45   : > { %891 = vmatpush1.bf16.msra.mxu0 %v1779_v32  ;;  %934 = vmatpush1.bf16.msra.mxu1 %v1781_v33 }
  0x46   : > { %892 = vmatprep.subr.bf16.mxu0 %v1772_v34  ;;  %935 = vmatprep.subr.bf16.mxu1 %v1774_v35 }
  0x49   : > { %893 = vmatpush1.bf16.msra.mxu0 %v1771_v40  ;;  %936 = vmatpush1.bf16.msra.mxu1 %v1773_v41  ;;  %v460_v41 = vsub.s32 4, %v2208_v15 }
  0x4a   : > { %894 = vmatprep.subr.bf16.mxu0 %v1764_v42  ;;  %937 = vmatprep.subr.bf16.mxu1 %v1766_v43  ;;  %v468_v42 = vsub.s32 6, %v2208_v15  ;;  %v464_v43 = vsub.s32 5, %v2208_v15 }
  0x4b   : > { %v461_v45 = vrot.slane %v440_v17, %v460_v41 }
  0x4c   : > { %v469_v0 = vrot.slane %v440_v17, %v468_v42  ;;  %v465_v46 = vrot.slane %v440_v17, %v464_v43 }
  0x4d   : > { %895 = vmatpush1.bf16.msra.mxu0 %v1763_v47  ;;  %938 = vmatpush1.bf16.msra.mxu1 %v1765_v48  ;;  %v473_v48 = vrot.slane %v440_v17, %v472_v44 }
  0x4e   : > { %896 = vmatprep.subr.bf16.mxu0 %v1756_v49  ;;  %939 = vmatprep.subr.bf16.mxu1 %v1758_v50 }
  0x51   : > { %897 = vmatpush1.bf16.msra.mxu0 %v1755_v55  ;;  %940 = vmatpush1.bf16.msra.mxu1 %v1757_v56 }
  0x52   : > { %898 = vmatprep.subr.bf16.mxu0 %v1748_v57  ;;  %941 = vmatprep.subr.bf16.mxu1 %v1750_v58 }
  0x55   : > { %899 = vmatpush1.bf16.msra.mxu0 %v1747_v63  ;;  %942 = vmatpush1.bf16.msra.mxu1 %v1749_v1  ;;  %v1894_v1 = vmov (%p974_p2), 0.0  }
  0x56   : > { %900 = vmatprep.subr.bf16.mxu0 %v1740_v2  ;;  %943 = vmatprep.subr.bf16.mxu1 %v1742_v3  ;;  %980 = vst [vmem:[%s2416_s5] sm:$0xff] (%p974_p2), %v1894_v1  ;;  %981 = vst [vmem:[%s2417_s6] sm:$0xff] (%p974_p2), %v1894_v1 }
  0x59   : > { %901 = vmatpush1.bf16.msra.mxu0 %v1739_v8  ;;  %944 = vmatpush1.bf16.msra.mxu1 %v1741_v9 }
  0x5a   : > { %902 = vmatprep.subr.bf16.mxu0 %v1732_v10  ;;  %945 = vmatprep.subr.bf16.mxu1 %v1734_v11 }
  0x5d   : > { %903 = vmatpush1.bf16.msra.mxu0 %v1731_v12  ;;  %946 = vmatpush1.bf16.msra.mxu1 %v1733_v13 }
  0x60   : > { %921 = vmatmul.mubr.bf16.vlgmr.msra.gmra.mxu0 %v2121_v21  ;;  %964 = vmatmul.mubr.bf16.vlgmr.msra.gmra.mxu1 %v2121_v21 }
 0x100   : > { %v836_v25 = vpop.f32.mrf.mxu0  ;;  %v879_v21 = vpop.f32.mrf.mxu1 }
 0x101   : > { %v2214_v27 = vadd.f32 %v836_v25, %v445_v22  ;;  %v2216_v28 = vadd.f32 %v879_v21, %v453_v23 }
 0x102   : > { %v838_v29 = vpop.f32.mrf.mxu0  ;;  %v881_v31 = vpop.f32.mrf.mxu1 }
 0x103   : > { %v2218_v30 = vadd.f32 %v838_v29, %v449_v24  ;;  %v2220_v32 = vadd.f32 %v881_v31, %v457_v26 }
 0x104   : > { %v840_v33 = vpop.f32.mrf.mxu0  ;;  %v883_v35 = vpop.f32.mrf.mxu1 }
 0x105   : > { %v2222_v34 = vadd.f32 %v840_v33, %v445_v22  ;;  %v2224_v36 = vadd.f32 %v883_v35, %v453_v23 }
 0x106   : > { %v842_v37 = vpop.f32.mrf.mxu0  ;;  %v885_v39 = vpop.f32.mrf.mxu1 }
 0x107   : > { %v2226_v38 = vadd.f32 %v842_v37, %v449_v24  ;;  %v2228_v40 = vadd.f32 %v885_v39, %v457_v26 }
 0x120   : > { %v922_v47 = vpop.f32.mrf.mxu0  ;;  %v965_v50 = vpop.f32.mrf.mxu1 }
 0x121   : > { %v2234_v49 = vadd.f32 %v922_v47, %v461_v45  ;;  %v2236_v51 = vadd.f32 %v965_v50, %v469_v0 }
 0x122   : > { %v924_v52 = vpop.f32.mrf.mxu0  ;;  %v967_v54 = vpop.f32.mrf.mxu1 }
 0x123   : > { %v2238_v53 = vadd.f32 %v924_v52, %v465_v46  ;;  %v2240_v55 = vadd.f32 %v967_v54, %v473_v48  ;;  %979 = sbr.rel (!%p974_p2) target bundleno = 296 (0x128), region = 48 }
 0x124   : > { %v926_v56 = vpop.f32.mrf.mxu0  ;;  %v969_v58 = vpop.f32.mrf.mxu1 }
 0x125   : > { %v2242_v57 = vadd.f32 %v926_v56, %v461_v45  ;;  %v2244_v59 = vadd.f32 %v969_v58, %v469_v0 }
 0x126   : > { %v928_v60 = vpop.f32.mrf.mxu0  ;;  %v971_v62 = vpop.f32.mrf.mxu1 }
 0x127   : > { %v2246_v61 = vadd.f32 %v928_v60, %v465_v46  ;;  %v2248_v63 = vadd.f32 %v971_v62, %v473_v48 }
 0x128 PF: > { %v983_v2 = vadd.f32 %v2222_v34, %v2214_v27  ;;  %v990_v3 = vadd.f32 %v2226_v38, %v2218_v30  ;;  %v997_v4 = vadd.f32 %v2224_v36, %v2216_v28  ;;  %v1004_v5 = vadd.f32 %v2228_v40, %v2220_v32 }
 0x129   : > { %v1011_v6 = vadd.f32 %v2242_v57, %v2234_v49  ;;  %v1018_v7 = vadd.f32 %v2246_v61, %v2238_v53  ;;  %v1025_v8 = vadd.f32 %v2244_v59, %v2236_v51  ;;  %v1032_v9 = vadd.f32 %v2248_v63, %v2240_v55 }
 0x12a   : > { %v984_v10 = vrot.slane %v983_v2, 4  ;;  %v991_v11 = vrot.slane %v990_v3, 4  ;;  %v998_v12 = vrot.slane %v997_v4, 4  ;;  %v1005_v13 = vrot.slane %v1004_v5, 4 }
 0x12b   : > { %v1012_v14 = vrot.slane %v1011_v6, 4  ;;  %v1019_v16 = vrot.slane %v1018_v7, 4  ;;  %v1026_v17 = vrot.slane %v1025_v8, 4  ;;  %v1033_v18 = vrot.slane %v1032_v9, 4 }
 0x12c   : > { %v985_v19 = vadd.f32 %v984_v10, %v983_v2  ;;  %v992_v20 = vadd.f32 %v991_v11, %v990_v3  ;;  %v999_v22 = vadd.f32 %v998_v12, %v997_v4  ;;  %v1006_v23 = vadd.f32 %v1005_v13, %v1004_v5 }
 0x12d   : > { %v1013_v24 = vadd.f32 %v1012_v14, %v1011_v6  ;;  %v1020_v25 = vadd.f32 %v1019_v16, %v1018_v7  ;;  %v1027_v26 = vadd.f32 %v1026_v17, %v1025_v8  ;;  %v1034_v21 = vadd.f32 %v1033_v18, %v1032_v9 }
 0x12e   : > { %v986_v29 = vrot.slane %v985_v19, 2  ;;  %v993_v31 = vrot.slane %v992_v20, 2  ;;  %v1000_v33 = vrot.slane %v999_v22, 2  ;;  %v1007_v35 = vrot.slane %v1006_v23, 2 }
 0x12f   : > { %v1014_v37 = vrot.slane %v1013_v24, 2  ;;  %v1021_v39 = vrot.slane %v1020_v25, 2  ;;  %v1028_v41 = vrot.slane %v1027_v26, 2  ;;  %v1035_v42 = vrot.slane %v1034_v21, 2 }
 0x130   : > { %v987_v43 = vadd.f32 %v986_v29, %v985_v19  ;;  %v994_v44 = vadd.f32 %v993_v31, %v992_v20  ;;  %v1001_v45 = vadd.f32 %v1000_v33, %v999_v22  ;;  %v1008_v0 = vadd.f32 %v1007_v35, %v1006_v23 }
 0x131   : > { %v1015_v46 = vadd.f32 %v1014_v37, %v1013_v24  ;;  %v1022_v47 = vadd.f32 %v1021_v39, %v1020_v25  ;;  %v1029_v48 = vadd.f32 %v1028_v41, %v1027_v26  ;;  %v1036_v50 = vadd.f32 %v1035_v42, %v1034_v21 }
 0x132   : > { %v988_v52 = vrot.slane %v987_v43, 1  ;;  %v995_v54 = vrot.slane %v994_v44, 1  ;;  %v1002_v56 = vrot.slane %v1001_v45, 1  ;;  %v1009_v58 = vrot.slane %v1008_v0, 1 }
 0x133   : > { %v1016_v60 = vrot.slane %v1015_v46, 1  ;;  %v1023_v62 = vrot.slane %v1022_v47, 1  ;;  %v1030_v1 = vrot.slane %v1029_v48, 1  ;;  %v1037_v2 = vrot.slane %v1036_v50, 1 }
 0x134   : > { %v989_v3 = vadd.f32 %v988_v52, %v987_v43  ;;  %v996_v4 = vadd.f32 %v995_v54, %v994_v44  ;;  %v1003_v5 = vadd.f32 %v1002_v56, %v1001_v45  ;;  %v1010_v6 = vadd.f32 %v1009_v58, %v1008_v0 }
 0x135   : > { %v1017_v7 = vadd.f32 %v1016_v60, %v1015_v46  ;;  %v1024_v8 = vadd.f32 %v1023_v62, %v1022_v47  ;;  %v1031_v9 = vadd.f32 %v1030_v1, %v1029_v48  ;;  %v1038_v10 = vadd.f32 %v1037_v2, %v1036_v50 }
 0x136   : > { %v1047_v11 = vcombine.low %v989_v3, %v996_v4  ;;  %v1048_v12 = vcombine.low %v1003_v5, %v1010_v6  ;;  %v1100_v13 = vmul.f32 %v2214_v27, %v2214_v27  ;;  %v1895_v17 = vmov 1966171168  }
 0x137   : > { %v1049_v14 = vcombine.low %v1017_v7, %v1024_v8  ;;  %v1050_v16 = vcombine.low %v1031_v9, %v1038_v10  ;;  %v1052_v18 = vunpack.c.l.s4 %v1895_v17  ;;  %v1101_v19 = vmul.f32 %v2218_v30, %v2218_v30 }
 0x138   : > { %v1102_v20 = vmul.f32 %v2216_v28, %v2216_v28  ;;  %v1103_v22 = vmul.f32 %v2220_v32, %v2220_v32  ;;  %v1104_v23 = vmul.f32 %v2234_v49, %v2234_v49  ;;  %v1105_v24 = vmul.f32 %v2238_v53, %v2238_v53 }
 0x139   : > { %v1053_v25 = vunpack.c.0.s8 %v1052_v18  ;;  %v1106_v26 = vmul.f32 %v2236_v51, %v2236_v51  ;;  %v1107_v21 = vmul.f32 %v2240_v55, %v2240_v55  ;;  %v1108_v29 = vmul.f32 %v2222_v34, %v2222_v34 }
 0x13a   : > { %v1109_v31 = vmul.f32 %v2226_v38, %v2226_v38  ;;  %v1110_v33 = vmul.f32 %v2224_v36, %v2224_v36  ;;  %v1111_v35 = vmul.f32 %v2228_v40, %v2228_v40  ;;  %v1112_v37 = vmul.f32 %v2242_v57, %v2242_v57 }
 0x13b   : > { %v2301_v39 = vsub.s32 %v1053_v25, %v2208_v15  ;;  %v1113_v41 = vmul.f32 %v2246_v61, %v2246_v61  ;;  %v1114_v42 = vmul.f32 %v2244_v59, %v2244_v59  ;;  %v1115_v43 = vmul.f32 %v2248_v63, %v2248_v63 }
 0x13c   : > { %v1116_v44 = vadd.f32 %v1108_v29, %v1100_v13  ;;  %v1123_v45 = vadd.f32 %v1109_v31, %v1101_v19  ;;  %v1130_v0 = vadd.f32 %v1110_v33, %v1102_v20  ;;  %v1137_v46 = vadd.f32 %v1111_v35, %v1103_v22 }
 0x13d   : > { %v1057_v47 = vrot.slane %v1047_v11, %v2301_v39  ;;  %v1064_v48 = vrot.slane %v1048_v12, %v2301_v39  ;;  %v1071_v15 = vrot.slane %v1049_v14, %v2301_v39  ;;  %v1078_v50 = vrot.slane %v1050_v16, %v2301_v39  ;;  %v982_v11 = vld [vmem:[%s2416_s5] sm:$0xff] }
 0x13e   : > { %v1117_v52 = vrot.slane %v1116_v44, 4  ;;  %v1124_v54 = vrot.slane %v1123_v45, 4  ;;  %v1131_v56 = vrot.slane %v1130_v0, 4  ;;  %v1138_v58 = vrot.slane %v1137_v46, 4 }
 0x13f   : > { %v1079_v60 = vcombine.low %v1057_v47, %v1064_v48  ;;  %v1080_v62 = vcombine.low %v1071_v15, %v1078_v50  ;;  %v1144_v1 = vadd.f32 %v1112_v37, %v1104_v23  ;;  %v1151_v2 = vadd.f32 %v1113_v41, %v1105_v24 }
 0x140   : > { %v1118_v3 = vadd.f32 %v1117_v52, %v1116_v44  ;;  %v1125_v4 = vadd.f32 %v1124_v54, %v1123_v45  ;;  %v1132_v5 = vadd.f32 %v1131_v56, %v1130_v0  ;;  %v1139_v6 = vadd.f32 %v1138_v58, %v1137_v46 }
 0x141   : > { %v1087_v7 = vrot.slane %v1079_v60, %v2301_v39  ;;  %v1094_v8 = vrot.slane %v1080_v62, %v2301_v39  ;;  %v1145_v9 = vrot.slane %v1144_v1, 4  ;;  %v1152_v10 = vrot.slane %v1151_v2, 4 }
 0x142   : > { %v1119_v12 = vrot.slane %v1118_v3, 2  ;;  %v1126_v13 = vrot.slane %v1125_v4, 2  ;;  %v1133_v14 = vrot.slane %v1132_v5, 2  ;;  %v1140_v16 = vrot.slane %v1139_v6, 2 }
 0x143   : > { %v1095_v17 = vcombine.low %v1087_v7, %v1094_v8  ;;  %v1146_v18 = vadd.f32 %v1145_v9, %v1144_v1  ;;  %v1153_v19 = vadd.f32 %v1152_v10, %v1151_v2  ;;  %v1158_v20 = vadd.f32 %v1114_v42, %v1106_v26 }
 0x144   : > { %v1120_v22 = vadd.f32 %v1119_v12, %v1118_v3  ;;  %v1127_v23 = vadd.f32 %v1126_v13, %v1125_v4  ;;  %v1134_v24 = vadd.f32 %v1133_v14, %v1132_v5  ;;  %v1141_v25 = vadd.f32 %v1140_v16, %v1139_v6 }
 0x145   : > { %v1097_v29 = vadd.f32 %v1095_v17, %v982_v11  ;;  %v1147_v31 = vrot.slane %v1146_v18, 2  ;;  %v1154_v33 = vrot.slane %v1153_v19, 2  ;;  %v1159_v35 = vrot.slane %v1158_v20, 4 }
 0x146   : > { %v1121_v37 = vrot.slane %v1120_v22, 1  ;;  %v1128_v41 = vrot.slane %v1127_v23, 1  ;;  %v1135_v44 = vrot.slane %v1134_v24, 1  ;;  %v1142_v45 = vrot.slane %v1141_v25, 1 }
 0x147   : > { %1098 = vst [vmem:[%s2416_s5] sm:$0xff] %v1097_v29  ;;  %v1148_v0 = vadd.f32 %v1147_v31, %v1146_v18  ;;  %v1155_v46 = vadd.f32 %v1154_v33, %v1153_v19  ;;  %v1160_v47 = vadd.f32 %v1159_v35, %v1158_v20  ;;  %v1165_v26 = vadd.f32 %v1115_v43, %v1107_v21 }
 0x148   : > { %v1122_v42 = vadd.f32 %v1121_v37, %v1120_v22  ;;  %v1129_v48 = vadd.f32 %v1128_v41, %v1127_v23  ;;  %v1136_v15 = vadd.f32 %v1135_v44, %v1134_v24  ;;  %v1143_v50 = vadd.f32 %v1142_v45, %v1141_v25 }
 0x149   : > { %v1149_v52 = vrot.slane %v1148_v0, 1  ;;  %v1156_v54 = vrot.slane %v1155_v46, 1  ;;  %v1161_v56 = vrot.slane %v1160_v47, 2  ;;  %v1166_v58 = vrot.slane %v1165_v26, 4 }
 0x14a   : > { %v1180_v60 = vcombine.low %v1122_v42, %v1129_v48  ;;  %v1181_v62 = vcombine.low %v1136_v15, %v1143_v50  ;;  %v1232_v1 = vmax.f32 %v2214_v27, %v2222_v34  ;;  %v1239_v2 = vmax.f32 %v2218_v30, %v2226_v38 }
 0x14b   : > { %v1150_v3 = vadd.f32 %v1149_v52, %v1148_v0  ;;  %v1157_v4 = vadd.f32 %v1156_v54, %v1155_v46  ;;  %v1162_v5 = vadd.f32 %v1161_v56, %v1160_v47  ;;  %v1167_v21 = vadd.f32 %v1166_v58, %v1165_v26 }
 0x14c   : > { %v1190_v43 = vrot.slane %v1180_v60, %v2301_v39  ;;  %v1197_v6 = vrot.slane %v1181_v62, %v2301_v39  ;;  %v1233_v7 = vrot.slane %v1232_v1, 4  ;;  %v1240_v8 = vrot.slane %v1239_v2, 4 }
 0x14d   : > { %v1163_v9 = vrot.slane %v1162_v5, 1  ;;  %v1168_v10 = vrot.slane %v1167_v21, 2  ;;  %v1182_v11 = vcombine.low %v1150_v3, %v1157_v4  ;;  %v1246_v12 = vmax.f32 %v2216_v28, %v2224_v36 }
 0x14e   : > { %v1212_v13 = vcombine.low %v1190_v43, %v1197_v6  ;;  %v1234_v14 = vmax.f32 %v1232_v1, %v1233_v7  ;;  %v1241_v16 = vmax.f32 %v1239_v2, %v1240_v8  ;;  %v1253_v17 = vmax.f32 %v2220_v32, %v2228_v40 }
 0x14f   : > { %v1164_v18 = vadd.f32 %v1163_v9, %v1162_v5  ;;  %v1169_v19 = vadd.f32 %v1168_v10, %v1167_v21  ;;  %v1204_v20 = vrot.slane %v1182_v11, %v2301_v39  ;;  %v1247_v22 = vrot.slane %v1246_v12, 4 }
 0x150   : > { %v1220_v23 = vrot.slane %v1212_v13, %v2301_v39  ;;  %v1235_v24 = vrot.slane %v1234_v14, 2  ;;  %v1242_v25 = vrot.slane %v1241_v16, 2  ;;  %v1254_v29 = vrot.slane %v1253_v17, 4 }
 0x151   : > { %v1170_v31 = vrot.slane %v1169_v19, 1  ;;  %v1248_v33 = vmax.f32 %v1246_v12, %v1247_v22  ;;  %v1260_v35 = vmax.f32 %v2234_v49, %v2242_v57  ;;  %v1267_v37 = vmax.f32 %v2238_v53, %v2246_v61 }
 0x152   : > { %v1236_v41 = vmax.f32 %v1234_v14, %v1235_v24  ;;  %v1243_v44 = vmax.f32 %v1241_v16, %v1242_v25  ;;  %v1255_v45 = vmax.f32 %v1253_v17, %v1254_v29  ;;  %v1274_v0 = vmax.f32 %v2236_v51, %v2244_v59 }
 0x153   : > { %v1171_v46 = vadd.f32 %v1170_v31, %v1169_v19  ;;  %v1249_v47 = vrot.slane %v1248_v33, 2  ;;  %v1261_v26 = vrot.slane %v1260_v35, 4  ;;  %v1268_v42 = vrot.slane %v1267_v37, 4 }
 0x154   : > { %v1237_v48 = vrot.slane %v1236_v41, 1  ;;  %v1244_v15 = vrot.slane %v1243_v44, 1  ;;  %v1256_v50 = vrot.slane %v1255_v45, 2  ;;  %v1275_v52 = vrot.slane %v1274_v0, 4 }
 0x155   : > { %v1183_v54 = vcombine.low %v1164_v18, %v1171_v46  ;;  %v1250_v56 = vmax.f32 %v1248_v33, %v1249_v47  ;;  %v1262_v58 = vmax.f32 %v1260_v35, %v1261_v26  ;;  %v1269_v60 = vmax.f32 %v1267_v37, %v1268_v42 }
 0x156   : > { %v2339_v62 = vmax.f32 %v1236_v41, %v1237_v48  ;;  %v2341_v1 = vmax.f32 %v1243_v44, %v1244_v15  ;;  %v1257_v2 = vmax.f32 %v1255_v45, %v1256_v50  ;;  %v1276_v3 = vmax.f32 %v1274_v0, %v1275_v52 }
 0x157   : > { %v1211_v4 = vrot.slane %v1183_v54, %v2301_v39  ;;  %v1251_v5 = vrot.slane %v1250_v56, 1  ;;  %v1263_v21 = vrot.slane %v1262_v58, 2  ;;  %v1270_v43 = vrot.slane %v1269_v60, 2 }
 0x158   : > { %v1258_v6 = vrot.slane %v1257_v2, 1  ;;  %v1277_v7 = vrot.slane %v1276_v3, 2  ;;  %v1281_v8 = vmax.f32 %v2240_v55, %v2248_v63  ;;  %v1288_v9 = vmin.f32 %v2214_v27, %v2222_v34  ;;  %v1099_v27 = vld [vmem:[%s2417_s6] sm:$0xff] }
 0x159   : > { %v1213_v10 = vcombine.low %v1204_v20, %v1211_v4  ;;  %v2348_v11 = vmax.f32 %v1250_v56, %v1251_v5  ;;  %v1264_v12 = vmax.f32 %v1262_v58, %v1263_v21  ;;  %v1271_v13 = vmax.f32 %v1269_v60, %v1270_v43 }
 0x15a   : > { %v2350_v14 = vmax.f32 %v1257_v2, %v1258_v6  ;;  %v1278_v16 = vmax.f32 %v1276_v3, %v1277_v7  ;;  %v1282_v17 = vrot.slane %v1281_v8, 4  ;;  %v1289_v18 = vrot.slane %v1288_v9, 4 }
 0x15b   : > { %v1227_v19 = vrot.slane %v1213_v10, %v2301_v39  ;;  %v1265_v22 = vrot.slane %v1264_v12, 1  ;;  %v1272_v24 = vrot.slane %v1271_v13, 1  ;;  %v1295_v25 = vmin.f32 %v2218_v30, %v2226_v38 }
 0x15c   : > { %v1279_v34 = vrot.slane %v1278_v16, 1  ;;  %v1283_v20 = vmax.f32 %v1281_v8, %v1282_v17  ;;  %v1290_v29 = vmin.f32 %v1288_v9, %v1289_v18  ;;  %v1302_v31 = vmin.f32 %v2216_v28, %v2224_v36 }
 0x15d   : > { %v1228_v33 = vcombine.low %v1220_v23, %v1227_v19  ;;  %v2360_v35 = vmax.f32 %v1264_v12, %v1265_v22  ;;  %v1273_v37 = vmax.f32 %v1271_v13, %v1272_v24  ;;  %v1296_v41 = vrot.slane %v1295_v25, 4 }
 0x15e   : > { %v1280_v44 = vmax.f32 %v1278_v16, %v1279_v34  ;;  %v1284_v45 = vrot.slane %v1283_v20, 2  ;;  %v1291_v0 = vrot.slane %v1290_v29, 2  ;;  %v1303_v46 = vrot.slane %v1302_v31, 4 }
 0x15f   : > { %v1230_v30 = vadd.f32 %v1228_v33, %v1099_v27  ;;  %v1297_v38 = vmin.f32 %v1295_v25, %v1296_v41  ;;  %v1309_v47 = vmin.f32 %v2220_v32, %v2228_v40  ;;  %v1316_v26 = vmin.f32 %v2234_v49, %v2242_v57 }
 0x160   : > { %v1285_v42 = vmax.f32 %v1283_v20, %v1284_v45  ;;  %v1292_v48 = vmin.f32 %v1290_v29, %v1291_v0  ;;  %v1304_v28 = vmin.f32 %v1302_v31, %v1303_v46  ;;  %v1323_v36 = vmin.f32 %v2238_v53, %v2246_v61 }
 0x161   : > { %1231 = vst [vmem:[%s2417_s6] sm:$0xff] %v1230_v30  ;;  %v1298_v23 = vrot.slane %v1297_v38, 2  ;;  %v1310_v15 = vrot.slane %v1309_v47, 4  ;;  %v1317_v50 = vrot.slane %v1316_v26, 4  ;;  %v1330_v52 = vmin.f32 %v2236_v51, %v2244_v59 }
 0x162   : > { %v1286_v32 = vrot.slane %v1285_v42, 1  ;;  %v1293_v40 = vrot.slane %v1292_v48, 1  ;;  %v1305_v54 = vrot.slane %v1304_v28, 2  ;;  %v1324_v49 = vrot.slane %v1323_v36, 4 }
 0x163   : > { %v1299_v57 = vmin.f32 %v1297_v38, %v1298_v23  ;;  %v1311_v56 = vmin.f32 %v1309_v47, %v1310_v15  ;;  %v1318_v58 = vmin.f32 %v1316_v26, %v1317_v50  ;;  %v1331_v60 = vrot.slane %v1330_v52, 4 }
 0x164   : > { %v1287_v2 = vmax.f32 %v1285_v42, %v1286_v32  ;;  %v1294_v53 = vmin.f32 %v1292_v48, %v1293_v40  ;;  %v1306_v61 = vmin.f32 %v1304_v28, %v1305_v54  ;;  %v1325_v3 = vmin.f32 %v1323_v36, %v1324_v49 }
 0x165   : > { %v1300_v4 = vrot.slane %v1299_v57, 1  ;;  %v1312_v5 = vrot.slane %v1311_v56, 2  ;;  %v1319_v21 = vrot.slane %v1318_v58, 2  ;;  %v1332_v43 = vmin.f32 %v1330_v52, %v1331_v60 }
 0x166   : > { %v1307_v6 = vrot.slane %v1306_v61, 1  ;;  %v1326_v7 = vrot.slane %v1325_v3, 2  ;;  %v1337_v51 = vmin.f32 %v2240_v55, %v2248_v63  ;;  %v1355_v59 = vcombine.low %v2339_v62, %v2341_v1 }
 0x167   : > { %v1301_v8 = vmin.f32 %v1299_v57, %v1300_v4  ;;  %v1313_v9 = vmin.f32 %v1311_v56, %v1312_v5  ;;  %v1320_v10 = vmin.f32 %v1318_v58, %v1319_v21  ;;  %v1333_v12 = vrot.slane %v1332_v43, 2 }
 0x168   : > { %v1308_v13 = vmin.f32 %v1306_v61, %v1307_v6  ;;  %v1327_v16 = vmin.f32 %v1325_v3, %v1326_v7  ;;  %v1338_v17 = vrot.slane %v1337_v51, 4  ;;  %v1356_v18 = vcombine.low %v2348_v11, %v2350_v14 }
 0x169   : > { %v1314_v19 = vrot.slane %v1313_v9, 1  ;;  %v1321_v22 = vrot.slane %v1320_v10, 1  ;;  %v1334_v24 = vmin.f32 %v1332_v43, %v1333_v12  ;;  %v1357_v25 = vcombine.low %v2360_v35, %v1273_v37 }
 0x16a   : > { %v1328_v27 = vrot.slane %v1327_v16, 1  ;;  %v1339_v55 = vmin.f32 %v1337_v51, %v1338_v17  ;;  %v1358_v63 = vcombine.low %v1280_v44, %v1287_v2  ;;  %v1365_v62 = vrot.slane %v1355_v59, %v2301_v39 }
 0x16b   : > { %v1315_v1 = vmin.f32 %v1313_v9, %v1314_v19  ;;  %v1322_v34 = vmin.f32 %v1320_v10, %v1321_v22  ;;  %v1335_v20 = vrot.slane %v1334_v24, 1  ;;  %v1372_v29 = vrot.slane %v1356_v18, %v2301_v39 }
 0x16c   : > { %v1329_v31 = vmin.f32 %v1327_v16, %v1328_v27  ;;  %v1340_v33 = vrot.slane %v1339_v55, 2  ;;  %v1379_v41 = vrot.slane %v1357_v25, %v2301_v39  ;;  %v1386_v11 = vrot.slane %v1358_v63, %v2301_v39 }
 0x16d   : > { %v1387_v14 = vcombine.low %v1365_v62, %v1372_v29  ;;  %v1414_v45 = vcombine.low %v1294_v53, %v1301_v8  ;;  %v1415_v35 = vcombine.low %v1308_v13, %v1315_v1  ;;  %v1336_v44 = vmin.f32 %v1334_v24, %v1335_v20 }
 0x16e   : > { %v1341_v37 = vmin.f32 %v1339_v55, %v1340_v33  ;;  %v1388_v0 = vcombine.low %v1379_v41, %v1386_v11  ;;  %v1416_v30 = vcombine.low %v1322_v34, %v1329_v31 }
 0x16f   : > { %v1395_v46 = vrot.slane %v1387_v14, %v2301_v39  ;;  %v1424_v26 = vrot.slane %v1414_v45, %v2301_v39  ;;  %v1431_v42 = vrot.slane %v1415_v35, %v2301_v39 }
 0x170   : > { %v1342_v38 = vrot.slane %v1341_v37, 1  ;;  %v1402_v47 = vrot.slane %v1388_v0, %v2301_v39  ;;  %v1438_v23 = vrot.slane %v1416_v30, %v2301_v39 }
 0x171   : > { %v1446_v15 = vcombine.low %v1424_v26, %v1431_v42 }
 0x172   : > { %v1343_v48 = vmin.f32 %v1341_v37, %v1342_v38  ;;  %v1403_v28 = vcombine.low %v1395_v46, %v1402_v47 }
 0x173   : > { %v1454_v32 = vrot.slane %v1446_v15, %v2301_v39 }
 0x174   : > { %1405 = vst [vmem:[%s345_s21] sm:$0xff] %v1403_v28  ;;  %v1417_v36 = vcombine.low %v1336_v44, %v1343_v48 }
 0x176   : > { %v1445_v50 = vrot.slane %v1417_v36, %v2301_v39 }
 0x178   : > { %v1447_v52 = vcombine.low %v1438_v23, %v1445_v50 }
 0x17a   : > { %v1461_v40 = vrot.slane %v1447_v52, %v2301_v39 }
 0x17c   : > { %v1462_v54 = vcombine.low %v1454_v32, %v1461_v40 }
 0x17e   : > { %1464 = vst [vmem:[%s349_s24] sm:$0xff] %v1462_v54 }
 0x17f PF: > { %s20_s29 = sadd.s32 1, %s1890_s29   ;;  %s2422_s27 = smov %s1886_s28 }
 0x180   : > { %p17_p3 = scmp.ge.s32.totalorder %s20_s29, 4   ;;  %s2423_s28 = smov %s2425_s9 }
 0x182   :  { %19 = sbr.rel (!%p17_p3) target bundleno = 2 (0x2), region = 115 }
 0x187   :  { %1636 = vsyncpa [#allocation3], 1 }
 0x188   :  { %1638 = vsyncpa [#allocation3 + $0x1], 1 }

// kernel: input_transform_net.7
= control target key start
LH: loop header
LB: loop body
LE: loop exit
PB: predicated region body
PF: predicated region fallthrough
CT: control target
= control target key end

     0   :  { %v52_v34 = vlaneseq  ;;  %v3998_v40 = vmov 1983009808   ;;  %vm2140_vm0 = vcmask 1041408   ;;  %vm3123_vm1 = vcmask 66560   ;;  %s5314_s4 = inlined_call_operand.vmem [shape: bf16[1024,512], index: 4, kind: input, shape index: {}]   ;;  %s5315_s2 = inlined_call_operand.vmem [shape: f32[1,1024], index: 2, kind: input, shape index: {}]   ;;  %s5316_s3 = inlined_call_operand.vmem [shape: f32[1,1024], index: 3, kind: input, shape index: {}]   ;;  %s5317_s0 = inlined_call_operand.vmem [shape: f32[2,1024], index: 0, kind: input, shape index: {}]   ;;  %s5318_s1 = inlined_call_operand.vmem [shape: f32[2,1024], index: 1, kind: input, shape index: {}]   ;;  %s5319_s5 = inlined_call_operand.vmem [shape: f32[1,512], index: 5, kind: input, shape index: {}]   ;;  %s5320_s8 = inlined_call_operand.vmem [shape: bf16[512,256], index: 8, kind: input, shape index: {}]   ;;  %s5321_s6 = inlined_call_operand.vmem [shape: f32[1,512], index: 6, kind: input, shape index: {}]   ;;  %s5322_s7 = inlined_call_operand.vmem [shape: f32[1,512], index: 7, kind: input, shape index: {}]   ;;  %s5323_s12 = inlined_call_operand.vmem [shape: bf16[256,9], index: 12, kind: input, shape index: {}]   ;;  %s5324_s9 = inlined_call_operand.vmem [shape: f32[1,256], index: 9, kind: input, shape index: {}]   ;;  %s5325_s10 = inlined_call_operand.vmem [shape: f32[1,256], index: 10, kind: input, shape index: {}]   ;;  %s5326_s11 = inlined_call_operand.vmem [shape: f32[1,256], index: 11, kind: input, shape index: {}]   ;;  %s5327_s13 = inlined_call_operand.vmem [shape: f32[1,9], index: 13, kind: input, shape index: {}]   ;;  %s5328_s14 = inlined_call_operand.vmem [shape: f32[2,9], index: 14, kind: output, shape index: {}]  }
   0x1   :  { %v3490_v0 = vld [vmem:[%s5314_s4 + $0xe4] ss:$16 sps:$4 sm:$0xff]   ;;  %v3494_v2 = vld [vmem:[%s5314_s4 + $0xe0] ss:$16 sps:$4 sm:$0xff]   ;;  %v87_v41 = vunpack.c.l.s4 %v3998_v40 }
   0x2   :  { %v3492_v1 = vld [vmem:[%s5314_s4 + $0x2e4] ss:$16 sps:$4 sm:$0xff]   ;;  %1812 = vmatprep.subr.bf16.mxu0 %v3490_v0  ;;  %v3495_v3 = vld [vmem:[%s5314_s4 + $0x2e0] ss:$16 sps:$4 sm:$0xff]   ;;  %v4189_v39 = vshrl.u32 %v52_v34, 7 }
   0x3   :  { %1853 = vmatprep.subr.bf16.mxu1 %v3492_v1  ;;  %v3496_v4 = vld [vmem:[%s5314_s4 + $0xc4] ss:$16 sps:$4 sm:$0xff]   ;;  %1813 = vmatpush1.bf16.msra.mxu0 %v3494_v2  ;;  %v3500_v6 = vld [vmem:[%s5314_s4 + $0xc0] ss:$16 sps:$4 sm:$0xff]   ;;  %v88_v49 = vunpack.c.0.s8 %v87_v41 }
   0x4   :  { %1854 = vmatpush1.bf16.msra.mxu1 %v3495_v3  ;;  %v3498_v5 = vld [vmem:[%s5314_s4 + $0x2c4] ss:$16 sps:$4 sm:$0xff]   ;;  %1814 = vmatprep.subr.bf16.mxu0 %v3496_v4  ;;  %v3501_v7 = vld [vmem:[%s5314_s4 + $0x2c0] ss:$16 sps:$4 sm:$0xff]   ;;  %v4204_v46 = vsub.s32 0, %v4189_v39  ;;  %v4207_v47 = vsub.s32 1, %v4189_v39 }
   0x5   :  { %1855 = vmatprep.subr.bf16.mxu1 %v3498_v5  ;;  %v3502_v8 = vld [vmem:[%s5314_s4 + $0xa4] ss:$16 sps:$4 sm:$0xff]   ;;  %v3506_v10 = vld [vmem:[%s5314_s4 + $0xa0] ss:$16 sps:$4 sm:$0xff]   ;;  %v4210_v48 = vsub.s32 2, %v4189_v39  ;;  %v4219_v52 = vsub.s32 3, %v4189_v39  ;;  %v4234_v59 = vsub.s32 %v88_v49, %v4189_v39 }
   0x6   :  { %v3504_v9 = vld [vmem:[%s5314_s4 + $0x2a4] ss:$16 sps:$4 sm:$0xff]   ;;  %v3507_v11 = vld [vmem:[%s5314_s4 + $0x2a0] ss:$16 sps:$4 sm:$0xff]   ;;  %v70_v53 = vsub.s32 4, %v4189_v39  ;;  %v74_v55 = vsub.s32 5, %v4189_v39 }
   0x7   :  { %1815 = vmatpush1.bf16.msra.mxu0 %v3500_v6  ;;  %v3508_v12 = vld [vmem:[%s5314_s4 + $0x84] ss:$16 sps:$4 sm:$0xff]   ;;  %v3512_v14 = vld [vmem:[%s5314_s4 + $0x80] ss:$16 sps:$4 sm:$0xff]   ;;  %v78_v56 = vsub.s32 6, %v4189_v39  ;;  %v82_v60 = vsub.s32 7, %v4189_v39 }
   0x8   :  { %1856 = vmatpush1.bf16.msra.mxu1 %v3501_v7  ;;  %1816 = vmatprep.subr.bf16.mxu0 %v3502_v8  ;;  %v3510_v13 = vld [vmem:[%s5314_s4 + $0x284] ss:$16 sps:$4 sm:$0xff]   ;;  %v3513_v15 = vld [vmem:[%s5314_s4 + $0x280] ss:$16 sps:$4 sm:$0xff]  }
   0x9   :  { %1857 = vmatprep.subr.bf16.mxu1 %v3504_v9  ;;  %v3514_v16 = vld [vmem:[%s5314_s4 + $0x64] ss:$16 sps:$4 sm:$0xff]   ;;  %v3518_v18 = vld [vmem:[%s5314_s4 + $0x60] ss:$16 sps:$4 sm:$0xff]  }
   0xa   :  { %v3516_v17 = vld [vmem:[%s5314_s4 + $0x264] ss:$16 sps:$4 sm:$0xff]   ;;  %v3519_v19 = vld [vmem:[%s5314_s4 + $0x260] ss:$16 sps:$4 sm:$0xff]  }
   0xb   :  { %1817 = vmatpush1.bf16.msra.mxu0 %v3506_v10  ;;  %v3520_v20 = vld [vmem:[%s5314_s4 + $0x44] ss:$16 sps:$4 sm:$0xff]   ;;  %v3524_v22 = vld [vmem:[%s5314_s4 + $0x40] ss:$16 sps:$4 sm:$0xff]  }
   0xc   :  { %1858 = vmatpush1.bf16.msra.mxu1 %v3507_v11  ;;  %1818 = vmatprep.subr.bf16.mxu0 %v3508_v12  ;;  %v3522_v21 = vld [vmem:[%s5314_s4 + $0x244] ss:$16 sps:$4 sm:$0xff]   ;;  %v3525_v23 = vld [vmem:[%s5314_s4 + $0x240] ss:$16 sps:$4 sm:$0xff]  }
   0xd   :  { %1859 = vmatprep.subr.bf16.mxu1 %v3510_v13  ;;  %v3526_v24 = vld [vmem:[%s5314_s4 + $0x24] ss:$16 sps:$4 sm:$0xff]   ;;  %v3530_v26 = vld [vmem:[%s5314_s4 + $0x20] ss:$16 sps:$4 sm:$0xff]  }
   0xe   :  { %v3528_v25 = vld [vmem:[%s5314_s4 + $0x224] ss:$16 sps:$4 sm:$0xff]   ;;  %v3531_v27 = vld [vmem:[%s5314_s4 + $0x220] ss:$16 sps:$4 sm:$0xff]  }
   0xf   :  { %1819 = vmatpush1.bf16.msra.mxu0 %v3512_v14  ;;  %v3532_v28 = vld [vmem:[%s5314_s4 + $0x4] ss:$16 sps:$4 sm:$0xff]   ;;  %v3536_v30 = vld [vmem:[%s5314_s4] ss:$16 sps:$4 sm:$0xff]  }
  0x10   :  { %1860 = vmatpush1.bf16.msra.mxu1 %v3513_v15  ;;  %1820 = vmatprep.subr.bf16.mxu0 %v3514_v16  ;;  %v3534_v29 = vld [vmem:[%s5314_s4 + $0x204] ss:$16 sps:$4 sm:$0xff]   ;;  %v3537_v31 = vld [vmem:[%s5314_s4 + $0x200] ss:$16 sps:$4 sm:$0xff]  }
  0x11   :  { %1861 = vmatprep.subr.bf16.mxu1 %v3516_v17  ;;  %v3538_v32 = vld [vmem:[%s5314_s4 + $0x1e4] ss:$16 sps:$4 sm:$0xff]   ;;  %v3542_v35 = vld [vmem:[%s5314_s4 + $0x1e0] ss:$16 sps:$4 sm:$0xff]  }
  0x12   :  { %v3540_v33 = vld [vmem:[%s5314_s4 + $0x3e4] ss:$16 sps:$4 sm:$0xff]   ;;  %v3543_v36 = vld [vmem:[%s5314_s4 + $0x3e0] ss:$16 sps:$4 sm:$0xff]  }
  0x13   :  { %1821 = vmatpush1.bf16.msra.mxu0 %v3518_v18  ;;  %v3544_v37 = vld [vmem:[%s5314_s4 + $0x1c4] ss:$16 sps:$4 sm:$0xff]   ;;  %v3548_v42 = vld [vmem:[%s5314_s4 + $0x1c0] ss:$16 sps:$4 sm:$0xff]  }
  0x14   :  { %1862 = vmatpush1.bf16.msra.mxu1 %v3519_v19  ;;  %1822 = vmatprep.subr.bf16.mxu0 %v3520_v20  ;;  %v3546_v38 = vld [vmem:[%s5314_s4 + $0x3c4] ss:$16 sps:$4 sm:$0xff]   ;;  %v3549_v43 = vld [vmem:[%s5314_s4 + $0x3c0] ss:$16 sps:$4 sm:$0xff]  }
  0x15   :  { %1863 = vmatprep.subr.bf16.mxu1 %v3522_v21  ;;  %v3550_v44 = vld [vmem:[%s5314_s4 + $0x1a4] ss:$16 sps:$4 sm:$0xff]   ;;  %v3554_v50 = vld [vmem:[%s5314_s4 + $0x1a0] ss:$16 sps:$4 sm:$0xff]  }
  0x16   :  { %v3552_v45 = vld [vmem:[%s5314_s4 + $0x3a4] ss:$16 sps:$4 sm:$0xff]   ;;  %v3555_v51 = vld [vmem:[%s5314_s4 + $0x3a0] ss:$16 sps:$4 sm:$0xff]  }
  0x17   :  { %1823 = vmatpush1.bf16.msra.mxu0 %v3524_v22  ;;  %v3556_v54 = vld [vmem:[%s5314_s4 + $0x184] ss:$16 sps:$4 sm:$0xff]   ;;  %v3560_v61 = vld [vmem:[%s5314_s4 + $0x180] ss:$16 sps:$4 sm:$0xff]  }
  0x18   :  { %1864 = vmatpush1.bf16.msra.mxu1 %v3525_v23  ;;  %1824 = vmatprep.subr.bf16.mxu0 %v3526_v24  ;;  %v3558_v57 = vld [vmem:[%s5314_s4 + $0x384] ss:$16 sps:$4 sm:$0xff]   ;;  %v3561_v2 = vld [vmem:[%s5314_s4 + $0x380] ss:$16 sps:$4 sm:$0xff]  }
  0x19   :  { %1865 = vmatprep.subr.bf16.mxu1 %v3528_v25  ;;  %v48_v58 = vld [vmem:[%s5315_s2] sm:$0xff] }
  0x1a   :  { %v55_v62 = vrot.slane %v48_v58, %v4204_v46  ;;  %v59_v63 = vrot.slane %v48_v58, %v4207_v47  ;;  %v63_v0 = vrot.slane %v48_v58, %v4210_v48  ;;  %v67_v1 = vrot.slane %v48_v58, %v4219_v52  ;;  %v128_v3 = vld [vmem:[%s5316_s3] sm:$0xff] }
  0x1b   :  { %1825 = vmatpush1.bf16.msra.mxu0 %v3530_v26  ;;  %v71_v4 = vrot.slane %v48_v58, %v70_v53  ;;  %v75_v5 = vrot.slane %v48_v58, %v74_v55  ;;  %v79_v6 = vrot.slane %v48_v58, %v78_v56  ;;  %v3562_v7 = vld [vmem:[%s5314_s4 + $0x164] ss:$16 sps:$4 sm:$0xff]   ;;  %v133_v11 = vrot.slane %v128_v3, %v4204_v46  ;;  %v3566_v12 = vld [vmem:[%s5314_s4 + $0x160] ss:$16 sps:$4 sm:$0xff]  }
  0x1c   :  { %1866 = vmatpush1.bf16.msra.mxu1 %v3531_v27  ;;  %1826 = vmatprep.subr.bf16.mxu0 %v3532_v28  ;;  %v3564_v8 = vld [vmem:[%s5314_s4 + $0x364] ss:$16 sps:$4 sm:$0xff]   ;;  %v84_v9 = vcombine.low %v55_v62, %v59_v63  ;;  %v85_v10 = vcombine.low %v63_v0, %v67_v1  ;;  %v137_v13 = vrot.slane %v128_v3, %v4207_v47  ;;  %v3567_v17 = vld [vmem:[%s5314_s4 + $0x360] ss:$16 sps:$4 sm:$0xff]  }
  0x1d   :  { %1867 = vmatprep.subr.bf16.mxu1 %v3534_v29  ;;  %v141_v14 = vrot.slane %v128_v3, %v4210_v48  ;;  %v145_v15 = vrot.slane %v128_v3, %v4219_v52  ;;  %v83_v16 = vrot.slane %v48_v58, %v82_v60  ;;  %v101_v20 = vcombine.low %v71_v4, %v75_v5  ;;  %v49_v22 = vld [vmem:[%s5317_s0] sm:$0xff] }
  0x1e   :  { %v92_v18 = vrot.slane %v84_v9, %v4234_v59  ;;  %v99_v19 = vrot.slane %v85_v10, %v4234_v59  ;;  %v149_v21 = vrot.slane %v128_v3, %v70_v53  ;;  %v122_v23 = vld [vmem:[%s5318_s1] sm:$0xff]  ;;  %v162_v24 = vcombine.low %v133_v11, %v137_v13 }
  0x1f   :  { %1827 = vmatpush1.bf16.msra.mxu0 %v3536_v30  ;;  %v163_v25 = vcombine.low %v141_v14, %v145_v15  ;;  %v102_v26 = vcombine.low %v79_v6, %v83_v16  ;;  %v3568_v27 = vld [vmem:[%s5314_s4 + $0x144] ss:$16 sps:$4 sm:$0xff]   ;;  %v109_v30 = vrot.slane %v101_v20, %v4234_v59  ;;  %v161_v41 = vrot.slane %v128_v3, %v82_v60  ;;  %v3579_v62 = vld [vmem:[%s5314_s4 + $0x320] ss:$16 sps:$4 sm:$0xff]  }
  0x20   :  { %1868 = vmatpush1.bf16.msra.mxu1 %v3537_v31  ;;  %1828 = vmatprep.subr.bf16.mxu0 %v3538_v32  ;;  %v3570_v28 = vld [vmem:[%s5314_s4 + $0x344] ss:$16 sps:$4 sm:$0xff]   ;;  %v100_v29 = vcombine.low %v92_v18, %v99_v19  ;;  %v153_v31 = vrot.slane %v128_v3, %v74_v55  ;;  %v50_v32 = vld [vmem:[%s5317_s0 + $0x8] sm:$0xff]  ;;  %v3586_v19 = vld [vmem:[%s5314_s4 + $0x4e0] ss:$16 sps:$4 sm:$0xff]  }
  0x21   :  { %1869 = vmatprep.subr.bf16.mxu1 %v3540_v33  ;;  %v170_v33 = vrot.slane %v162_v24, %v4234_v59  ;;  %v177_v34 = vrot.slane %v163_v25, %v4234_v59  ;;  %v3580_v0 = vld [vmem:[%s5314_s4 + $0x104] ss:$16 sps:$4 sm:$0xff]  }
  0x22   :  { %v124_v40 = vmul.f32 %v122_v23, %v100_v29  ;;  %v3582_v1 = vld [vmem:[%s5314_s4 + $0x304] ss:$16 sps:$4 sm:$0xff]  }
  0x23   :  { %1829 = vmatpush2.bf16.msra.mxu0 %v3542_v35  ;;  %v116_v35 = vrot.slane %v102_v26, %v4234_v59  ;;  %v3588_v11 = vld [vmem:[%s5314_s4 + $0x4e4] ss:$16 sps:$4 sm:$0xff]  }
  0x24   :  { %1870 = vmatpush2.bf16.msra.mxu1 %v3543_v36  ;;  %1830 = vmatprep.subr.bf16.mxu0 %v3544_v37  ;;  %v157_v36 = vrot.slane %v128_v3, %v78_v56  ;;  %v120_v37 = vmul.f32 %v100_v29, %v49_v22  ;;  %v3591_v13 = vld [vmem:[%s5314_s4 + $0x6e4] ss:$16 sps:$4 sm:$0xff]   ;;  %v3589_v22 = vld [vmem:[%s5314_s4 + $0x6e0] ss:$16 sps:$4 sm:$0xff]  }
  0x25   :  { %1871 = vmatprep.subr.bf16.mxu1 %v3546_v38  ;;  %v123_v38 = vld [vmem:[%s5318_s1 + $0x8] sm:$0xff]  ;;  %v117_v49 = vcombine.low %v109_v30, %v116_v35  ;;  %v3594_v23 = vld [vmem:[%s5314_s4 + $0x4c4] ss:$16 sps:$4 sm:$0xff]  }
  0x26   :  { %v126_v53 = vmax.f32 %v120_v37, %v124_v40  ;;  %v3597_v25 = vld [vmem:[%s5314_s4 + $0x6c4] ss:$16 sps:$4 sm:$0xff]   ;;  %v3604_v37 = vld [vmem:[%s5314_s4 + $0x480] ss:$16 sps:$4 sm:$0xff]  }
  0x27   :  { %1831 = vmatpush2.bf16.msra.mxu0 %v3548_v42  ;;  %v179_v42 = vcombine.low %v149_v21, %v153_v31  ;;  %v121_v56 = vmul.f32 %v117_v49, %v50_v32  ;;  %v3600_v30 = vld [vmem:[%s5314_s4 + $0x4a4] ss:$16 sps:$4 sm:$0xff]  }
  0x28   :  { %1872 = vmatpush2.bf16.msra.mxu1 %v3549_v43  ;;  %1832 = vmatprep.subr.bf16.mxu0 %v3550_v44  ;;  %v3572_v43 = vld [vmem:[%s5314_s4 + $0x140] ss:$16 sps:$4 sm:$0xff]   ;;  %v3603_v31 = vld [vmem:[%s5314_s4 + $0x6a4] ss:$16 sps:$4 sm:$0xff]  }
  0x29   :  { %1873 = vmatprep.subr.bf16.mxu1 %v3552_v45  ;;  %v3573_v44 = vld [vmem:[%s5314_s4 + $0x340] ss:$16 sps:$4 sm:$0xff]   ;;  %v178_v45 = vcombine.low %v170_v33, %v177_v34  ;;  %v187_v55 = vrot.slane %v179_v42, %v4234_v59  ;;  %v3606_v35 = vld [vmem:[%s5314_s4 + $0x484] ss:$16 sps:$4 sm:$0xff]  }
  0x2a   :  { %v3598_v33 = vld [vmem:[%s5314_s4 + $0x4a0] ss:$16 sps:$4 sm:$0xff]   ;;  %v3612_v40 = vld [vmem:[%s5314_s4 + $0x464] ss:$16 sps:$4 sm:$0xff]  }
  0x2b   :  { %1833 = vmatpush2.bf16.msra.mxu0 %v3554_v50  ;;  %v3574_v50 = vld [vmem:[%s5314_s4 + $0x124] ss:$16 sps:$4 sm:$0xff]   ;;  %v198_v58 = vadd.f32 %v178_v45, %v126_v53  ;;  %v3601_v34 = vld [vmem:[%s5314_s4 + $0x6a0] ss:$16 sps:$4 sm:$0xff]  }
  0x2c   :  { %1874 = vmatpush2.bf16.msra.mxu1 %v3555_v51  ;;  %1834 = vmatprep.subr.bf16.mxu0 %v3556_v54  ;;  %v3576_v51 = vld [vmem:[%s5314_s4 + $0x324] ss:$16 sps:$4 sm:$0xff]   ;;  %v180_v54 = vcombine.low %v157_v36, %v161_v41  ;;  %v3610_v42 = vld [vmem:[%s5314_s4 + $0x460] ss:$16 sps:$4 sm:$0xff]  }
  0x2d   :  { %1875 = vmatprep.subr.bf16.mxu1 %v3558_v57  ;;  %v125_v57 = vmul.f32 %v123_v38, %v117_v49  ;;  %v3609_v36 = vld [vmem:[%s5314_s4 + $0x684] ss:$16 sps:$4 sm:$0xff]   ;;  %v3607_v38 = vld [vmem:[%s5314_s4 + $0x680] ss:$16 sps:$4 sm:$0xff]  }
  0x2e   :  { %v194_v60 = vrot.slane %v180_v54, %v4234_v59  ;;  %v3615_v41 = vld [vmem:[%s5314_s4 + $0x664] ss:$16 sps:$4 sm:$0xff]   ;;  %v3616_v49 = vld [vmem:[%s5314_s4 + $0x440] ss:$16 sps:$4 sm:$0xff]  }
  0x2f   :  { %1835 = vmatpush2.bf16.msra.mxu0 %v3560_v61  ;;  %v3578_v61 = vld [vmem:[%s5314_s4 + $0x120] ss:$16 sps:$4 sm:$0xff]   ;;  %v127_v63 = vmax.f32 %v121_v56, %v125_v57  ;;  %v3621_v45 = vld [vmem:[%s5314_s4 + $0x644] ss:$16 sps:$4 sm:$0xff]  }
  0x30   :  { %1876 = vmatpush2.bf16.msra.mxu1 %v3561_v2  ;;  %1836 = vmatprep.subr.bf16.mxu0 %v3562_v7  ;;  %v200_v2 = vmax.f32 %v198_v58, 0.0  ;;  %v195_v3 = vcombine.low %v187_v55, %v194_v60  ;;  %v3584_v7 = vld [vmem:[%s5314_s4 + $0x100] ss:$16 sps:$4 sm:$0xff]   ;;  %v3627_v53 = vld [vmem:[%s5314_s4 + $0x624] ss:$16 sps:$4 sm:$0xff]  }
  0x31   :  { %1877 = vmatprep.subr.bf16.mxu1 %v3564_v8  ;;  %v3585_v8 = vld [vmem:[%s5314_s4 + $0x300] ss:$16 sps:$4 sm:$0xff]   ;;  %v3630_v56 = vld [vmem:[%s5314_s4 + $0x404] ss:$16 sps:$4 sm:$0xff]  }
  0x32   :  { %v211_v4 = vrot.slane %v200_v2, %v4234_v59  ;;  %v204_v5 = vcombine.high %v200_v2, %v200_v2  ;;  %v199_v6 = vadd.f32 %v195_v3, %v127_v63  ;;  %v3622_v54 = vld [vmem:[%s5314_s4 + $0x420] ss:$16 sps:$4 sm:$0xff]   ;;  %v3633_v57 = vld [vmem:[%s5314_s4 + $0x604] ss:$16 sps:$4 sm:$0xff]  }
  0x33   :  { %1837 = vmatpush2.bf16.msra.mxu0 %v3566_v12  ;;  %v3625_v55 = vld [vmem:[%s5314_s4 + $0x620] ss:$16 sps:$4 sm:$0xff]   ;;  %v3645_v2 = vld [vmem:[%s5314_s4 + $0x7c4] ss:$16 sps:$4 sm:$0xff]  }
  0x34   :  { %1878 = vmatpush2.bf16.msra.mxu1 %v3567_v17  ;;  %1838 = vmatprep.subr.bf16.mxu0 %v3568_v27  ;;  %v219_v9 = vcombine.high %v211_v4, %v211_v4  ;;  %v218_v10 = vrot.slane %v204_v5, %v4234_v59  ;;  %v201_v12 = vmax.f32 %v199_v6, 0.0  ;;  %v4332_v16 = vpack.c.bf16 %v211_v4, %v211_v4  ;;  %v3628_v58 = vld [vmem:[%s5314_s4 + $0x400] ss:$16 sps:$4 sm:$0xff]   ;;  %v3648_v5 = vld [vmem:[%s5314_s4 + $0x5a4] ss:$16 sps:$4 sm:$0xff]  }
  0x35   :  { %1879 = vmatprep.subr.bf16.mxu1 %v3570_v28  ;;  %v3592_v28 = vld [vmem:[%s5314_s4 + $0x4c0] ss:$16 sps:$4 sm:$0xff]   ;;  %v3651_v6 = vld [vmem:[%s5314_s4 + $0x7a4] ss:$16 sps:$4 sm:$0xff]  }
  0x36   :  { %v4330_v14 = vpack.c.bf16 %v219_v9, %v219_v9  ;;  %v220_v15 = vcombine.high %v218_v10, %v218_v10  ;;  %v4335_v17 = vrot.slane %v201_v12, %v4234_v59  ;;  %v4337_v18 = vpack.c.bf16 %v218_v10, %v218_v10  ;;  %v3631_v60 = vld [vmem:[%s5314_s4 + $0x600] ss:$16 sps:$4 sm:$0xff]   ;;  %v3654_v9 = vld [vmem:[%s5314_s4 + $0x584] ss:$16 sps:$4 sm:$0xff]  }
  0x37   :  { %1839 = vmatpush2.bf16.msra.mxu0 %v3572_v43  ;;  %v221_v20 = vcombine.high %v201_v12, %v201_v12  ;;  %v3613_v43 = vld [vmem:[%s5314_s4 + $0x660] ss:$16 sps:$4 sm:$0xff]   ;;  %v3657_v10 = vld [vmem:[%s5314_s4 + $0x784] ss:$16 sps:$4 sm:$0xff]  }
  0x38   :  { %1880 = vmatpush2.bf16.msra.mxu1 %v3573_v44  ;;  %1840 = vmatprep.subr.bf16.mxu0 %v3574_v50  ;;  %v4343_v21 = vpack.c.bf16 %v220_v15, %v220_v15  ;;  %v236_v24 = vcombine.high %v4335_v17, %v4335_v17  ;;  %v3618_v44 = vld [vmem:[%s5314_s4 + $0x444] ss:$16 sps:$4 sm:$0xff]   ;;  %v3619_v50 = vld [vmem:[%s5314_s4 + $0x640] ss:$16 sps:$4 sm:$0xff]  }
  0x39   :  { %1881 = vmatprep.subr.bf16.mxu1 %v3576_v51  ;;  %1844 = vmatprep.mubr.bf16.mxu0 %v4330_v14  ;;  %v4357_v26 = vrot.slane %v221_v20, %v4234_v59  ;;  %v3595_v59 = vld [vmem:[%s5314_s4 + $0x6c0] ss:$16 sps:$4 sm:$0xff]   ;;  %v3624_v51 = vld [vmem:[%s5314_s4 + $0x424] ss:$16 sps:$4 sm:$0xff]  }
  0x3a   :  { %1885 = vmatprep.mubr.bf16.mxu1 %v4343_v21  ;;  %v4361_v27 = vpack.c.bf16 %v236_v24, %v236_v24  ;;  %v3634_v63 = vld [vmem:[%s5314_s4 + $0x5e0] ss:$16 sps:$4 sm:$0xff]   ;;  %v3663_v15 = vld [vmem:[%s5314_s4 + $0x764] ss:$16 sps:$4 sm:$0xff]  }
  0x3b   :  { %1841 = vmatpush2.bf16.msra.mxu0 %v3578_v61  ;;  %v237_v29 = vcombine.high %v4357_v26, %v4357_v26  ;;  %v3636_v61 = vld [vmem:[%s5314_s4 + $0x5e4] ss:$16 sps:$4 sm:$0xff]   ;;  %v3640_v3 = vld [vmem:[%s5314_s4 + $0x5c0] ss:$16 sps:$4 sm:$0xff]  }
  0x3c   :  { %1882 = vmatpush2.bf16.msra.mxu1 %v3579_v62  ;;  %1842 = vmatprep.subr.bf16.mxu0 %v3580_v0  ;;  %v3639_v62 = vld [vmem:[%s5314_s4 + $0x7e4] ss:$16 sps:$4 sm:$0xff]   ;;  %v3637_v0 = vld [vmem:[%s5314_s4 + $0x7e0] ss:$16 sps:$4 sm:$0xff]  }
  0x3d   :  { %1883 = vmatprep.subr.bf16.mxu1 %v3582_v1  ;;  %v4379_v32 = vpack.c.bf16 %v237_v29, %v237_v29  ;;  %v3642_v1 = vld [vmem:[%s5314_s4 + $0x5c4] ss:$16 sps:$4 sm:$0xff]   ;;  %v3643_v4 = vld [vmem:[%s5314_s4 + $0x7c0] ss:$16 sps:$4 sm:$0xff]  }
  0x3e   :  { %v3655_v12 = vld [vmem:[%s5314_s4 + $0x780] ss:$16 sps:$4 sm:$0xff]   ;;  %v3675_v29 = vld [vmem:[%s5314_s4 + $0x724] ss:$16 sps:$4 sm:$0xff]  }
  0x3f   :  { %1843 = vmatpush2.bf16.msra.mxu0 %v3584_v7  ;;  %v3646_v7 = vld [vmem:[%s5314_s4 + $0x5a0] ss:$16 sps:$4 sm:$0xff]  }
  0x40   :  { %1884 = vmatpush2.bf16.msra.mxu1 %v3585_v8  ;;  %1894 = vmatprep.subr.bf16.mxu0 %v3588_v11  ;;  %v3649_v8 = vld [vmem:[%s5314_s4 + $0x7a0] ss:$16 sps:$4 sm:$0xff]  }
  0x41   :  { %1935 = vmatprep.subr.bf16.mxu1 %v3591_v13  ;;  %v3652_v11 = vld [vmem:[%s5314_s4 + $0x580] ss:$16 sps:$4 sm:$0xff]   ;;  %v3660_v13 = vld [vmem:[%s5314_s4 + $0x564] ss:$16 sps:$4 sm:$0xff]  }
  0x42   :  { %1845 = vmatmul.mubr.bf16.vlgmr.msra.gmra.mxu0 %v4332_v16  ;;  %v3661_v20 = vld [vmem:[%s5314_s4 + $0x760] ss:$16 sps:$4 sm:$0xff]  }
  0x43   :  { %1886 = vmatmul.mubr.bf16.vlgmr.msra.gmra.mxu1 %v4337_v18  ;;  %1895 = vmatpush1.bf16.msra.mxu0 %v3586_v19  ;;  %v3658_v19 = vld [vmem:[%s5314_s4 + $0x560] ss:$16 sps:$4 sm:$0xff]  }
  0x44   :  { %1936 = vmatpush1.bf16.msra.mxu1 %v3589_v22  ;;  %1896 = vmatprep.subr.bf16.mxu0 %v3594_v23  ;;  %v3666_v22 = vld [vmem:[%s5314_s4 + $0x544] ss:$16 sps:$4 sm:$0xff]   ;;  %v3664_v24 = vld [vmem:[%s5314_s4 + $0x540] ss:$16 sps:$4 sm:$0xff]  }
  0x45   :  { %1937 = vmatprep.subr.bf16.mxu1 %v3597_v25  ;;  %1926 = vmatprep.mubr.bf16.mxu0 %v4361_v27  ;;  %v3669_v23 = vld [vmem:[%s5314_s4 + $0x744] ss:$16 sps:$4 sm:$0xff]   ;;  %v3667_v25 = vld [vmem:[%s5314_s4 + $0x740] ss:$16 sps:$4 sm:$0xff]  }
  0x46   :  { %1967 = vmatprep.mubr.bf16.mxu1 %v4379_v32 }
  0x47   :  { %1897 = vmatpush1.bf16.msra.mxu0 %v3592_v28  ;;  %v3672_v28 = vld [vmem:[%s5314_s4 + $0x524] ss:$16 sps:$4 sm:$0xff]  }
  0x48   :  { %1938 = vmatpush1.bf16.msra.mxu1 %v3595_v59  ;;  %1898 = vmatprep.subr.bf16.mxu0 %v3600_v30  ;;  %v3670_v59 = vld [vmem:[%s5314_s4 + $0x520] ss:$16 sps:$4 sm:$0xff]  }
  0x49   :  { %1939 = vmatprep.subr.bf16.mxu1 %v3603_v31  ;;  %v3673_v30 = vld [vmem:[%s5314_s4 + $0x720] ss:$16 sps:$4 sm:$0xff]   ;;  %v3678_v31 = vld [vmem:[%s5314_s4 + $0x504] ss:$16 sps:$4 sm:$0xff]  }
  0x4b   :  { %1899 = vmatpush1.bf16.msra.mxu0 %v3598_v33  ;;  %v3681_v33 = vld [vmem:[%s5314_s4 + $0x704] ss:$16 sps:$4 sm:$0xff]  }
  0x4c   :  { %1940 = vmatpush1.bf16.msra.mxu1 %v3601_v34  ;;  %1900 = vmatprep.subr.bf16.mxu0 %v3606_v35  ;;  %v3676_v34 = vld [vmem:[%s5314_s4 + $0x500] ss:$16 sps:$4 sm:$0xff]  }
  0x4d   :  { %1941 = vmatprep.subr.bf16.mxu1 %v3609_v36  ;;  %v3679_v35 = vld [vmem:[%s5314_s4 + $0x700] ss:$16 sps:$4 sm:$0xff]   ;;  %v3684_v36 = vld [vmem:[%s5314_s4 + $0xec] ss:$16 sps:$4 sm:$0xff]  }
  0x4f   :  { %1901 = vmatpush1.bf16.msra.mxu0 %v3604_v37  ;;  %v3687_v37 = vld [vmem:[%s5314_s4 + $0x2ec] ss:$16 sps:$4 sm:$0xff]  }
  0x50   :  { %1942 = vmatpush1.bf16.msra.mxu1 %v3607_v38  ;;  %1902 = vmatprep.subr.bf16.mxu0 %v3612_v40  ;;  %v4552_v38 = vpack.c.bf16 %v4335_v17, %v4335_v17  ;;  %v4556_v40 = vpack.c.bf16 %v4357_v26, %v4357_v26  ;;  %v3690_v17 = vld [vmem:[%s5314_s4 + $0xcc] ss:$16 sps:$4 sm:$0xff]  }
  0x51   :  { %1943 = vmatprep.subr.bf16.mxu1 %v3615_v41  ;;  %v3682_v41 = vld [vmem:[%s5314_s4 + $0xe8] ss:$16 sps:$4 sm:$0xff]   ;;  %v3693_v26 = vld [vmem:[%s5314_s4 + $0x2cc] ss:$16 sps:$4 sm:$0xff]  }
  0x53   :  { %1903 = vmatpush1.bf16.msra.mxu0 %v3610_v42  ;;  %v3685_v42 = vld [vmem:[%s5314_s4 + $0x2e8] ss:$16 sps:$4 sm:$0xff]  }
  0x54   :  { %1944 = vmatpush1.bf16.msra.mxu1 %v3613_v43  ;;  %1904 = vmatprep.subr.bf16.mxu0 %v3618_v44  ;;  %v3688_v43 = vld [vmem:[%s5314_s4 + $0xc8] ss:$16 sps:$4 sm:$0xff]  }
  0x55   :  { %1945 = vmatprep.subr.bf16.mxu1 %v3621_v45  ;;  %v3691_v44 = vld [vmem:[%s5314_s4 + $0x2c8] ss:$16 sps:$4 sm:$0xff]   ;;  %v3696_v45 = vld [vmem:[%s5314_s4 + $0xac] ss:$16 sps:$4 sm:$0xff]  }
  0x57   :  { %1905 = vmatpush1.bf16.msra.mxu0 %v3616_v49  ;;  %v3699_v49 = vld [vmem:[%s5314_s4 + $0x2ac] ss:$16 sps:$4 sm:$0xff]  }
  0x58   :  { %1946 = vmatpush1.bf16.msra.mxu1 %v3619_v50  ;;  %1906 = vmatprep.subr.bf16.mxu0 %v3624_v51  ;;  %v3694_v50 = vld [vmem:[%s5314_s4 + $0xa8] ss:$16 sps:$4 sm:$0xff]  }
  0x59   :  { %1947 = vmatprep.subr.bf16.mxu1 %v3627_v53  ;;  %v3697_v51 = vld [vmem:[%s5314_s4 + $0x2a8] ss:$16 sps:$4 sm:$0xff]   ;;  %v3702_v53 = vld [vmem:[%s5314_s4 + $0x8c] ss:$16 sps:$4 sm:$0xff]  }
  0x5b   :  { %1907 = vmatpush1.bf16.msra.mxu0 %v3622_v54  ;;  %v3703_v54 = vld [vmem:[%s5314_s4 + $0x288] ss:$16 sps:$4 sm:$0xff]  }
  0x5c   :  { %1948 = vmatpush1.bf16.msra.mxu1 %v3625_v55  ;;  %1908 = vmatprep.subr.bf16.mxu0 %v3630_v56  ;;  %v3708_v55 = vld [vmem:[%s5314_s4 + $0x6c] ss:$16 sps:$4 sm:$0xff]  }
  0x5d   :  { %1949 = vmatprep.subr.bf16.mxu1 %v3633_v57  ;;  %v3711_v56 = vld [vmem:[%s5314_s4 + $0x26c] ss:$16 sps:$4 sm:$0xff]   ;;  %v3706_v57 = vld [vmem:[%s5314_s4 + $0x68] ss:$16 sps:$4 sm:$0xff]  }
  0x5f   :  { %1909 = vmatpush1.bf16.msra.mxu0 %v3628_v58  ;;  %v3709_v58 = vld [vmem:[%s5314_s4 + $0x268] ss:$16 sps:$4 sm:$0xff]  }
  0x60   :  { %1950 = vmatpush1.bf16.msra.mxu1 %v3631_v60  ;;  %1910 = vmatprep.subr.bf16.mxu0 %v3636_v61  ;;  %v3714_v60 = vld [vmem:[%s5314_s4 + $0x4c] ss:$16 sps:$4 sm:$0xff]  }
  0x61   :  { %1951 = vmatprep.subr.bf16.mxu1 %v3639_v62  ;;  %v3717_v61 = vld [vmem:[%s5314_s4 + $0x24c] ss:$16 sps:$4 sm:$0xff]   ;;  %v3712_v62 = vld [vmem:[%s5314_s4 + $0x48] ss:$16 sps:$4 sm:$0xff]  }
  0x63   :  { %1911 = vmatpush2.bf16.msra.mxu0 %v3634_v63  ;;  %v3715_v63 = vld [vmem:[%s5314_s4 + $0x248] ss:$16 sps:$4 sm:$0xff]  }
  0x64   :  { %1952 = vmatpush2.bf16.msra.mxu1 %v3637_v0  ;;  %1912 = vmatprep.subr.bf16.mxu0 %v3642_v1  ;;  %v3720_v0 = vld [vmem:[%s5314_s4 + $0x2c] ss:$16 sps:$4 sm:$0xff]  }
  0x65   :  { %1953 = vmatprep.subr.bf16.mxu1 %v3645_v2  ;;  %v3723_v1 = vld [vmem:[%s5314_s4 + $0x22c] ss:$16 sps:$4 sm:$0xff]   ;;  %v3718_v2 = vld [vmem:[%s5314_s4 + $0x28] ss:$16 sps:$4 sm:$0xff]  }
  0x67   :  { %1913 = vmatpush2.bf16.msra.mxu0 %v3640_v3  ;;  %v3721_v3 = vld [vmem:[%s5314_s4 + $0x228] ss:$16 sps:$4 sm:$0xff]  }
  0x68   :  { %1954 = vmatpush2.bf16.msra.mxu1 %v3643_v4  ;;  %1914 = vmatprep.subr.bf16.mxu0 %v3648_v5  ;;  %v3726_v4 = vld [vmem:[%s5314_s4 + $0xc] ss:$16 sps:$4 sm:$0xff]  }
  0x69   :  { %1955 = vmatprep.subr.bf16.mxu1 %v3651_v6  ;;  %v3729_v5 = vld [vmem:[%s5314_s4 + $0x20c] ss:$16 sps:$4 sm:$0xff]   ;;  %v3724_v6 = vld [vmem:[%s5314_s4 + $0x8] ss:$16 sps:$4 sm:$0xff]  }
  0x6b   :  { %1915 = vmatpush2.bf16.msra.mxu0 %v3646_v7  ;;  %v3727_v7 = vld [vmem:[%s5314_s4 + $0x208] ss:$16 sps:$4 sm:$0xff]  }
  0x6c   :  { %1956 = vmatpush2.bf16.msra.mxu1 %v3649_v8  ;;  %1916 = vmatprep.subr.bf16.mxu0 %v3654_v9  ;;  %v3732_v8 = vld [vmem:[%s5314_s4 + $0x1ec] ss:$16 sps:$4 sm:$0xff]  }
  0x6d   :  { %1957 = vmatprep.subr.bf16.mxu1 %v3657_v10  ;;  %v3735_v9 = vld [vmem:[%s5314_s4 + $0x3ec] ss:$16 sps:$4 sm:$0xff]   ;;  %v3730_v10 = vld [vmem:[%s5314_s4 + $0x1e8] ss:$16 sps:$4 sm:$0xff]  }
  0x6f   :  { %1917 = vmatpush2.bf16.msra.mxu0 %v3652_v11  ;;  %v3733_v11 = vld [vmem:[%s5314_s4 + $0x3e8] ss:$16 sps:$4 sm:$0xff]  }
  0x70   :  { %1958 = vmatpush2.bf16.msra.mxu1 %v3655_v12  ;;  %1918 = vmatprep.subr.bf16.mxu0 %v3660_v13  ;;  %v3738_v12 = vld [vmem:[%s5314_s4 + $0x1cc] ss:$16 sps:$4 sm:$0xff]  }
  0x71   :  { %1959 = vmatprep.subr.bf16.mxu1 %v3663_v15  ;;  %v3741_v13 = vld [vmem:[%s5314_s4 + $0x3cc] ss:$16 sps:$4 sm:$0xff]   ;;  %v3736_v15 = vld [vmem:[%s5314_s4 + $0x1c8] ss:$16 sps:$4 sm:$0xff]  }
  0x73   :  { %1919 = vmatpush2.bf16.msra.mxu0 %v3658_v19  ;;  %v3739_v19 = vld [vmem:[%s5314_s4 + $0x3c8] ss:$16 sps:$4 sm:$0xff]  }
  0x74   :  { %1960 = vmatpush2.bf16.msra.mxu1 %v3661_v20  ;;  %1920 = vmatprep.subr.bf16.mxu0 %v3666_v22  ;;  %v3744_v20 = vld [vmem:[%s5314_s4 + $0x1ac] ss:$16 sps:$4 sm:$0xff]  }
  0x75   :  { %1961 = vmatprep.subr.bf16.mxu1 %v3669_v23  ;;  %v3747_v22 = vld [vmem:[%s5314_s4 + $0x3ac] ss:$16 sps:$4 sm:$0xff]   ;;  %v3742_v23 = vld [vmem:[%s5314_s4 + $0x1a8] ss:$16 sps:$4 sm:$0xff]  }
  0x77   :  { %1921 = vmatpush2.bf16.msra.mxu0 %v3664_v24  ;;  %v3745_v24 = vld [vmem:[%s5314_s4 + $0x3a8] ss:$16 sps:$4 sm:$0xff]  }
  0x78   :  { %1962 = vmatpush2.bf16.msra.mxu1 %v3667_v25  ;;  %1922 = vmatprep.subr.bf16.mxu0 %v3672_v28  ;;  %v3750_v25 = vld [vmem:[%s5314_s4 + $0x18c] ss:$16 sps:$4 sm:$0xff]  }
  0x79   :  { %1963 = vmatprep.subr.bf16.mxu1 %v3675_v29  ;;  %v3753_v28 = vld [vmem:[%s5314_s4 + $0x38c] ss:$16 sps:$4 sm:$0xff]   ;;  %v3748_v29 = vld [vmem:[%s5314_s4 + $0x188] ss:$16 sps:$4 sm:$0xff]  }
  0x7b   :  { %1923 = vmatpush2.bf16.msra.mxu0 %v3670_v59  ;;  %v3751_v59 = vld [vmem:[%s5314_s4 + $0x388] ss:$16 sps:$4 sm:$0xff]  }
  0x7c   :  { %1964 = vmatpush2.bf16.msra.mxu1 %v3673_v30  ;;  %1924 = vmatprep.subr.bf16.mxu0 %v3678_v31  ;;  %v3756_v30 = vld [vmem:[%s5314_s4 + $0x16c] ss:$16 sps:$4 sm:$0xff]  }
  0x7d   :  { %1965 = vmatprep.subr.bf16.mxu1 %v3681_v33  ;;  %v3759_v31 = vld [vmem:[%s5314_s4 + $0x36c] ss:$16 sps:$4 sm:$0xff]   ;;  %v3754_v33 = vld [vmem:[%s5314_s4 + $0x168] ss:$16 sps:$4 sm:$0xff]  }
  0x7f   :  { %1925 = vmatpush2.bf16.msra.mxu0 %v3676_v34  ;;  %v3757_v34 = vld [vmem:[%s5314_s4 + $0x368] ss:$16 sps:$4 sm:$0xff]  }
  0x80   :  { %1966 = vmatpush2.bf16.msra.mxu1 %v3679_v35  ;;  %1976 = vmatprep.subr.bf16.mxu0 %v3684_v36  ;;  %v3762_v35 = vld [vmem:[%s5314_s4 + $0x14c] ss:$16 sps:$4 sm:$0xff]  }
  0x81   :  { %2017 = vmatprep.subr.bf16.mxu1 %v3687_v37  ;;  %v3765_v36 = vld [vmem:[%s5314_s4 + $0x34c] ss:$16 sps:$4 sm:$0xff]   ;;  %v3760_v37 = vld [vmem:[%s5314_s4 + $0x148] ss:$16 sps:$4 sm:$0xff]  }
  0x82   :  { %1927 = vmatmul.mubr.bf16.vlgmr.msra.gmra.mxu0 %v4552_v38 }
  0x83   :  { %1968 = vmatmul.mubr.bf16.vlgmr.msra.gmra.mxu1 %v4556_v40  ;;  %1977 = vmatpush1.bf16.msra.mxu0 %v3682_v41  ;;  %v3763_v41 = vld [vmem:[%s5314_s4 + $0x348] ss:$16 sps:$4 sm:$0xff]  }
  0x84   :  { %2018 = vmatpush1.bf16.msra.mxu1 %v3685_v42  ;;  %1978 = vmatprep.subr.bf16.mxu0 %v3690_v17  ;;  %v3768_v42 = vld [vmem:[%s5314_s4 + $0x12c] ss:$16 sps:$4 sm:$0xff]  }
  0x85   :  { %2019 = vmatprep.subr.bf16.mxu1 %v3693_v26  ;;  %2008 = vmatprep.mubr.bf16.mxu0 %v4330_v14  ;;  %v3705_v14 = vld [vmem:[%s5314_s4 + $0x28c] ss:$16 sps:$4 sm:$0xff]   ;;  %v3766_v26 = vld [vmem:[%s5314_s4 + $0x128] ss:$16 sps:$4 sm:$0xff]  }
  0x86   :  { %2049 = vmatprep.mubr.bf16.mxu1 %v4343_v21  ;;  %v3700_v21 = vld [vmem:[%s5314_s4 + $0x88] ss:$16 sps:$4 sm:$0xff]   ;;  %v3771_v17 = vld [vmem:[%s5314_s4 + $0x32c] ss:$16 sps:$4 sm:$0xff]  }
  0x87   :  { %1979 = vmatpush1.bf16.msra.mxu0 %v3688_v43  ;;  %v3769_v43 = vld [vmem:[%s5314_s4 + $0x328] ss:$16 sps:$4 sm:$0xff]  }
  0x88   :  { %2020 = vmatpush1.bf16.msra.mxu1 %v3691_v44  ;;  %1980 = vmatprep.subr.bf16.mxu0 %v3696_v45  ;;  %v3774_v44 = vld [vmem:[%s5314_s4 + $0x10c] ss:$16 sps:$4 sm:$0xff]  }
  0x89   :  { %2021 = vmatprep.subr.bf16.mxu1 %v3699_v49  ;;  %v3777_v45 = vld [vmem:[%s5314_s4 + $0x30c] ss:$16 sps:$4 sm:$0xff]   ;;  %v3772_v49 = vld [vmem:[%s5314_s4 + $0x108] ss:$16 sps:$4 sm:$0xff]  }
  0x8b   :  { %1981 = vmatpush1.bf16.msra.mxu0 %v3694_v50  ;;  %v3775_v50 = vld [vmem:[%s5314_s4 + $0x308] ss:$16 sps:$4 sm:$0xff]  }
  0x8c   :  { %2022 = vmatpush1.bf16.msra.mxu1 %v3697_v51  ;;  %1982 = vmatprep.subr.bf16.mxu0 %v3702_v53  ;;  %v3780_v51 = vld [vmem:[%s5314_s4 + $0x4ec] ss:$16 sps:$4 sm:$0xff]  }
  0x8d   :  { %2023 = vmatprep.subr.bf16.mxu1 %v3705_v14  ;;  %v3783_v53 = vld [vmem:[%s5314_s4 + $0x6ec] ss:$16 sps:$4 sm:$0xff]   ;;  %v3778_v14 = vld [vmem:[%s5314_s4 + $0x4e8] ss:$16 sps:$4 sm:$0xff]  }
  0x8f   :  { %1983 = vmatpush1.bf16.msra.mxu0 %v3700_v21  ;;  %v3781_v21 = vld [vmem:[%s5314_s4 + $0x6e8] ss:$16 sps:$4 sm:$0xff]  }
  0x90   :  { %2024 = vmatpush1.bf16.msra.mxu1 %v3703_v54  ;;  %1984 = vmatprep.subr.bf16.mxu0 %v3708_v55  ;;  %v3786_v54 = vld [vmem:[%s5314_s4 + $0x4cc] ss:$16 sps:$4 sm:$0xff]  }
  0x91   :  { %2025 = vmatprep.subr.bf16.mxu1 %v3711_v56  ;;  %v3789_v55 = vld [vmem:[%s5314_s4 + $0x6cc] ss:$16 sps:$4 sm:$0xff]   ;;  %v3784_v56 = vld [vmem:[%s5314_s4 + $0x4c8] ss:$16 sps:$4 sm:$0xff]  }
  0x93   :  { %1985 = vmatpush1.bf16.msra.mxu0 %v3706_v57  ;;  %v3787_v57 = vld [vmem:[%s5314_s4 + $0x6c8] ss:$16 sps:$4 sm:$0xff]  }
  0x94   :  { %2026 = vmatpush1.bf16.msra.mxu1 %v3709_v58  ;;  %1986 = vmatprep.subr.bf16.mxu0 %v3714_v60  ;;  %v3792_v58 = vld [vmem:[%s5314_s4 + $0x4ac] ss:$16 sps:$4 sm:$0xff]   ;;  %v3793_v60 = vld [vmem:[%s5314_s4 + $0x6a8] ss:$16 sps:$4 sm:$0xff]  }
  0x95   :  { %2027 = vmatprep.subr.bf16.mxu1 %v3717_v61  ;;  %v3798_v61 = vld [vmem:[%s5314_s4 + $0x48c] ss:$16 sps:$4 sm:$0xff]  }
  0x97   :  { %1987 = vmatpush1.bf16.msra.mxu0 %v3712_v62  ;;  %v3799_v62 = vld [vmem:[%s5314_s4 + $0x688] ss:$16 sps:$4 sm:$0xff]  }
  0x98   :  { %2028 = vmatpush1.bf16.msra.mxu1 %v3715_v63  ;;  %1988 = vmatprep.subr.bf16.mxu0 %v3720_v0  ;;  %v3804_v63 = vld [vmem:[%s5314_s4 + $0x46c] ss:$16 sps:$4 sm:$0xff]  }
  0x99   :  { %2029 = vmatprep.subr.bf16.mxu1 %v3723_v1  ;;  %v3807_v0 = vld [vmem:[%s5314_s4 + $0x66c] ss:$16 sps:$4 sm:$0xff]   ;;  %v3802_v1 = vld [vmem:[%s5314_s4 + $0x468] ss:$16 sps:$4 sm:$0xff]  }
  0x9b   :  { %1989 = vmatpush1.bf16.msra.mxu0 %v3718_v2  ;;  %v3805_v2 = vld [vmem:[%s5314_s4 + $0x668] ss:$16 sps:$4 sm:$0xff]  }
  0x9c   :  { %2030 = vmatpush1.bf16.msra.mxu1 %v3721_v3  ;;  %1990 = vmatprep.subr.bf16.mxu0 %v3726_v4  ;;  %v3810_v3 = vld [vmem:[%s5314_s4 + $0x44c] ss:$16 sps:$4 sm:$0xff]  }
  0x9d   :  { %2031 = vmatprep.subr.bf16.mxu1 %v3729_v5  ;;  %v3813_v4 = vld [vmem:[%s5314_s4 + $0x64c] ss:$16 sps:$4 sm:$0xff]   ;;  %v3808_v5 = vld [vmem:[%s5314_s4 + $0x448] ss:$16 sps:$4 sm:$0xff]  }
  0x9f   :  { %1991 = vmatpush1.bf16.msra.mxu0 %v3724_v6  ;;  %v3811_v6 = vld [vmem:[%s5314_s4 + $0x648] ss:$16 sps:$4 sm:$0xff]  }
  0xa0   :  { %2032 = vmatpush1.bf16.msra.mxu1 %v3727_v7  ;;  %1992 = vmatprep.subr.bf16.mxu0 %v3732_v8  ;;  %v3816_v7 = vld [vmem:[%s5314_s4 + $0x42c] ss:$16 sps:$4 sm:$0xff]  }
  0xa1   :  { %2033 = vmatprep.subr.bf16.mxu1 %v3735_v9  ;;  %v3819_v8 = vld [vmem:[%s5314_s4 + $0x62c] ss:$16 sps:$4 sm:$0xff]   ;;  %v3814_v9 = vld [vmem:[%s5314_s4 + $0x428] ss:$16 sps:$4 sm:$0xff]  }
  0xa3   :  { %1993 = vmatpush2.bf16.msra.mxu0 %v3730_v10  ;;  %v3817_v10 = vld [vmem:[%s5314_s4 + $0x628] ss:$16 sps:$4 sm:$0xff]  }
  0xa4   :  { %2034 = vmatpush2.bf16.msra.mxu1 %v3733_v11  ;;  %1994 = vmatprep.subr.bf16.mxu0 %v3738_v12  ;;  %v3822_v11 = vld [vmem:[%s5314_s4 + $0x40c] ss:$16 sps:$4 sm:$0xff]  }
  0xa5   :  { %2035 = vmatprep.subr.bf16.mxu1 %v3741_v13  ;;  %v3825_v12 = vld [vmem:[%s5314_s4 + $0x60c] ss:$16 sps:$4 sm:$0xff]   ;;  %v3820_v13 = vld [vmem:[%s5314_s4 + $0x408] ss:$16 sps:$4 sm:$0xff]  }
  0xa7   :  { %1995 = vmatpush2.bf16.msra.mxu0 %v3736_v15  ;;  %v3823_v15 = vld [vmem:[%s5314_s4 + $0x608] ss:$16 sps:$4 sm:$0xff]  }
  0xa8   :  { %2036 = vmatpush2.bf16.msra.mxu1 %v3739_v19  ;;  %1996 = vmatprep.subr.bf16.mxu0 %v3744_v20  ;;  %v3828_v19 = vld [vmem:[%s5314_s4 + $0x5ec] ss:$16 sps:$4 sm:$0xff]  }
  0xa9   :  { %2037 = vmatprep.subr.bf16.mxu1 %v3747_v22  ;;  %v3831_v20 = vld [vmem:[%s5314_s4 + $0x7ec] ss:$16 sps:$4 sm:$0xff]   ;;  %v3826_v22 = vld [vmem:[%s5314_s4 + $0x5e8] ss:$16 sps:$4 sm:$0xff]  }
  0xab   :  { %1997 = vmatpush2.bf16.msra.mxu0 %v3742_v23  ;;  %v3829_v23 = vld [vmem:[%s5314_s4 + $0x7e8] ss:$16 sps:$4 sm:$0xff]  }
  0xac   :  { %2038 = vmatpush2.bf16.msra.mxu1 %v3745_v24  ;;  %1998 = vmatprep.subr.bf16.mxu0 %v3750_v25  ;;  %v3834_v24 = vld [vmem:[%s5314_s4 + $0x5cc] ss:$16 sps:$4 sm:$0xff]  }
  0xad   :  { %2039 = vmatprep.subr.bf16.mxu1 %v3753_v28  ;;  %v3837_v25 = vld [vmem:[%s5314_s4 + $0x7cc] ss:$16 sps:$4 sm:$0xff]   ;;  %v3832_v28 = vld [vmem:[%s5314_s4 + $0x5c8] ss:$16 sps:$4 sm:$0xff]  }
  0xaf   :  { %1999 = vmatpush2.bf16.msra.mxu0 %v3748_v29  ;;  %v3835_v29 = vld [vmem:[%s5314_s4 + $0x7c8] ss:$16 sps:$4 sm:$0xff]  }
  0xb0   :  { %2040 = vmatpush2.bf16.msra.mxu1 %v3751_v59  ;;  %2000 = vmatprep.subr.bf16.mxu0 %v3756_v30  ;;  %v3840_v59 = vld [vmem:[%s5314_s4 + $0x5ac] ss:$16 sps:$4 sm:$0xff]  }
  0xb1   :  { %2041 = vmatprep.subr.bf16.mxu1 %v3759_v31  ;;  %v3843_v30 = vld [vmem:[%s5314_s4 + $0x7ac] ss:$16 sps:$4 sm:$0xff]   ;;  %v3838_v31 = vld [vmem:[%s5314_s4 + $0x5a8] ss:$16 sps:$4 sm:$0xff]  }
  0xb3   :  { %2001 = vmatpush2.bf16.msra.mxu0 %v3754_v33  ;;  %v3841_v33 = vld [vmem:[%s5314_s4 + $0x7a8] ss:$16 sps:$4 sm:$0xff]  }
  0xb4   :  { %2042 = vmatpush2.bf16.msra.mxu1 %v3757_v34  ;;  %2002 = vmatprep.subr.bf16.mxu0 %v3762_v35  ;;  %v3846_v34 = vld [vmem:[%s5314_s4 + $0x58c] ss:$16 sps:$4 sm:$0xff]  }
  0xb5   :  { %2043 = vmatprep.subr.bf16.mxu1 %v3765_v36  ;;  %v3849_v35 = vld [vmem:[%s5314_s4 + $0x78c] ss:$16 sps:$4 sm:$0xff]   ;;  %v3844_v36 = vld [vmem:[%s5314_s4 + $0x588] ss:$16 sps:$4 sm:$0xff]  }
  0xb7   :  { %2003 = vmatpush2.bf16.msra.mxu0 %v3760_v37  ;;  %v3847_v37 = vld [vmem:[%s5314_s4 + $0x788] ss:$16 sps:$4 sm:$0xff]  }
  0xb8   :  { %2044 = vmatpush2.bf16.msra.mxu1 %v3763_v41  ;;  %2004 = vmatprep.subr.bf16.mxu0 %v3768_v42  ;;  %v3852_v41 = vld [vmem:[%s5314_s4 + $0x56c] ss:$16 sps:$4 sm:$0xff]  }
  0xb9   :  { %2045 = vmatprep.subr.bf16.mxu1 %v3771_v17  ;;  %v3855_v42 = vld [vmem:[%s5314_s4 + $0x76c] ss:$16 sps:$4 sm:$0xff]   ;;  %v3850_v17 = vld [vmem:[%s5314_s4 + $0x568] ss:$16 sps:$4 sm:$0xff]  }
  0xbb   :  { %2005 = vmatpush2.bf16.msra.mxu0 %v3766_v26  ;;  %v3853_v26 = vld [vmem:[%s5314_s4 + $0x768] ss:$16 sps:$4 sm:$0xff]  }
  0xbc   :  { %2046 = vmatpush2.bf16.msra.mxu1 %v3769_v43  ;;  %2006 = vmatprep.subr.bf16.mxu0 %v3774_v44  ;;  %v3858_v43 = vld [vmem:[%s5314_s4 + $0x54c] ss:$16 sps:$4 sm:$0xff]  }
  0xbd   :  { %2047 = vmatprep.subr.bf16.mxu1 %v3777_v45  ;;  %v3861_v44 = vld [vmem:[%s5314_s4 + $0x74c] ss:$16 sps:$4 sm:$0xff]   ;;  %v3856_v45 = vld [vmem:[%s5314_s4 + $0x548] ss:$16 sps:$4 sm:$0xff]  }
  0xbf   :  { %2007 = vmatpush2.bf16.msra.mxu0 %v3772_v49  ;;  %v3859_v49 = vld [vmem:[%s5314_s4 + $0x748] ss:$16 sps:$4 sm:$0xff]  }
  0xc0   :  { %2048 = vmatpush2.bf16.msra.mxu1 %v3775_v50  ;;  %2058 = vmatprep.subr.bf16.mxu0 %v3780_v51  ;;  %v3864_v50 = vld [vmem:[%s5314_s4 + $0x52c] ss:$16 sps:$4 sm:$0xff]  }
  0xc1   :  { %2099 = vmatprep.subr.bf16.mxu1 %v3783_v53  ;;  %v3867_v51 = vld [vmem:[%s5314_s4 + $0x72c] ss:$16 sps:$4 sm:$0xff]   ;;  %v3862_v53 = vld [vmem:[%s5314_s4 + $0x528] ss:$16 sps:$4 sm:$0xff]  }
  0xc2   :  { %2009 = vmatmul.mubr.bf16.vlgmr.msra.gmra.mxu0 %v4332_v16  ;;  %v3795_v16 = vld [vmem:[%s5314_s4 + $0x6ac] ss:$16 sps:$4 sm:$0xff]  }
  0xc3   :  { %2050 = vmatmul.mubr.bf16.vlgmr.msra.gmra.mxu1 %v4337_v18  ;;  %2059 = vmatpush1.bf16.msra.mxu0 %v3778_v14  ;;  %v3790_v18 = vld [vmem:[%s5314_s4 + $0x4a8] ss:$16 sps:$4 sm:$0xff]  }
  0xc4   :  { %2100 = vmatpush1.bf16.msra.mxu1 %v3781_v21  ;;  %2060 = vmatprep.subr.bf16.mxu0 %v3786_v54  ;;  %v3865_v14 = vld [vmem:[%s5314_s4 + $0x728] ss:$16 sps:$4 sm:$0xff]   ;;  %v3870_v21 = vld [vmem:[%s5314_s4 + $0x50c] ss:$16 sps:$4 sm:$0xff]  }
  0xc5   :  { %2101 = vmatprep.subr.bf16.mxu1 %v3789_v55  ;;  %2090 = vmatprep.mubr.bf16.mxu0 %v4361_v27  ;;  %v3801_v27 = vld [vmem:[%s5314_s4 + $0x68c] ss:$16 sps:$4 sm:$0xff]   ;;  %v3868_v55 = vld [vmem:[%s5314_s4 + $0x508] ss:$16 sps:$4 sm:$0xff]  }
  0xc6   :  { %2131 = vmatprep.mubr.bf16.mxu1 %v4379_v32  ;;  %v3796_v32 = vld [vmem:[%s5314_s4 + $0x488] ss:$16 sps:$4 sm:$0xff]   ;;  %v3873_v54 = vld [vmem:[%s5314_s4 + $0x70c] ss:$16 sps:$4 sm:$0xff]  }
  0xc7   :  { %2061 = vmatpush1.bf16.msra.mxu0 %v3784_v56  ;;  %v3871_v56 = vld [vmem:[%s5314_s4 + $0x708] ss:$16 sps:$4 sm:$0xff]  }
  0xc8   :  { %2102 = vmatpush1.bf16.msra.mxu1 %v3787_v57  ;;  %2062 = vmatprep.subr.bf16.mxu0 %v3792_v58  ;;  %v4947_v57 = vld [vmem:[%s5319_s5] sm:$0xf] }
  0xc9   :  { %2103 = vmatprep.subr.bf16.mxu1 %v3795_v16  ;;  %v515_v58 = vrot.slane %v4947_v57, %v4204_v46  ;;  %v519_v16 = vrot.slane %v4947_v57, %v4207_v47 }
  0xcb   :  { %2063 = vmatpush1.bf16.msra.mxu0 %v3790_v18 }
  0xcc   :  { %2104 = vmatpush1.bf16.msra.mxu1 %v3793_v60  ;;  %2064 = vmatprep.subr.bf16.mxu0 %v3798_v61 }
  0xcd   :  { %2105 = vmatprep.subr.bf16.mxu1 %v3801_v27 }
  0xcf   :  { %2065 = vmatpush1.bf16.msra.mxu0 %v3796_v32 }
  0xd0   :  { %2106 = vmatpush1.bf16.msra.mxu1 %v3799_v62  ;;  %2066 = vmatprep.subr.bf16.mxu0 %v3804_v63 }
  0xd1   :  { %2107 = vmatprep.subr.bf16.mxu1 %v3807_v0 }
  0xd3   :  { %2067 = vmatpush1.bf16.msra.mxu0 %v3802_v1 }
  0xd4   :  { %2108 = vmatpush1.bf16.msra.mxu1 %v3805_v2  ;;  %2068 = vmatprep.subr.bf16.mxu0 %v3810_v3 }
  0xd5   :  { %2109 = vmatprep.subr.bf16.mxu1 %v3813_v4 }
  0xd7   :  { %2069 = vmatpush1.bf16.msra.mxu0 %v3808_v5 }
  0xd8   :  { %2110 = vmatpush1.bf16.msra.mxu1 %v3811_v6  ;;  %2070 = vmatprep.subr.bf16.mxu0 %v3816_v7 }
  0xd9   :  { %2111 = vmatprep.subr.bf16.mxu1 %v3819_v8 }
  0xdb   :  { %2071 = vmatpush1.bf16.msra.mxu0 %v3814_v9 }
  0xdc   :  { %2112 = vmatpush1.bf16.msra.mxu1 %v3817_v10  ;;  %2072 = vmatprep.subr.bf16.mxu0 %v3822_v11 }
  0xdd   :  { %2113 = vmatprep.subr.bf16.mxu1 %v3825_v12 }
  0xdf   :  { %2073 = vmatpush1.bf16.msra.mxu0 %v3820_v13 }
  0xe0   :  { %2114 = vmatpush1.bf16.msra.mxu1 %v3823_v15  ;;  %2074 = vmatprep.subr.bf16.mxu0 %v3828_v19 }
  0xe1   :  { %2115 = vmatprep.subr.bf16.mxu1 %v3831_v20 }
  0xe3   :  { %2075 = vmatpush2.bf16.msra.mxu0 %v3826_v22 }
  0xe4   :  { %2116 = vmatpush2.bf16.msra.mxu1 %v3829_v23  ;;  %2076 = vmatprep.subr.bf16.mxu0 %v3834_v24 }
  0xe5   :  { %2117 = vmatprep.subr.bf16.mxu1 %v3837_v25 }
  0xe7   :  { %2077 = vmatpush2.bf16.msra.mxu0 %v3832_v28 }
  0xe8   :  { %2118 = vmatpush2.bf16.msra.mxu1 %v3835_v29  ;;  %2078 = vmatprep.subr.bf16.mxu0 %v3840_v59 }
  0xe9   :  { %2119 = vmatprep.subr.bf16.mxu1 %v3843_v30 }
  0xeb   :  { %2079 = vmatpush2.bf16.msra.mxu0 %v3838_v31 }
  0xec   :  { %2120 = vmatpush2.bf16.msra.mxu1 %v3841_v33  ;;  %2080 = vmatprep.subr.bf16.mxu0 %v3846_v34 }
  0xed   :  { %2121 = vmatprep.subr.bf16.mxu1 %v3849_v35 }
  0xef   :  { %2081 = vmatpush2.bf16.msra.mxu0 %v3844_v36 }
  0xf0   :  { %2122 = vmatpush2.bf16.msra.mxu1 %v3847_v37  ;;  %2082 = vmatprep.subr.bf16.mxu0 %v3852_v41 }
  0xf1   :  { %2123 = vmatprep.subr.bf16.mxu1 %v3855_v42 }
  0xf3   :  { %2083 = vmatpush2.bf16.msra.mxu0 %v3850_v17  ;;  %v3876_v17 = vld [vmem:[%s5320_s8 + $0x74] ss:$8 sps:$4 sm:$0xff]  }
  0xf4   :  { %2124 = vmatpush2.bf16.msra.mxu1 %v3853_v26  ;;  %2084 = vmatprep.subr.bf16.mxu0 %v3858_v43  ;;  %v3874_v26 = vld [vmem:[%s5320_s8 + $0x70] ss:$8 sps:$4 sm:$0xff]  }
  0xf5   :  { %2125 = vmatprep.subr.bf16.mxu1 %v3861_v44 }
  0xf7   :  { %2085 = vmatpush2.bf16.msra.mxu0 %v3856_v45 }
  0xf8   :  { %2126 = vmatpush2.bf16.msra.mxu1 %v3859_v49  ;;  %2086 = vmatprep.subr.bf16.mxu0 %v3864_v50  ;;  %v3877_v50 = vld [vmem:[%s5320_s8 + $0x170] ss:$8 sps:$4 sm:$0xff]  }
  0xf9   :  { %2127 = vmatprep.subr.bf16.mxu1 %v3867_v51  ;;  %v3879_v51 = vld [vmem:[%s5320_s8 + $0x174] ss:$8 sps:$4 sm:$0xff]  }
  0xfb   :  { %2087 = vmatpush2.bf16.msra.mxu0 %v3862_v53 }
  0xfc   :  { %2128 = vmatpush2.bf16.msra.mxu1 %v3865_v14  ;;  %2088 = vmatprep.subr.bf16.mxu0 %v3870_v21 }
  0xfd   :  { %2129 = vmatprep.subr.bf16.mxu1 %v3873_v54 }
  0xff   :  { %2089 = vmatpush2.bf16.msra.mxu0 %v3868_v55  ;;  %v3882_v55 = vld [vmem:[%s5320_s8 + $0x64] ss:$8 sps:$4 sm:$0xff]  }
 0x100   :  { %2130 = vmatpush2.bf16.msra.mxu1 %v3871_v56  ;;  %2750 = vmatprep.subr.bf16.mxu0 %v3876_v17  ;;  %v3880_v56 = vld [vmem:[%s5320_s8 + $0x60] ss:$8 sps:$4 sm:$0xff]  }
 0x101   :  { %2791 = vmatprep.subr.bf16.mxu1 %v3879_v51  ;;  %v3930_v51 = vld [vmem:[%s5320_s8 + $0xe4] ss:$8 sps:$4 sm:$0xff]  }
 0x102   :  { %v1846_v18 = vpop.f32.mrf.mxu0  ;;  %2091 = vmatmul.mubr.bf16.vlgmr.msra.gmra.mxu0 %v4552_v38 }
 0x103   :  { %v1847_v60 = vadd.f32 %v1846_v18, %v515_v58  ;;  %v1887_v61 = vpop.f32.mrf.mxu1  ;;  %2132 = vmatmul.mubr.bf16.vlgmr.msra.gmra.mxu1 %v4556_v40  ;;  %2751 = vmatpush1.bf16.msra.mxu0 %v3874_v26  ;;  %v3883_v58 = vld [vmem:[%s5320_s8 + $0x160] ss:$8 sps:$4 sm:$0xff]  }
 0x104   :  { %v1848_v27 = vpop.f32.mrf.mxu0  ;;  %2792 = vmatpush1.bf16.msra.mxu1 %v3877_v50  ;;  %2752 = vmatprep.subr.bf16.mxu0 %v3882_v55  ;;  %v3925_v50 = vld [vmem:[%s5320_s8 + $0x1f0] ss:$8 sps:$4 sm:$0xff]   ;;  %v3939_v55 = vld [vmem:[%s5320_s8 + $0x1d4] ss:$8 sps:$4 sm:$0xff]  }
 0x105   :  { %v1888_v32 = vadd.f32 %v1887_v61, %v1847_v60  ;;  %v1849_v62 = vadd.f32 %v1848_v27, %v519_v16  ;;  %v1889_v63 = vpop.f32.mrf.mxu1  ;;  %v3885_v16 = vld [vmem:[%s5320_s8 + $0x164] ss:$8 sps:$4 sm:$0xff]  }
 0x106   :  { %v1850_v0 = vpop.f32.mrf.mxu0  ;;  %2793 = vmatprep.subr.bf16.mxu1 %v3885_v16  ;;  %v3942_v16 = vld [vmem:[%s5320_s8 + $0xc4] ss:$8 sps:$4 sm:$0xff]  }
 0x107   :  { %v1890_v1 = vadd.f32 %v1889_v63, %v1849_v62  ;;  %v1891_v2 = vpop.f32.mrf.mxu1  ;;  %2753 = vmatpush1.bf16.msra.mxu0 %v3880_v56  ;;  %v3934_v56 = vld [vmem:[%s5320_s8 + $0xd0] ss:$8 sps:$4 sm:$0xff]  }
 0x108   :  { %v1851_v3 = vpop.f32.mrf.mxu0  ;;  %v3891_v2 = vld [vmem:[%s5320_s8 + $0x154] ss:$8 sps:$4 sm:$0xff]   ;;  %2794 = vmatpush1.bf16.msra.mxu1 %v3883_v58  ;;  %v3937_v58 = vld [vmem:[%s5320_s8 + $0x1d0] ss:$8 sps:$4 sm:$0xff]  }
 0x109   :  { %v1892_v4 = vpop.f32.mrf.mxu1  ;;  %v3886_v3 = vld [vmem:[%s5320_s8 + $0x50] ss:$8 sps:$4 sm:$0xff]   ;;  %2795 = vmatprep.subr.bf16.mxu1 %v3891_v2  ;;  %v3954_v2 = vld [vmem:[%s5320_s8 + $0xa4] ss:$8 sps:$4 sm:$0xff]  }
 0x10a   :  { %v3889_v4 = vld [vmem:[%s5320_s8 + $0x150] ss:$8 sps:$4 sm:$0xff]  }
 0x10c   :  { %2796 = vmatpush1.bf16.msra.mxu1 %v3889_v4  ;;  %v3952_v4 = vld [vmem:[%s5320_s8 + $0xa0] ss:$8 sps:$4 sm:$0xff]  }
 0x142   :  { %v1928_v5 = vpop.f32.mrf.mxu0 }
 0x143   :  { %v1929_v6 = vadd.f32 %v1928_v5, %v1888_v32  ;;  %v1969_v7 = vpop.f32.mrf.mxu1 }
 0x144   :  { %v1930_v8 = vpop.f32.mrf.mxu0 }
 0x145   :  { %v4955_v9 = vadd.f32 %v1969_v7, %v1929_v6  ;;  %v1931_v38 = vadd.f32 %v1930_v8, %v1890_v1  ;;  %v1971_v10 = vpop.f32.mrf.mxu1  ;;  %v3888_v1 = vld [vmem:[%s5320_s8 + $0x54] ss:$8 sps:$4 sm:$0xff]  }
 0x146   :  { %v1932_v11 = vpop.f32.mrf.mxu0  ;;  %2754 = vmatprep.subr.bf16.mxu0 %v3888_v1  ;;  %v3951_v1 = vld [vmem:[%s5320_s8 + $0x1b4] ss:$8 sps:$4 sm:$0xff]  }
 0x147   :  { %v2141_v40 = vsel %vm2140_vm0, %v4955_v9, 0.0  ;;  %v2174_v12 = vmul.f32 %v4955_v9, %v4955_v9  ;;  %v4961_v13 = vadd.f32 %v1971_v10, %v1931_v38  ;;  %v1973_v15 = vpop.f32.mrf.mxu1  ;;  %2755 = vmatpush1.bf16.msra.mxu0 %v3886_v3  ;;  %v3894_v10 = vld [vmem:[%s5320_s8 + $0x44] ss:$8 sps:$4 sm:$0xff]  }
 0x148   :  { %v2142_v19 = vrot.slane %v2141_v40, 4  ;;  %v1933_v20 = vpop.f32.mrf.mxu0  ;;  %v3897_v11 = vld [vmem:[%s5320_s8 + $0x144] ss:$8 sps:$4 sm:$0xff]   ;;  %2756 = vmatprep.subr.bf16.mxu0 %v3894_v10  ;;  %v3963_v10 = vld [vmem:[%s5320_s8 + $0x194] ss:$8 sps:$4 sm:$0xff]  }
 0x149   :  { %v2178_v22 = vsel %vm2140_vm0, %v2174_v12, 0.0  ;;  %v2148_v23 = vsel %vm2140_vm0, %v4961_v13, 0.0  ;;  %v2175_v24 = vmul.f32 %v4961_v13, %v4961_v13  ;;  %v1974_v25 = vpop.f32.mrf.mxu1  ;;  %v3895_v12 = vld [vmem:[%s5320_s8 + $0x140] ss:$8 sps:$4 sm:$0xff]   ;;  %2797 = vmatprep.subr.bf16.mxu1 %v3897_v11  ;;  %v3957_v3 = vld [vmem:[%s5320_s8 + $0x1a4] ss:$8 sps:$4 sm:$0xff]  }
 0x14a   :  { %v2143_v28 = vadd.f32 %v2142_v19, %v2141_v40  ;;  %v2179_v29 = vrot.slane %v2178_v22, 4  ;;  %v2149_v59 = vrot.slane %v2148_v23, 4  ;;  %v3892_v40 = vld [vmem:[%s5320_s8 + $0x40] ss:$8 sps:$4 sm:$0xff]   ;;  %2798 = vmatpush1.bf16.msra.mxu1 %v3895_v12  ;;  %v3901_v25 = vld [vmem:[%s5320_s8 + $0x130] ss:$8 sps:$4 sm:$0xff]  }
 0x14b   :  { %v2185_v30 = vsel %vm2140_vm0, %v2175_v24, 0.0  ;;  %2757 = vmatpush1.bf16.msra.mxu0 %v3892_v40  ;;  %v3898_v24 = vld [vmem:[%s5320_s8 + $0x30] ss:$8 sps:$4 sm:$0xff]  }
 0x14c   :  { %v2144_v31 = vrot.slane %v2143_v28, 2  ;;  %v2180_v33 = vadd.f32 %v2179_v29, %v2178_v22  ;;  %v2150_v34 = vadd.f32 %v2149_v59, %v2148_v23  ;;  %v2186_v35 = vrot.slane %v2185_v30, 4  ;;  %v3900_v22 = vld [vmem:[%s5320_s8 + $0x34] ss:$8 sps:$4 sm:$0xff]   ;;  %v3909_v29 = vld [vmem:[%s5320_s8 + $0x124] ss:$8 sps:$4 sm:$0xff]  }
 0x14d   :  { %v3903_v23 = vld [vmem:[%s5320_s8 + $0x134] ss:$8 sps:$4 sm:$0xff]   ;;  %2758 = vmatprep.subr.bf16.mxu0 %v3900_v22  ;;  %v3904_v59 = vld [vmem:[%s5320_s8 + $0x20] ss:$8 sps:$4 sm:$0xff]   ;;  %v3958_v40 = vld [vmem:[%s5320_s8 + $0x90] ss:$8 sps:$4 sm:$0xff]  }
 0x14e   :  { %v2145_v36 = vadd.f32 %v2144_v31, %v2143_v28  ;;  %v2181_v37 = vrot.slane %v2180_v33, 2  ;;  %v2151_v41 = vrot.slane %v2150_v34, 2  ;;  %v2187_v42 = vadd.f32 %v2186_v35, %v2185_v30  ;;  %2799 = vmatprep.subr.bf16.mxu1 %v3903_v23  ;;  %v3906_v28 = vld [vmem:[%s5320_s8 + $0x24] ss:$8 sps:$4 sm:$0xff]   ;;  %v3907_v30 = vld [vmem:[%s5320_s8 + $0x120] ss:$8 sps:$4 sm:$0xff]  }
 0x14f   :  { %2759 = vmatpush1.bf16.msra.mxu0 %v3898_v24  ;;  %2800 = vmatpush1.bf16.msra.mxu1 %v3901_v25  ;;  %v3912_v31 = vld [vmem:[%s5320_s8 + $0x14] ss:$8 sps:$4 sm:$0xff]   ;;  %v3913_v35 = vld [vmem:[%s5320_s8 + $0x110] ss:$8 sps:$4 sm:$0xff]   ;;  %v3969_v23 = vld [vmem:[%s5320_s8 + $0x184] ss:$8 sps:$4 sm:$0xff]  }
 0x150   :  { %v2146_v43 = vrot.slane %v2145_v36, 1  ;;  %v2182_v44 = vadd.f32 %v2181_v37, %v2180_v33  ;;  %v2152_v45 = vadd.f32 %v2151_v41, %v2150_v34  ;;  %v2188_v49 = vrot.slane %v2187_v42, 2  ;;  %2760 = vmatprep.subr.bf16.mxu0 %v3906_v28  ;;  %2801 = vmatprep.subr.bf16.mxu1 %v3909_v29  ;;  %v3915_v33 = vld [vmem:[%s5320_s8 + $0x114] ss:$8 sps:$4 sm:$0xff]   ;;  %v3910_v34 = vld [vmem:[%s5320_s8 + $0x10] ss:$8 sps:$4 sm:$0xff]  }
 0x151   :  { %v3921_v37 = vld [vmem:[%s5320_s8 + $0x104] ss:$8 sps:$4 sm:$0xff]   ;;  %v3916_v41 = vld [vmem:[%s5320_s8] ss:$8 sps:$4 sm:$0xff]   ;;  %v523_v29 = vrot.slane %v4947_v57, %v4210_v48 }
 0x152   :  { %v2147_v53 = vadd.f32 %v2146_v43, %v2145_v36  ;;  %v2183_v14 = vrot.slane %v2182_v44, 1  ;;  %v2153_v21 = vrot.slane %v2152_v45, 1  ;;  %v2189_v54 = vadd.f32 %v2188_v49, %v2187_v42  ;;  %v3918_v36 = vld [vmem:[%s5320_s8 + $0x4] ss:$8 sps:$4 sm:$0xff]   ;;  %v3919_v42 = vld [vmem:[%s5320_s8 + $0x100] ss:$8 sps:$4 sm:$0xff]  }
 0x153   :  { %2761 = vmatpush1.bf16.msra.mxu0 %v3904_v59  ;;  %2802 = vmatpush1.bf16.msra.mxu1 %v3907_v30  ;;  %v3922_v49 = vld [vmem:[%s5320_s8 + $0xf0] ss:$8 sps:$4 sm:$0xff]   ;;  %v3964_v25 = vld [vmem:[%s5320_s8 + $0x80] ss:$8 sps:$4 sm:$0xff]   ;;  %v527_v59 = vrot.slane %v4947_v57, %v4219_v52 }
 0x154   :  { %v4993_v18 = vmul.f32 0.5, %v2147_v53  ;;  %v2184_v60 = vadd.f32 %v2183_v14, %v2182_v44  ;;  %v2154_v61 = vadd.f32 %v2153_v21, %v2152_v45  ;;  %v2190_v27 = vrot.slane %v2189_v54, 1  ;;  %2762 = vmatprep.subr.bf16.mxu0 %v3912_v31  ;;  %2803 = vmatprep.subr.bf16.mxu1 %v3915_v33  ;;  %v3924_v44 = vld [vmem:[%s5320_s8 + $0xf4] ss:$8 sps:$4 sm:$0xff]   ;;  %v3933_v53 = vld [vmem:[%s5320_s8 + $0x1e4] ss:$8 sps:$4 sm:$0xff]  }
 0x155   :  { %v3927_v45 = vld [vmem:[%s5320_s8 + $0x1f4] ss:$8 sps:$4 sm:$0xff]   ;;  %v3928_v14 = vld [vmem:[%s5320_s8 + $0xe0] ss:$8 sps:$4 sm:$0xff]  }
 0x156   :  { %v2206_v32 = vmul.f32 0.5, %v2184_v60  ;;  %v2210_v62 = vmul.f32 %v4993_v18, %v4993_v18  ;;  %v4997_v63 = vmul.f32 0.5, %v2154_v61  ;;  %v2191_v0 = vadd.f32 %v2190_v27, %v2189_v54  ;;  %v3931_v21 = vld [vmem:[%s5320_s8 + $0x1e0] ss:$8 sps:$4 sm:$0xff]   ;;  %v3936_v54 = vld [vmem:[%s5320_s8 + $0xd4] ss:$8 sps:$4 sm:$0xff]  }
 0x157   :  { %2763 = vmatpush1.bf16.msra.mxu0 %v3910_v34  ;;  %2804 = vmatpush1.bf16.msra.mxu1 %v3913_v35  ;;  %v3945_v60 = vld [vmem:[%s5320_s8 + $0x1c4] ss:$8 sps:$4 sm:$0xff]   ;;  %v3940_v61 = vld [vmem:[%s5320_s8 + $0xc0] ss:$8 sps:$4 sm:$0xff]  }
 0x158   :  { %v2214_v5 = vsub.f32 %v2206_v32, %v2210_v62  ;;  %v2207_v6 = vmul.f32 0.5, %v2191_v0  ;;  %v2211_v7 = vmul.f32 %v4997_v63, %v4997_v63  ;;  %2764 = vmatprep.subr.bf16.mxu0 %v3918_v36  ;;  %2805 = vmatprep.subr.bf16.mxu1 %v3921_v37  ;;  %v3943_v27 = vld [vmem:[%s5320_s8 + $0x1c0] ss:$8 sps:$4 sm:$0xff]   ;;  %v3946_v32 = vld [vmem:[%s5320_s8 + $0xb0] ss:$8 sps:$4 sm:$0xff]  }
 0x159   :  { %v3948_v62 = vld [vmem:[%s5320_s8 + $0xb4] ss:$8 sps:$4 sm:$0xff]   ;;  %v3949_v0 = vld [vmem:[%s5320_s8 + $0x1b0] ss:$8 sps:$4 sm:$0xff]   ;;  %v3967_v28 = vld [vmem:[%s5320_s8 + $0x180] ss:$8 sps:$4 sm:$0xff]  }
 0x15a   :  { %v2218_v8 = vmax.f32 %v2214_v5, 0.0  ;;  %v2215_v38 = vsub.f32 %v2207_v6, %v2211_v7  ;;  %v3960_v6 = vld [vmem:[%s5320_s8 + $0x94] ss:$8 sps:$4 sm:$0xff]  }
 0x15b   :  { %2765 = vmatpush1.bf16.msra.mxu0 %v3916_v41  ;;  %2806 = vmatpush1.bf16.msra.mxu1 %v3919_v42 }
 0x15c   :  { %v2223_v15 = vadd.f32 1e-05, %v2218_v8  ;;  %v2219_v19 = vmax.f32 %v2215_v38, 0.0  ;;  %2766 = vmatprep.subr.bf16.mxu0 %v3924_v44  ;;  %2807 = vmatprep.subr.bf16.mxu1 %v3927_v45  ;;  %v3955_v8 = vld [vmem:[%s5320_s8 + $0x1a0] ss:$8 sps:$4 sm:$0xff]  }
 0x15e   :  { %v2224_v20 = vadd.f32 1e-05, %v2219_v19  ;;  %3986 = vrsqrt.f32 %v2223_v15  ;;  %v3966_v15 = vld [vmem:[%s5320_s8 + $0x84] ss:$8 sps:$4 sm:$0xff]  }
 0x15f   :  { %2767 = vmatpush2.bf16.msra.mxu0 %v3922_v49  ;;  %2808 = vmatpush2.bf16.msra.mxu1 %v3925_v50 }
 0x160   :  { %3988 = vrsqrt.f32 %v2224_v20  ;;  %2768 = vmatprep.subr.bf16.mxu0 %v3930_v51  ;;  %2809 = vmatprep.subr.bf16.mxu1 %v3933_v53  ;;  %v3961_v20 = vld [vmem:[%s5320_s8 + $0x190] ss:$8 sps:$4 sm:$0xff]  }
 0x163   :  { %2769 = vmatpush2.bf16.msra.mxu0 %v3928_v14  ;;  %2810 = vmatpush2.bf16.msra.mxu1 %v3931_v21 }
 0x164   :  { %2770 = vmatprep.subr.bf16.mxu0 %v3936_v54  ;;  %2811 = vmatprep.subr.bf16.mxu1 %v3939_v55 }
 0x167   :  { %2771 = vmatpush2.bf16.msra.mxu0 %v3934_v56  ;;  %2812 = vmatpush2.bf16.msra.mxu1 %v3937_v58 }
 0x168   :  { %2772 = vmatprep.subr.bf16.mxu0 %v3942_v16  ;;  %2813 = vmatprep.subr.bf16.mxu1 %v3945_v60 }
 0x16b   :  { %v5073_v17 = vpop.eup %3986  ;;  %2773 = vmatpush2.bf16.msra.mxu0 %v3940_v61  ;;  %2814 = vmatpush2.bf16.msra.mxu1 %v3943_v27 }
 0x16c   :  { %2774 = vmatprep.subr.bf16.mxu0 %v3948_v62  ;;  %2815 = vmatprep.subr.bf16.mxu1 %v3951_v1 }
 0x16d   :  { %v5075_v26 = vpop.eup %3988 }
 0x16e   :  { %v2235_v43 = vcombine.low %v5073_v17, %v5075_v26 }
 0x16f   :  { %2775 = vmatpush2.bf16.msra.mxu0 %v3946_v32  ;;  %2816 = vmatpush2.bf16.msra.mxu1 %v3949_v0 }
 0x170   :  { %2776 = vmatprep.subr.bf16.mxu0 %v3954_v2  ;;  %2817 = vmatprep.subr.bf16.mxu1 %v3957_v3 }
 0x173   :  { %2777 = vmatpush2.bf16.msra.mxu0 %v3952_v4  ;;  %2818 = vmatpush2.bf16.msra.mxu1 %v3955_v8 }
 0x174   :  { %2778 = vmatprep.subr.bf16.mxu0 %v3960_v6  ;;  %2819 = vmatprep.subr.bf16.mxu1 %v3963_v10 }
 0x177   :  { %2779 = vmatpush2.bf16.msra.mxu0 %v3958_v40  ;;  %2820 = vmatpush2.bf16.msra.mxu1 %v3961_v20 }
 0x178   :  { %2780 = vmatprep.subr.bf16.mxu0 %v3966_v15  ;;  %2821 = vmatprep.subr.bf16.mxu1 %v3969_v23 }
 0x17b   :  { %2781 = vmatpush2.bf16.msra.mxu0 %v3964_v25  ;;  %2822 = vmatpush2.bf16.msra.mxu1 %v3967_v28 }
 0x182   :  { %v2010_v5 = vpop.f32.mrf.mxu0 }
 0x183   :  { %v2051_v7 = vpop.f32.mrf.mxu1  ;;  %v2011_v30 = vadd.f32 %v2010_v5, %v523_v29 }
 0x184   :  { %v2012_v38 = vpop.f32.mrf.mxu0 }
 0x185   :  { %v2053_v11 = vpop.f32.mrf.mxu1  ;;  %v2013_v31 = vadd.f32 %v2012_v38, %v527_v59  ;;  %v2052_v33 = vadd.f32 %v2051_v7, %v2011_v30 }
 0x186   :  { %v2014_v12 = vpop.f32.mrf.mxu0 }
 0x187   :  { %v2055_v19 = vpop.f32.mrf.mxu1  ;;  %v2054_v35 = vadd.f32 %v2053_v11, %v2013_v31 }
 0x188   :  { %v2015_v22 = vpop.f32.mrf.mxu0 }
 0x189   :  { %v2056_v24 = vpop.f32.mrf.mxu1 }
 0x1c2   :  { %v2092_v34 = vpop.f32.mrf.mxu0 }
 0x1c3   :  { %v2093_v36 = vadd.f32 %v2092_v34, %v2052_v33  ;;  %v2133_v37 = vpop.f32.mrf.mxu1 }
 0x1c4   :  { %v2094_v41 = vpop.f32.mrf.mxu0 }
 0x1c5   :  { %v5179_v42 = vadd.f32 %v2133_v37, %v2093_v36  ;;  %v2095_v44 = vadd.f32 %v2094_v41, %v2054_v35  ;;  %v2135_v45 = vpop.f32.mrf.mxu1  ;;  %v3999_v37 = vmov 1966171168  }
 0x1c6   :  { %v2096_v49 = vpop.f32.mrf.mxu0  ;;  %v2238_v41 = vunpack.c.l.s4 %v3999_v37  ;;  %v3983_v37 = vld [vmem:[%s5323_s12 + $0x8] sm:$0xff]  }
 0x1c7   :  { %v2155_v50 = vsel %vm2140_vm0, %v5179_v42, 0.0  ;;  %v2176_v51 = vmul.f32 %v5179_v42, %v5179_v42  ;;  %v5185_v57 = vadd.f32 %v2135_v45, %v2095_v44  ;;  %v2137_v53 = vpop.f32.mrf.mxu1 }
 0x1c8   :  { %v2156_v14 = vrot.slane %v2155_v50, 4  ;;  %v2097_v21 = vpop.f32.mrf.mxu0  ;;  %v2239_v44 = vunpack.c.0.s8 %v2238_v41  ;;  %v3984_v41 = vld [vmem:[%s5323_s12 + $0x40] sm:$0xff]  }
 0x1c9   :  { %v2192_v54 = vsel %vm2140_vm0, %v2176_v51, 0.0  ;;  %v2162_v55 = vsel %vm2140_vm0, %v5185_v57, 0.0  ;;  %v2177_v56 = vmul.f32 %v5185_v57, %v5185_v57  ;;  %v2138_v58 = vpop.f32.mrf.mxu1 }
 0x1ca   :  { %v2157_v16 = vadd.f32 %v2156_v14, %v2155_v50  ;;  %v2193_v60 = vrot.slane %v2192_v54, 4  ;;  %v2163_v61 = vrot.slane %v2162_v55, 4  ;;  %v5194_v49 = vsub.s32 %v2239_v44, %v4189_v39  ;;  %v3985_v44 = vld [vmem:[%s5323_s12] sm:$0xff]  }
 0x1cb   :  { %v2199_v27 = vsel %vm2140_vm0, %v2177_v56, 0.0 }
 0x1cc   :  { %v2158_v32 = vrot.slane %v2157_v16, 2  ;;  %v2194_v62 = vadd.f32 %v2193_v60, %v2192_v54  ;;  %v2164_v0 = vadd.f32 %v2163_v61, %v2162_v55  ;;  %v2200_v1 = vrot.slane %v2199_v27, 4  ;;  %v2222_v54 = vld [vmem:[%s5321_s6] sm:$0xf] }
 0x1cd   :  { %v2243_v53 = vrot.slane %v2235_v43, %v5194_v49 }
 0x1ce   :  { %v2159_v2 = vadd.f32 %v2158_v32, %v2157_v16  ;;  %v2195_v3 = vrot.slane %v2194_v62, 2  ;;  %v2165_v4 = vrot.slane %v2164_v0, 2  ;;  %v2201_v5 = vadd.f32 %v2200_v1, %v2199_v27 }
 0x1d0   :  { %v2160_v6 = vrot.slane %v2159_v2, 1  ;;  %v2196_v7 = vadd.f32 %v2195_v3, %v2194_v62  ;;  %v2166_v8 = vadd.f32 %v2165_v4, %v2164_v0  ;;  %v2202_v38 = vrot.slane %v2201_v5, 2 }
 0x1d2   :  { %v2161_v10 = vadd.f32 %v2160_v6, %v2159_v2  ;;  %v2197_v11 = vrot.slane %v2196_v7, 1  ;;  %v2167_v40 = vrot.slane %v2166_v8, 1  ;;  %v2203_v12 = vadd.f32 %v2202_v38, %v2201_v5  ;;  %v2261_v5 = vld [vmem:[%s5322_s7] sm:$0xf] }
 0x1d4   :  { %v2172_v15 = vmul.f32 0.5, %v2161_v10  ;;  %v2198_v19 = vadd.f32 %v2197_v11, %v2196_v7  ;;  %v2168_v20 = vadd.f32 %v2167_v40, %v2166_v8  ;;  %v2204_v22 = vrot.slane %v2203_v12, 1 }
 0x1d6   :  { %v2208_v23 = vmul.f32 0.5, %v2198_v19  ;;  %v2212_v24 = vmul.f32 %v2172_v15, %v2172_v15  ;;  %v2173_v25 = vmul.f32 0.5, %v2168_v20  ;;  %v2205_v28 = vadd.f32 %v2204_v22, %v2203_v12 }
 0x1d8   :  { %v2216_v29 = vsub.f32 %v2208_v23, %v2212_v24  ;;  %v2209_v59 = vmul.f32 0.5, %v2205_v28  ;;  %v2213_v30 = vmul.f32 %v2173_v25, %v2173_v25  ;;  %v3972_v24 = vld [vmem:[%s5323_s12 + $0x70] sm:$0xff]   ;;  %v3974_v28 = vld [vmem:[%s5323_s12 + $0x68] sm:$0xff]  }
 0x1da   :  { %v2220_v31 = vmax.f32 %v2216_v29, 0.0  ;;  %v2217_v33 = vsub.f32 %v2209_v59, %v2213_v30  ;;  %v3975_v29 = vld [vmem:[%s5323_s12 + $0x28] sm:$0xff]   ;;  %v3976_v59 = vld [vmem:[%s5323_s12 + $0x60] sm:$0xff]  }
 0x1db   :  { %v3977_v30 = vld [vmem:[%s5323_s12 + $0x20] sm:$0xff]  }
 0x1dc   :  { %v2225_v34 = vadd.f32 1e-05, %v2220_v31  ;;  %v2221_v35 = vmax.f32 %v2217_v33, 0.0  ;;  %v3978_v31 = vld [vmem:[%s5323_s12 + $0x58] sm:$0xff]  }
 0x1dd   :  { %v3979_v33 = vld [vmem:[%s5323_s12 + $0x18] sm:$0xff]  }
 0x1de   :  { %v2226_v36 = vadd.f32 1e-05, %v2221_v35  ;;  %3990 = vrsqrt.f32 %v2225_v34  ;;  %v3980_v34 = vld [vmem:[%s5323_s12 + $0x50] sm:$0xff]  }
 0x1df   :  { %v3981_v35 = vld [vmem:[%s5323_s12 + $0x10] sm:$0xff]  }
 0x1e0   :  { %3992 = vrsqrt.f32 %v2226_v36  ;;  %v3982_v36 = vld [vmem:[%s5323_s12 + $0x48] sm:$0xff]  }
 0x1eb   :  { %v3991_v45 = vpop.eup %3990 }
 0x1ed   :  { %v3993_v50 = vpop.eup %3992 }
 0x1ee   :  { %v2236_v51 = vcombine.low %v3991_v45, %v3993_v50  ;;  %v2418_v45 = vld [vmem:[%s5324_s9] sm:$0x3] }
 0x1ef   :  { %v2423_v50 = vrot.slane %v2418_v45, %v4204_v46 }
 0x1f0   :  { %v2250_v14 = vrot.slane %v2236_v51, %v5194_v49  ;;  %v2427_v51 = vrot.slane %v2418_v45, %v4207_v47  ;;  %v2872_v45 = vld [vmem:[%s5325_s10] sm:$0x3] }
 0x1f2   :  { %v2251_v21 = vcombine.low %v2243_v53, %v2250_v14 }
 0x1f4   :  { %v2258_v55 = vrot.slane %v2251_v21, %v5194_v49 }
 0x1f6   :  { %v2260_v56 = vmul.f32 %v2258_v55, %v2222_v54 }
 0x1f8   :  { %v2274_v39 = vrot.slane %v2260_v56, %v4210_v48  ;;  %v2278_v58 = vrot.slane %v2260_v56, %v4219_v52  ;;  %v2266_v16 = vrot.slane %v2260_v56, %v4204_v46  ;;  %v2270_v60 = vrot.slane %v2260_v56, %v4207_v47 }
 0x1fa   :  { %v2285_v17 = vmul.f32 %v2274_v39, %v2172_v15  ;;  %v2286_v26 = vmul.f32 %v2278_v58, %v2173_v25  ;;  %v2283_v43 = vmul.f32 %v2266_v16, %v4993_v18  ;;  %v2284_v61 = vmul.f32 %v2270_v60, %v4997_v63  ;;  %v3973_v25 = vld [vmem:[%s5323_s12 + $0x30] sm:$0xff]  }
 0x1fb   :  { %v2318_v27 = vmul.f32 %v2270_v60, %v4961_v13  ;;  %v2317_v32 = vmul.f32 %v2266_v16, %v4955_v9  ;;  %v2319_v62 = vmul.f32 %v2274_v39, %v5179_v42  ;;  %v2320_v13 = vmul.f32 %v2278_v58, %v5185_v57 }
 0x1fc   :  { %v2292_v0 = vcombine.low %v2285_v17, %v2286_v26  ;;  %v2291_v1 = vcombine.low %v2283_v43, %v2284_v61 }
 0x1fe   :  { %v2306_v2 = vrot.slane %v2292_v0, %v5194_v49  ;;  %v2299_v3 = vrot.slane %v2291_v1, %v5194_v49 }
 0x200   :  { %v2307_v4 = vcombine.low %v2299_v3, %v2306_v2 }
 0x202   :  { %v2314_v18 = vrot.slane %v2307_v4, %v5194_v49 }
 0x204   :  { %v2316_v63 = vsub.f32 %v2261_v5, %v2314_v18 }
 0x206   :  { %v2329_v9 = vrot.slane %v2316_v63, %v4207_v47  ;;  %v2337_v42 = vrot.slane %v2316_v63, %v4219_v52  ;;  %v2325_v6 = vrot.slane %v2316_v63, %v4204_v46  ;;  %v2333_v7 = vrot.slane %v2316_v63, %v4210_v48  ;;  %v3970_v48 = vld [vmem:[%s5323_s12 + $0x78] sm:$0xff]  }
 0x207   :  { %v3971_v52 = vld [vmem:[%s5323_s12 + $0x38] sm:$0xff]   ;;  %3466 = vmatprep.subr.bf16.mxu0 %v3970_v48 }
 0x208   :  { %v2343_v8 = vadd.f32 %v2329_v9, %v2318_v27  ;;  %v2345_v38 = vadd.f32 %v2337_v42, %v2320_v13  ;;  %v2342_v10 = vadd.f32 %v2325_v6, %v2317_v32  ;;  %v2344_v11 = vadd.f32 %v2333_v7, %v2319_v62 }
 0x20a   :  { %v2347_v40 = vmax.f32 %v2343_v8, 0.0  ;;  %v2349_v12 = vmax.f32 %v2345_v38, 0.0  ;;  %v2346_v15 = vmax.f32 %v2342_v10, 0.0  ;;  %v2348_v19 = vmax.f32 %v2344_v11, 0.0 }
 0x20c   :  { %v2351_v20 = vpack.c.bf16 %v2347_v40, %v2347_v40  ;;  %v2353_v22 = vpack.c.bf16 %v2349_v12, %v2349_v12  ;;  %v2350_v23 = vpack.c.bf16 %v2346_v15, %v2346_v15  ;;  %v2352_v57 = vpack.c.bf16 %v2348_v19, %v2348_v19 }
 0x20e   :  { %2782 = vmatprep.mubr.bf16.mxu0 %v2351_v20  ;;  %2823 = vmatprep.mubr.bf16.mxu1 %v2353_v22 }
 0x20f   :  { %2783 = vmatmul.mubr.bf16.vlgmr.msra.gmra.mxu0 %v2350_v23  ;;  %2824 = vmatmul.mubr.bf16.vlgmr.msra.gmra.mxu1 %v2352_v57 }
 0x210   :  { %3467 = vmatpush3.bf16.msra.mxu0 %v3971_v52 }
 0x211   :  { %3468 = vmatprep.subr.bf16.mxu0 %v3972_v24 }
 0x214   :  { %3469 = vmatpush3.bf16.msra.mxu0 %v3973_v25 }
 0x215   :  { %3470 = vmatprep.subr.bf16.mxu0 %v3974_v28 }
 0x218   :  { %3471 = vmatpush3.bf16.msra.mxu0 %v3975_v29 }
 0x219   :  { %3472 = vmatprep.subr.bf16.mxu0 %v3976_v59 }
 0x21c   :  { %3473 = vmatpush3.bf16.msra.mxu0 %v3977_v30 }
 0x21d   :  { %3474 = vmatprep.subr.bf16.mxu0 %v3978_v31 }
 0x220   :  { %3475 = vmatpush3.bf16.msra.mxu0 %v3979_v33 }
 0x221   :  { %3476 = vmatprep.subr.bf16.mxu0 %v3980_v34 }
 0x224   :  { %3477 = vmatpush3.bf16.msra.mxu0 %v3981_v35 }
 0x225   :  { %3478 = vmatprep.subr.bf16.mxu0 %v3982_v36 }
 0x228   :  { %3479 = vmatpush3.bf16.msra.mxu0 %v3983_v37 }
 0x229   :  { %3480 = vmatprep.subr.bf16.mxu0 %v3984_v41 }
 0x22c   :  { %3481 = vmatpush3.bf16.msra.mxu0 %v3985_v44 }
 0x2cf   :  { %v2784_v53 = vpop.f32.mrf.mxu0  ;;  %v2825_v14 = vpop.f32.mrf.mxu1 }
 0x2d0   :  { %v2785_v21 = vadd.f32 %v2784_v53, %v2423_v50 }
 0x2d1   :  { %v2786_v54 = vpop.f32.mrf.mxu0  ;;  %v2827_v55 = vpop.f32.mrf.mxu1 }
 0x2d2   :  { %v5278_v56 = vadd.f32 %v2825_v14, %v2785_v21  ;;  %v2787_v39 = vadd.f32 %v2786_v54, %v2427_v51 }
 0x2d3   :  { %v2788_v58 = vpop.f32.mrf.mxu0  ;;  %v2829_v16 = vpop.f32.mrf.mxu1 }
 0x2d4   :  { %v2832_v60 = vsel %vm2140_vm0, %v5278_v56, 0.0  ;;  %v2848_v17 = vmul.f32 %v5278_v56, %v5278_v56  ;;  %v5284_v26 = vadd.f32 %v2827_v55, %v2787_v39  ;;  %v2896_v58 = vld [vmem:[%s5326_s11] sm:$0x3] }
 0x2d5   :  { %v2833_v43 = vrot.slane %v2832_v60, 4  ;;  %v2789_v61 = vpop.f32.mrf.mxu0  ;;  %v2830_v27 = vpop.f32.mrf.mxu1 }
 0x2d6   :  { %v2850_v32 = vsel %vm2140_vm0, %v2848_v17, 0.0  ;;  %v2839_v62 = vsel %vm2140_vm0, %v5284_v26, 0.0  ;;  %v2849_v0 = vmul.f32 %v5284_v26, %v5284_v26 }
 0x2d7   :  { %v2834_v1 = vadd.f32 %v2833_v43, %v2832_v60  ;;  %v2851_v2 = vrot.slane %v2850_v32, 4  ;;  %v2840_v3 = vrot.slane %v2839_v62, 4 }
 0x2d8   :  { %v2857_v4 = vsel %vm2140_vm0, %v2849_v0, 0.0 }
 0x2d9   :  { %v2835_v5 = vrot.slane %v2834_v1, 2  ;;  %v2852_v18 = vadd.f32 %v2851_v2, %v2850_v32  ;;  %v2841_v63 = vadd.f32 %v2840_v3, %v2839_v62  ;;  %v2858_v13 = vrot.slane %v2857_v4, 4 }
 0x2db   :  { %v2836_v9 = vadd.f32 %v2835_v5, %v2834_v1  ;;  %v2853_v42 = vrot.slane %v2852_v18, 2  ;;  %v2842_v6 = vrot.slane %v2841_v63, 2  ;;  %v2859_v7 = vadd.f32 %v2858_v13, %v2857_v4 }
 0x2dd   :  { %v2837_v8 = vrot.slane %v2836_v9, 1  ;;  %v2854_v38 = vadd.f32 %v2853_v42, %v2852_v18  ;;  %v2843_v10 = vadd.f32 %v2842_v6, %v2841_v63  ;;  %v2860_v11 = vrot.slane %v2859_v7, 2 }
 0x2df   :  { %v2838_v40 = vadd.f32 %v2837_v8, %v2836_v9  ;;  %v2855_v12 = vrot.slane %v2854_v38, 1  ;;  %v2844_v15 = vrot.slane %v2843_v10, 1  ;;  %v2861_v19 = vadd.f32 %v2860_v11, %v2859_v7 }
 0x2e1   :  { %v2846_v20 = vmul.f32 0.5, %v2838_v40  ;;  %v2856_v22 = vadd.f32 %v2855_v12, %v2854_v38  ;;  %v2845_v23 = vadd.f32 %v2844_v15, %v2843_v10  ;;  %v2862_v57 = vrot.slane %v2861_v19, 1 }
 0x2e3   :  { %v2864_v48 = vmul.f32 0.5, %v2856_v22  ;;  %v2866_v52 = vmul.f32 %v2846_v20, %v2846_v20  ;;  %v2847_v24 = vmul.f32 0.5, %v2845_v23  ;;  %v2863_v25 = vadd.f32 %v2862_v57, %v2861_v19 }
 0x2e5   :  { %v2868_v28 = vsub.f32 %v2864_v48, %v2866_v52  ;;  %v2865_v29 = vmul.f32 0.5, %v2863_v25  ;;  %v2867_v59 = vmul.f32 %v2847_v24, %v2847_v24 }
 0x2e7   :  { %v2870_v30 = vmax.f32 %v2868_v28, 0.0  ;;  %v2869_v31 = vsub.f32 %v2865_v29, %v2867_v59 }
 0x2e9   :  { %v2873_v33 = vadd.f32 1e-05, %v2870_v30  ;;  %v2871_v34 = vmax.f32 %v2869_v31, 0.0 }
 0x2eb   :  { %v2874_v35 = vadd.f32 1e-05, %v2871_v34  ;;  %3994 = vrsqrt.f32 %v2873_v33 }
 0x2ed   :  { %3996 = vrsqrt.f32 %v2874_v35 }
 0x2f8   :  { %v3995_v36 = vpop.eup %3994 }
 0x2fa   :  { %v3997_v37 = vpop.eup %3996 }
 0x2fb   :  { %v2879_v41 = vcombine.low %v3995_v36, %v3997_v37 }
 0x2fd   :  { %v2886_v44 = vrot.slane %v2879_v41, %v5194_v49 }
 0x2ff   :  { %v2893_v50 = vrot.slane %v2886_v44, %v5194_v49 }
 0x301   :  { %v2895_v51 = vmul.f32 %v2893_v50, %v2872_v45 }
 0x303   :  { %v2901_v53 = vrot.slane %v2895_v51, %v4204_v46  ;;  %v2905_v14 = vrot.slane %v2895_v51, %v4207_v47 }
 0x305   :  { %v2908_v21 = vmul.f32 %v2901_v53, %v2846_v20  ;;  %v2909_v54 = vmul.f32 %v2905_v14, %v2847_v24  ;;  %v2930_v17 = vmul.f32 %v2905_v14, %v5284_v26  ;;  %v2929_v61 = vmul.f32 %v2901_v53, %v5278_v56 }
 0x307   :  { %v2912_v55 = vcombine.low %v2908_v21, %v2909_v54 }
 0x309   :  { %v2919_v39 = vrot.slane %v2912_v55, %v5194_v49 }
 0x30b   :  { %v2926_v16 = vrot.slane %v2919_v39, %v5194_v49  ;;  %v3449_v49 = vld [vmem:[%s5327_s13] ss:$0 sm:$0xff] }
 0x30d   :  { %v2928_v60 = vsub.f32 %v2896_v58, %v2926_v16 }
 0x30f   :  { %v2939_v43 = vrot.slane %v2928_v60, %v4207_v47  ;;  %v2935_v27 = vrot.slane %v2928_v60, %v4204_v46 }
 0x311   :  { %v2943_v32 = vadd.f32 %v2939_v43, %v2930_v17  ;;  %v2942_v62 = vadd.f32 %v2935_v27, %v2929_v61 }
 0x313   :  { %v2945_v0 = vmax.f32 %v2943_v32, 0.0  ;;  %v2944_v1 = vmax.f32 %v2942_v62, 0.0 }
 0x315   :  { %v2947_v2 = vpack.c.bf16 %v2945_v0, %v2945_v0  ;;  %v2946_v3 = vpack.c.bf16 %v2944_v1, %v2944_v1 }
 0x317   :  { %3115 = vmatprep.mubr.bf16.mxu0 %v2947_v2 }
 0x318   :  { %3116 = vmatmul.mubr.bf16.vlgmr.msra.gmra.mxu0 %v2946_v3 }
 0x3d8   :  { %v3482_v4 = vpop.f32.mrf.mxu0 }
 0x3da   :  { %v3483_v26 = vpop.f32.mrf.mxu0 }
 0x3db   :  { %v3484_v5 = vadd.f32 %v3483_v26, %v3482_v4 }
 0x3dc   :  { %v3485_v47 = vpop.f32.mrf.mxu0 }
 0x3dd   :  { %v3118_v56 = vadd.f32 %v3484_v5, %v3449_v49 }
 0x3de   :  { %v3486_v18 = vpop.f32.mrf.mxu0 }
 0x3df   :  { %3124 = vst.msk [vmem:[%s5328_s14] sm:$0x3] %vm3123_vm1, %v3118_v56 }

</bundles_post_ra>
